<compile_context>
chip_gen: v7x
topology: tpu7x:2x2x1
jax: 0.10.0
libtpu: 0.0.40
codegen_flags: <defaults>
</compile_context>

<pallas_src>
import functools

import jax
import jax.numpy as jnp
from jax import lax
from jax.experimental import pallas as pl
from jax.experimental.pallas import tpu as pltpu


def _attention_k_kernel(x_ref, mask_ref, wih_ref, whh_ref, b_ref,
                        out_ref, att_ref, *, threshold):
    TB, S, F = x_ref.shape

    x = x_ref[...]                      # (TB, S, F) f32
    mask = mask_ref[...]                # (TB, S)    f32 (1 = keep step, 0 = masked)
    wih = wih_ref[...]                  # (8, F)     gate rows [i,f,g,o]_fwd then _bwd
    whh = whh_ref[...]                  # (1, 8)     recurrent weights (hidden size 1)
    b = b_ref[...]                      # (1, 8)     b_ih + b_hh per gate / direction

    # ---- bidirectional LSTM (hidden = 1) -----------------------------------
    # Input contribution of every gate for every (batch, step): output width is
    # only 8, so use VPU multiply + lane reduction instead of a narrow-N MXU
    # matmul.  pre[k]: (TB, S), step on the lane axis (lane-dense).
    pre = []
    for k in range(8):
        wk = wih[k:k + 1, :].reshape(1, 1, F)                   # (1, 1, F)
        pre.append(jnp.sum(x * wk, axis=2) + b[:, k:k + 1])     # (TB, S)

    col = lax.broadcasted_iota(jnp.int32, (TB, S), 1)           # step index per lane

    def lstm_cell(t, h, c, koff):
        gi = jax.nn.sigmoid(pre[koff + 0][:, t:t + 1] + h * whh[:, koff + 0:koff + 1])
        gf = jax.nn.sigmoid(pre[koff + 1][:, t:t + 1] + h * whh[:, koff + 1:koff + 2])
        gg = jnp.tanh(pre[koff + 2][:, t:t + 1] + h * whh[:, koff + 2:koff + 3])
        go = jax.nn.sigmoid(pre[koff + 3][:, t:t + 1] + h * whh[:, koff + 3:koff + 4])
        c = gf * c + gi * gg
        h = go * jnp.tanh(c)
        return h, c

    zero = jnp.zeros((TB, 1), jnp.float32)
    h_f, c_f, h_b, c_b = zero, zero, zero, zero
    att_logits = jnp.zeros((TB, S), jnp.float32)

    # Static unroll: S is a small compile-time constant.  Forward and reverse
    # directions advance inside the same loop (indices t and S-1-t).
    for t in range(S):
        tr = S - 1 - t
        h_f, c_f = lstm_cell(t, h_f, c_f, 0)
        h_b, c_b = lstm_cell(tr, h_b, c_b, 4)
        att_logits = (att_logits
                      + jnp.where(col == t, h_f, 0.0)
                      + jnp.where(col == tr, h_b, 0.0))

    # ---- att[~mask] = -inf ; softmax over the step (lane) axis ---------------
    att_logits = jnp.where(mask > 0.5, att_logits, -jnp.inf)
    m = jnp.max(att_logits, axis=1, keepdims=True)
    e = jnp.exp(att_logits - m)
    att = e / jnp.sum(e, axis=1, keepdims=True)                 # (TB, S)

    # ---- best-contribution selection (threshold, fallback = first argmax) ----
    sel_f = jnp.where(att >= threshold, 1.0, 0.0)               # (TB, S)
    any_sel = jnp.max(sel_f, axis=1, keepdims=True)             # (TB, 1) in {0, 1}
    colf = col.astype(jnp.float32)
    is_max_f = jnp.where(att == jnp.max(att, axis=1, keepdims=True), 1.0, 0.0)
    first_max = jnp.min(jnp.where(is_max_f > 0.5, colf, jnp.float32(S)),
                        axis=1, keepdims=True)                  # first argmax index
    fallback_f = jnp.where(colf == first_max, 1.0, 0.0)
    keep_f = jnp.where(any_sel > 0.5, sel_f, fallback_f)        # (TB, S)
    w_att = att * keep_f                                        # (TB, S)

    # ---- output[b] = sum_s w_att[b,s] * x[b,s,:]  (single MXU matmul) --------
    # Block-diagonal (TB, TB*S) attention matrix @ batch-flattened x (TB*S, F).
    x2 = x.reshape(TB * S, F)                                   # layout-preserving
    tiled = jnp.concatenate([w_att] * TB, axis=1)               # (TB, TB*S): [r,c]=w_att[r, c%S]
    r = lax.broadcasted_iota(jnp.int32, (TB, TB * S), 0)
    c = lax.broadcasted_iota(jnp.int32, (TB, TB * S), 1)
    band = (c >= r * S) & (c < (r + 1) * S)
    w_blk = jnp.where(band, tiled, 0.0)
    out = jnp.dot(w_blk, x2, preferred_element_type=jnp.float32)  # (TB, F)

    att_ref[...] = att.astype(att_ref.dtype)
    out_ref[...] = out.astype(out_ref.dtype)


def attention_k_layer(x, mask, params, *, threshold=0.1, batch_block=8):
    """Forward pass of Attention_K_Layer.

    x: (B, S, F) f32, mask: (B, S) bool (True = keep step).
    params: w_ih_f/w_ih_b (4,F), w_hh_f/w_hh_b (4,1), b_ih_f/b_hh_f/b_ih_b/b_hh_b (4,).
    Returns (output (B, F) f32, att (B, S) f32).
    """
    B, S, F = x.shape
    x = x.astype(jnp.float32)
    maskf = mask.astype(jnp.float32)

    # Pack the bidirectional LSTM parameters: gate order [i, f, g, o], fwd then bwd.
    wih = jnp.concatenate([params["w_ih_f"], params["w_ih_b"]], axis=0)       # (8, F)
    whh = jnp.concatenate([params["w_hh_f"], params["w_hh_b"]], axis=0).reshape(1, 8)
    b = jnp.concatenate([params["b_ih_f"] + params["b_hh_f"],
                         params["b_ih_b"] + params["b_hh_b"]]).reshape(1, 8)

    # Batch tiling: fuse everything into one grid step when B is small; otherwise
    # blocks of `batch_block` (multiple of 8 -> clean tiling, >1 step feeds both
    # TensorCores on v7x via the parallel grid axis).
    if B <= batch_block:
        TB, Bp = B, B
    else:
        TB = max(8, (batch_block // 8) * 8)
        Bp = ((B + TB - 1) // TB) * TB
    xp, maskp = x, maskf
    if Bp != B:
        xp = jnp.pad(x, ((0, Bp - B), (0, 0), (0, 0)))
        maskp = jnp.pad(maskf, ((0, Bp - B), (0, 0)), constant_values=1.0)
    grid = (Bp // TB,)

    kernel = functools.partial(_attention_k_kernel, threshold=threshold)

    cost = pl.CostEstimate(
        flops=int(2 * Bp * S * F * 8 + 2 * Bp * TB * S * F + 40 * Bp * S),
        transcendentals=int(11 * Bp * S),
        bytes_accessed=int(4 * (Bp * S * F + 2 * Bp * S + 9 * 8 + Bp * F)),
    )

    out, att = pl.pallas_call(
        kernel,
        out_shape=(jax.ShapeDtypeStruct((Bp, F), jnp.float32),
                   jax.ShapeDtypeStruct((Bp, S), jnp.float32)),
        grid_spec=pltpu.PrefetchScalarGridSpec(
            num_scalar_prefetch=0,
            grid=grid,
            in_specs=[
                pl.BlockSpec((TB, S, F), lambda i: (i, 0, 0)),   # x
                pl.BlockSpec((TB, S), lambda i: (i, 0)),         # mask
                pl.BlockSpec((8, F), lambda i: (0, 0)),          # W_ih (both dirs)
                pl.BlockSpec((1, 8), lambda i: (0, 0)),          # W_hh (both dirs)
                pl.BlockSpec((1, 8), lambda i: (0, 0)),          # biases
            ],
            out_specs=(
                pl.BlockSpec((TB, F), lambda i: (i, 0)),         # output, lane-dense
                pl.BlockSpec((TB, S), lambda i: (i, 0)),         # att, lane-dense
            ),
        ),
        compiler_params=pltpu.CompilerParams(
            dimension_semantics=("parallel",)),
        cost_estimate=cost,
    )(xp, maskp, wih, whh, b)

    return out[:B], att[:B]


def _reference(x, mask, params, threshold=0.1):
    """Pure-JAX reference of Attention_K_Layer.forward."""
    B, S, F = x.shape
    hp = jax.lax.Precision.HIGHEST

    def run_dir(w_ih, w_hh, b_ih, b_hh, reverse):
        pre = jnp.einsum("bsf,gf->bsg", x, w_ih, precision=hp) + (b_ih + b_hh)  # (B,S,4)
        h = jnp.zeros((B, 1), jnp.float32)
        c = jnp.zeros((B, 1), jnp.float32)
        outs = [None] * S
        w_hh_row = w_hh.reshape(1, 4)
        order = range(S - 1, -1, -1) if reverse else range(S)
        for t in order:
            g = pre[:, t, :] + h * w_hh_row
            gi = jax.nn.sigmoid(g[:, 0:1]); gf = jax.nn.sigmoid(g[:, 1:2])
            gg = jnp.tanh(g[:, 2:3]);       go = jax.nn.sigmoid(g[:, 3:4])
            c = gf * c + gi * gg
            h = go * jnp.tanh(c)
            outs[t] = h
        return jnp.concatenate(outs, axis=1)                                    # (B,S)

    att_logits = (run_dir(params["w_ih_f"], params["w_hh_f"],
                          params["b_ih_f"], params["b_hh_f"], False)
                  + run_dir(params["w_ih_b"], params["w_hh_b"],
                            params["b_ih_b"], params["b_hh_b"], True))
    att_logits = jnp.where(mask, att_logits, -jnp.inf)
    m = jnp.max(att_logits, axis=1, keepdims=True)
    e = jnp.exp(att_logits - m)
    att = e / jnp.sum(e, axis=1, keepdims=True)

    sel = att >= threshold
    any_sel = jnp.any(sel, axis=1, keepdims=True)
    first_max = jnp.argmax(att, axis=1, keepdims=True)
    onehot = jnp.arange(S)[None, :] == first_max
    keep = jnp.where(any_sel, sel, onehot)
    w_att = jnp.where(keep, att, 0.0)
    out = jnp.sum(x * w_att[:, :, None], axis=1)
    return out, att


if __name__ == "__main__":
    feature_dim = 32
    step_dim = 8
    batch = 4

    key = jax.random.PRNGKey(0)
    keys = jax.random.split(key, 10)

    def u(k, shape, bound=1.0):   # PyTorch LSTM default init: U(-1/sqrt(hidden)=1, 1)
        return jax.random.uniform(k, shape, jnp.float32, -bound, bound)

    params = {
        "w_ih_f": u(keys[0], (4, feature_dim)),
        "w_hh_f": u(keys[1], (4, 1)),
        "b_ih_f": u(keys[2], (4,)),
        "b_hh_f": u(keys[3], (4,)),
        "w_ih_b": u(keys[4], (4, feature_dim)),
        "w_hh_b": u(keys[5], (4, 1)),
        "b_ih_b": u(keys[6], (4,)),
        "b_hh_b": u(keys[7], (4,)),
    }

    x = jax.random.normal(keys[8], (batch, step_dim, feature_dim), jnp.float32)
    mask = jax.random.uniform(keys[9], (batch, step_dim)) > 0.25
    mask = mask.at[:, 0].set(True)   # ensure at least one unmasked step per row

    out, att = attention_k_layer(x, mask, params)
    jax.block_until_ready((out, att))

    out_ref, att_ref = _reference(x, mask, params)
    assert jnp.allclose(att, att_ref, rtol=1e-4, atol=1e-5), "attention mismatch"
    assert jnp.allclose(out, out_ref, rtol=1e-4, atol=1e-4), "output mismatch"

    # TODO(synk): drop_hidden (LSTM dropout) is a no-op for a 1-layer LSTM and the
    # unused `self.b` parameter is intentionally not implemented.
    print("KERNEL_OK")
</pallas_src>

<mosaic_0001>
module attributes {stable_mosaic.version = 11 : i64} {
  func.func @_attention_k_kernel(%arg0: i32, %arg1: memref<4x8x32xf32, #tpu.memory_space<vmem>>, %arg2: memref<4x8xf32, #tpu.memory_space<vmem>>, %arg3: memref<8x32xf32, #tpu.memory_space<vmem>>, %arg4: memref<1x8xf32, #tpu.memory_space<vmem>>, %arg5: memref<1x8xf32, #tpu.memory_space<vmem>>, %arg6: memref<4x32xf32, #tpu.memory_space<vmem>>, %arg7: memref<4x8xf32, #tpu.memory_space<vmem>>) attributes {dimension_semantics = [#tpu.dimension_semantics<parallel>], iteration_bounds = array<i64: 1>, scalar_prefetch = 0 : i64, scratch_operands = 0 : i64, tpu.core_type = #tpu.core_type<tc>, window_params = [{transform_indices = @transform_0, window_bounds = array<i64: 4, 8, 32>}, {transform_indices = @transform_1, window_bounds = array<i64: 4, 8>}, {pipeline_mode = #tpu.pipeline_mode<synchronous>, transform_indices = @transform_2, window_bounds = array<i64: 8, 32>}, {pipeline_mode = #tpu.pipeline_mode<synchronous>, transform_indices = @transform_3, window_bounds = array<i64: 1, 8>}, {pipeline_mode = #tpu.pipeline_mode<synchronous>, transform_indices = @transform_4, window_bounds = array<i64: 1, 8>}, {transform_indices = @transform_5, window_bounds = array<i64: 4, 32>}, {transform_indices = @transform_6, window_bounds = array<i64: 4, 8>}]} {
    %c0 = arith.constant 0 : index
    %c0_0 = arith.constant 0 : index
    %c0_1 = arith.constant 0 : index
    %0 = vector.load %arg1[%c0, %c0_0, %c0_1] : memref<4x8x32xf32, #tpu.memory_space<vmem>>, vector<4x8x32xf32>
    %c0_2 = arith.constant 0 : index
    %c0_3 = arith.constant 0 : index
    %1 = vector.load %arg2[%c0_2, %c0_3] : memref<4x8xf32, #tpu.memory_space<vmem>>, vector<4x8xf32>
    %c0_4 = arith.constant 0 : index
    %c0_5 = arith.constant 0 : index
    %2 = vector.load %arg3[%c0_4, %c0_5] : memref<8x32xf32, #tpu.memory_space<vmem>>, vector<8x32xf32>
    %c0_6 = arith.constant 0 : index
    %c0_7 = arith.constant 0 : index
    %3 = vector.load %arg4[%c0_6, %c0_7] : memref<1x8xf32, #tpu.memory_space<vmem>>, vector<1x8xf32>
    %c0_8 = arith.constant 0 : index
    %c0_9 = arith.constant 0 : index
    %4 = vector.load %arg5[%c0_8, %c0_9] : memref<1x8xf32, #tpu.memory_space<vmem>>, vector<1x8xf32>
    %5 = vector.extract_strided_slice %2 {offsets = [0, 0], sizes = [1, 32], strides = [1, 1]} : vector<8x32xf32> to vector<1x32xf32>
    %6 = vector.shape_cast %5 : vector<1x32xf32> to vector<1x1x32xf32>
    %7 = vector.broadcast %6 : vector<1x1x32xf32> to vector<4x8x32xf32>
    %8 = arith.mulf %0, %7 : vector<4x8x32xf32>
    %cst = arith.constant dense<0.000000e+00> : vector<4x8xf32>
    %9 = vector.multi_reduction <add>, %8, %cst [2] : vector<4x8x32xf32> to vector<4x8xf32>
    %10 = vector.extract_strided_slice %4 {offsets = [0, 0], sizes = [1, 1], strides = [1, 1]} : vector<1x8xf32> to vector<1x1xf32>
    %11 = vector.broadcast %10 : vector<1x1xf32> to vector<4x8xf32>
    %12 = arith.addf %9, %11 : vector<4x8xf32>
    %13 = vector.extract_strided_slice %2 {offsets = [1, 0], sizes = [1, 32], strides = [1, 1]} : vector<8x32xf32> to vector<1x32xf32>
    %14 = vector.shape_cast %13 : vector<1x32xf32> to vector<1x1x32xf32>
    %15 = vector.broadcast %14 : vector<1x1x32xf32> to vector<4x8x32xf32>
    %16 = arith.mulf %0, %15 : vector<4x8x32xf32>
    %cst_10 = arith.constant dense<0.000000e+00> : vector<4x8xf32>
    %17 = vector.multi_reduction <add>, %16, %cst_10 [2] : vector<4x8x32xf32> to vector<4x8xf32>
    %18 = vector.extract_strided_slice %4 {offsets = [0, 1], sizes = [1, 1], strides = [1, 1]} : vector<1x8xf32> to vector<1x1xf32>
    %19 = vector.broadcast %18 : vector<1x1xf32> to vector<4x8xf32>
    %20 = arith.addf %17, %19 : vector<4x8xf32>
    %21 = vector.extract_strided_slice %2 {offsets = [2, 0], sizes = [1, 32], strides = [1, 1]} : vector<8x32xf32> to vector<1x32xf32>
    %22 = vector.shape_cast %21 : vector<1x32xf32> to vector<1x1x32xf32>
    %23 = vector.broadcast %22 : vector<1x1x32xf32> to vector<4x8x32xf32>
    %24 = arith.mulf %0, %23 : vector<4x8x32xf32>
    %cst_11 = arith.constant dense<0.000000e+00> : vector<4x8xf32>
    %25 = vector.multi_reduction <add>, %24, %cst_11 [2] : vector<4x8x32xf32> to vector<4x8xf32>
    %26 = vector.extract_strided_slice %4 {offsets = [0, 2], sizes = [1, 1], strides = [1, 1]} : vector<1x8xf32> to vector<1x1xf32>
    %27 = vector.broadcast %26 : vector<1x1xf32> to vector<4x8xf32>
    %28 = arith.addf %25, %27 : vector<4x8xf32>
    %29 = vector.extract_strided_slice %2 {offsets = [3, 0], sizes = [1, 32], strides = [1, 1]} : vector<8x32xf32> to vector<1x32xf32>
    %30 = vector.shape_cast %29 : vector<1x32xf32> to vector<1x1x32xf32>
    %31 = vector.broadcast %30 : vector<1x1x32xf32> to vector<4x8x32xf32>
    %32 = arith.mulf %0, %31 : vector<4x8x32xf32>
    %cst_12 = arith.constant dense<0.000000e+00> : vector<4x8xf32>
    %33 = vector.multi_reduction <add>, %32, %cst_12 [2] : vector<4x8x32xf32> to vector<4x8xf32>
    %34 = vector.extract_strided_slice %4 {offsets = [0, 3], sizes = [1, 1], strides = [1, 1]} : vector<1x8xf32> to vector<1x1xf32>
    %35 = vector.broadcast %34 : vector<1x1xf32> to vector<4x8xf32>
    %36 = arith.addf %33, %35 : vector<4x8xf32>
    %37 = vector.extract_strided_slice %2 {offsets = [4, 0], sizes = [1, 32], strides = [1, 1]} : vector<8x32xf32> to vector<1x32xf32>
    %38 = vector.shape_cast %37 : vector<1x32xf32> to vector<1x1x32xf32>
    %39 = vector.broadcast %38 : vector<1x1x32xf32> to vector<4x8x32xf32>
    %40 = arith.mulf %0, %39 : vector<4x8x32xf32>
    %cst_13 = arith.constant dense<0.000000e+00> : vector<4x8xf32>
    %41 = vector.multi_reduction <add>, %40, %cst_13 [2] : vector<4x8x32xf32> to vector<4x8xf32>
    %42 = vector.extract_strided_slice %4 {offsets = [0, 4], sizes = [1, 1], strides = [1, 1]} : vector<1x8xf32> to vector<1x1xf32>
    %43 = vector.broadcast %42 : vector<1x1xf32> to vector<4x8xf32>
    %44 = arith.addf %41, %43 : vector<4x8xf32>
    %45 = vector.extract_strided_slice %2 {offsets = [5, 0], sizes = [1, 32], strides = [1, 1]} : vector<8x32xf32> to vector<1x32xf32>
    %46 = vector.shape_cast %45 : vector<1x32xf32> to vector<1x1x32xf32>
    %47 = vector.broadcast %46 : vector<1x1x32xf32> to vector<4x8x32xf32>
    %48 = arith.mulf %0, %47 : vector<4x8x32xf32>
    %cst_14 = arith.constant dense<0.000000e+00> : vector<4x8xf32>
    %49 = vector.multi_reduction <add>, %48, %cst_14 [2] : vector<4x8x32xf32> to vector<4x8xf32>
    %50 = vector.extract_strided_slice %4 {offsets = [0, 5], sizes = [1, 1], strides = [1, 1]} : vector<1x8xf32> to vector<1x1xf32>
    %51 = vector.broadcast %50 : vector<1x1xf32> to vector<4x8xf32>
    %52 = arith.addf %49, %51 : vector<4x8xf32>
    %53 = vector.extract_strided_slice %2 {offsets = [6, 0], sizes = [1, 32], strides = [1, 1]} : vector<8x32xf32> to vector<1x32xf32>
    %54 = vector.shape_cast %53 : vector<1x32xf32> to vector<1x1x32xf32>
    %55 = vector.broadcast %54 : vector<1x1x32xf32> to vector<4x8x32xf32>
    %56 = arith.mulf %0, %55 : vector<4x8x32xf32>
    %cst_15 = arith.constant dense<0.000000e+00> : vector<4x8xf32>
    %57 = vector.multi_reduction <add>, %56, %cst_15 [2] : vector<4x8x32xf32> to vector<4x8xf32>
    %58 = vector.extract_strided_slice %4 {offsets = [0, 6], sizes = [1, 1], strides = [1, 1]} : vector<1x8xf32> to vector<1x1xf32>
    %59 = vector.broadcast %58 : vector<1x1xf32> to vector<4x8xf32>
    %60 = arith.addf %57, %59 : vector<4x8xf32>
    %61 = vector.extract_strided_slice %2 {offsets = [7, 0], sizes = [1, 32], strides = [1, 1]} : vector<8x32xf32> to vector<1x32xf32>
    %62 = vector.shape_cast %61 : vector<1x32xf32> to vector<1x1x32xf32>
    %63 = vector.broadcast %62 : vector<1x1x32xf32> to vector<4x8x32xf32>
    %64 = arith.mulf %0, %63 : vector<4x8x32xf32>
    %cst_16 = arith.constant dense<0.000000e+00> : vector<4x8xf32>
    %65 = vector.multi_reduction <add>, %64, %cst_16 [2] : vector<4x8x32xf32> to vector<4x8xf32>
    %66 = vector.extract_strided_slice %4 {offsets = [0, 7], sizes = [1, 1], strides = [1, 1]} : vector<1x8xf32> to vector<1x1xf32>
    %67 = vector.broadcast %66 : vector<1x1xf32> to vector<4x8xf32>
    %68 = arith.addf %65, %67 : vector<4x8xf32>
    %69 = tpu.iota {dimensions = array<i32: 1>} : vector<4x8xi32>
    %cst_17 = arith.constant 0.000000e+00 : f32
    %70 = vector.broadcast %cst_17 : f32 to vector<4x1xf32>
    %cst_18 = arith.constant 0.000000e+00 : f32
    %71 = vector.broadcast %cst_18 : f32 to vector<4x8xf32>
    %72 = vector.extract_strided_slice %12 {offsets = [0, 0], sizes = [4, 1], strides = [1, 1]} : vector<4x8xf32> to vector<4x1xf32>
    %73 = vector.extract_strided_slice %3 {offsets = [0, 0], sizes = [1, 1], strides = [1, 1]} : vector<1x8xf32> to vector<1x1xf32>
    %74 = vector.broadcast %73 : vector<1x1xf32> to vector<4x1xf32>
    %75 = arith.mulf %70, %74 : vector<4x1xf32>
    %76 = arith.addf %72, %75 : vector<4x1xf32>
    %77 = arith.negf %76 : vector<4x1xf32>
    %78 = math.exp %77 : vector<4x1xf32>
    %cst_19 = arith.constant 1.000000e+00 : f32
    %79 = vector.broadcast %cst_19 : f32 to vector<4x1xf32>
    %80 = arith.addf %79, %78 : vector<4x1xf32>
    %81 = arith.divf %79, %80 : vector<4x1xf32>
    %82 = vector.extract_strided_slice %20 {offsets = [0, 0], sizes = [4, 1], strides = [1, 1]} : vector<4x8xf32> to vector<4x1xf32>
    %83 = vector.extract_strided_slice %3 {offsets = [0, 1], sizes = [1, 1], strides = [1, 1]} : vector<1x8xf32> to vector<1x1xf32>
    %84 = vector.broadcast %83 : vector<1x1xf32> to vector<4x1xf32>
    %85 = arith.mulf %70, %84 : vector<4x1xf32>
    %86 = arith.addf %82, %85 : vector<4x1xf32>
    %87 = arith.negf %86 : vector<4x1xf32>
    %88 = math.exp %87 : vector<4x1xf32>
    %cst_20 = arith.constant 1.000000e+00 : f32
    %89 = vector.broadcast %cst_20 : f32 to vector<4x1xf32>
    %90 = arith.addf %89, %88 : vector<4x1xf32>
    %91 = arith.divf %89, %90 : vector<4x1xf32>
    %92 = vector.extract_strided_slice %28 {offsets = [0, 0], sizes = [4, 1], strides = [1, 1]} : vector<4x8xf32> to vector<4x1xf32>
    %93 = vector.extract_strided_slice %3 {offsets = [0, 2], sizes = [1, 1], strides = [1, 1]} : vector<1x8xf32> to vector<1x1xf32>
    %94 = vector.broadcast %93 : vector<1x1xf32> to vector<4x1xf32>
    %95 = arith.mulf %70, %94 : vector<4x1xf32>
    %96 = arith.addf %92, %95 : vector<4x1xf32>
    %97 = math.tanh %96 : vector<4x1xf32>
    %98 = vector.extract_strided_slice %36 {offsets = [0, 0], sizes = [4, 1], strides = [1, 1]} : vector<4x8xf32> to vector<4x1xf32>
    %99 = vector.extract_strided_slice %3 {offsets = [0, 3], sizes = [1, 1], strides = [1, 1]} : vector<1x8xf32> to vector<1x1xf32>
    %100 = vector.broadcast %99 : vector<1x1xf32> to vector<4x1xf32>
    %101 = arith.mulf %70, %100 : vector<4x1xf32>
    %102 = arith.addf %98, %101 : vector<4x1xf32>
    %103 = arith.negf %102 : vector<4x1xf32>
    %104 = math.exp %103 : vector<4x1xf32>
    %cst_21 = arith.constant 1.000000e+00 : f32
    %105 = vector.broadcast %cst_21 : f32 to vector<4x1xf32>
    %106 = arith.addf %105, %104 : vector<4x1xf32>
    %107 = arith.divf %105, %106 : vector<4x1xf32>
    %108 = arith.mulf %91, %70 : vector<4x1xf32>
    %109 = arith.mulf %81, %97 : vector<4x1xf32>
    %110 = arith.addf %108, %109 : vector<4x1xf32>
    %111 = math.tanh %110 : vector<4x1xf32>
    %112 = arith.mulf %107, %111 : vector<4x1xf32>
    %113 = vector.extract_strided_slice %44 {offsets = [0, 7], sizes = [4, 1], strides = [1, 1]} : vector<4x8xf32> to vector<4x1xf32>
    %114 = vector.extract_strided_slice %3 {offsets = [0, 4], sizes = [1, 1], strides = [1, 1]} : vector<1x8xf32> to vector<1x1xf32>
    %115 = vector.broadcast %114 : vector<1x1xf32> to vector<4x1xf32>
    %116 = arith.mulf %70, %115 : vector<4x1xf32>
    %117 = arith.addf %113, %116 : vector<4x1xf32>
    %118 = arith.negf %117 : vector<4x1xf32>
    %119 = math.exp %118 : vector<4x1xf32>
    %cst_22 = arith.constant 1.000000e+00 : f32
    %120 = vector.broadcast %cst_22 : f32 to vector<4x1xf32>
    %121 = arith.addf %120, %119 : vector<4x1xf32>
    %122 = arith.divf %120, %121 : vector<4x1xf32>
    %123 = vector.extract_strided_slice %52 {offsets = [0, 7], sizes = [4, 1], strides = [1, 1]} : vector<4x8xf32> to vector<4x1xf32>
    %124 = vector.extract_strided_slice %3 {offsets = [0, 5], sizes = [1, 1], strides = [1, 1]} : vector<1x8xf32> to vector<1x1xf32>
    %125 = vector.broadcast %124 : vector<1x1xf32> to vector<4x1xf32>
    %126 = arith.mulf %70, %125 : vector<4x1xf32>
    %127 = arith.addf %123, %126 : vector<4x1xf32>
    %128 = arith.negf %127 : vector<4x1xf32>
    %129 = math.exp %128 : vector<4x1xf32>
    %cst_23 = arith.constant 1.000000e+00 : f32
    %130 = vector.broadcast %cst_23 : f32 to vector<4x1xf32>
    %131 = arith.addf %130, %129 : vector<4x1xf32>
    %132 = arith.divf %130, %131 : vector<4x1xf32>
    %133 = vector.extract_strided_slice %60 {offsets = [0, 7], sizes = [4, 1], strides = [1, 1]} : vector<4x8xf32> to vector<4x1xf32>
    %134 = vector.extract_strided_slice %3 {offsets = [0, 6], sizes = [1, 1], strides = [1, 1]} : vector<1x8xf32> to vector<1x1xf32>
    %135 = vector.broadcast %134 : vector<1x1xf32> to vector<4x1xf32>
    %136 = arith.mulf %70, %135 : vector<4x1xf32>
    %137 = arith.addf %133, %136 : vector<4x1xf32>
    %138 = math.tanh %137 : vector<4x1xf32>
    %139 = vector.extract_strided_slice %68 {offsets = [0, 7], sizes = [4, 1], strides = [1, 1]} : vector<4x8xf32> to vector<4x1xf32>
    %140 = vector.extract_strided_slice %3 {offsets = [0, 7], sizes = [1, 1], strides = [1, 1]} : vector<1x8xf32> to vector<1x1xf32>
    %141 = vector.broadcast %140 : vector<1x1xf32> to vector<4x1xf32>
    %142 = arith.mulf %70, %141 : vector<4x1xf32>
    %143 = arith.addf %139, %142 : vector<4x1xf32>
    %144 = arith.negf %143 : vector<4x1xf32>
    %145 = math.exp %144 : vector<4x1xf32>
    %cst_24 = arith.constant 1.000000e+00 : f32
    %146 = vector.broadcast %cst_24 : f32 to vector<4x1xf32>
    %147 = arith.addf %146, %145 : vector<4x1xf32>
    %148 = arith.divf %146, %147 : vector<4x1xf32>
    %149 = arith.mulf %132, %70 : vector<4x1xf32>
    %150 = arith.mulf %122, %138 : vector<4x1xf32>
    %151 = arith.addf %149, %150 : vector<4x1xf32>
    %152 = math.tanh %151 : vector<4x1xf32>
    %153 = arith.mulf %148, %152 : vector<4x1xf32>
    %c0_i32 = arith.constant 0 : i32
    %154 = vector.broadcast %c0_i32 : i32 to vector<4x8xi32>
    %155 = arith.cmpi eq, %69, %154 : vector<4x8xi32>
    %cst_25 = arith.constant 0.000000e+00 : f32
    %156 = vector.shape_cast %112 : vector<4x1xf32> to vector<4x1xf32>
    %157 = vector.broadcast %156 : vector<4x1xf32> to vector<4x8xf32>
    %158 = vector.broadcast %cst_25 : f32 to vector<4x8xf32>
    %159 = arith.select %155, %157, %158 : vector<4x8xi1>, vector<4x8xf32>
    %160 = arith.addf %71, %159 : vector<4x8xf32>
    %c7_i32 = arith.constant 7 : i32
    %161 = vector.broadcast %c7_i32 : i32 to vector<4x8xi32>
    %162 = arith.cmpi eq, %69, %161 : vector<4x8xi32>
    %cst_26 = arith.constant 0.000000e+00 : f32
    %163 = vector.shape_cast %153 : vector<4x1xf32> to vector<4x1xf32>
    %164 = vector.broadcast %163 : vector<4x1xf32> to vector<4x8xf32>
    %165 = vector.broadcast %cst_26 : f32 to vector<4x8xf32>
    %166 = arith.select %162, %164, %165 : vector<4x8xi1>, vector<4x8xf32>
    %167 = arith.addf %160, %166 : vector<4x8xf32>
    %168 = vector.extract_strided_slice %12 {offsets = [0, 1], sizes = [4, 1], strides = [1, 1]} : vector<4x8xf32> to vector<4x1xf32>
    %169 = vector.extract_strided_slice %3 {offsets = [0, 0], sizes = [1, 1], strides = [1, 1]} : vector<1x8xf32> to vector<1x1xf32>
    %170 = vector.broadcast %169 : vector<1x1xf32> to vector<4x1xf32>
    %171 = arith.mulf %112, %170 : vector<4x1xf32>
    %172 = arith.addf %168, %171 : vector<4x1xf32>
    %173 = arith.negf %172 : vector<4x1xf32>
    %174 = math.exp %173 : vector<4x1xf32>
    %cst_27 = arith.constant 1.000000e+00 : f32
    %175 = vector.broadcast %cst_27 : f32 to vector<4x1xf32>
    %176 = arith.addf %175, %174 : vector<4x1xf32>
    %177 = arith.divf %175, %176 : vector<4x1xf32>
    %178 = vector.extract_strided_slice %20 {offsets = [0, 1], sizes = [4, 1], strides = [1, 1]} : vector<4x8xf32> to vector<4x1xf32>
    %179 = vector.extract_strided_slice %3 {offsets = [0, 1], sizes = [1, 1], strides = [1, 1]} : vector<1x8xf32> to vector<1x1xf32>
    %180 = vector.broadcast %179 : vector<1x1xf32> to vector<4x1xf32>
    %181 = arith.mulf %112, %180 : vector<4x1xf32>
    %182 = arith.addf %178, %181 : vector<4x1xf32>
    %183 = arith.negf %182 : vector<4x1xf32>
    %184 = math.exp %183 : vector<4x1xf32>
    %cst_28 = arith.constant 1.000000e+00 : f32
    %185 = vector.broadcast %cst_28 : f32 to vector<4x1xf32>
    %186 = arith.addf %185, %184 : vector<4x1xf32>
    %187 = arith.divf %185, %186 : vector<4x1xf32>
    %188 = vector.extract_strided_slice %28 {offsets = [0, 1], sizes = [4, 1], strides = [1, 1]} : vector<4x8xf32> to vector<4x1xf32>
    %189 = vector.extract_strided_slice %3 {offsets = [0, 2], sizes = [1, 1], strides = [1, 1]} : vector<1x8xf32> to vector<1x1xf32>
    %190 = vector.broadcast %189 : vector<1x1xf32> to vector<4x1xf32>
    %191 = arith.mulf %112, %190 : vector<4x1xf32>
    %192 = arith.addf %188, %191 : vector<4x1xf32>
    %193 = math.tanh %192 : vector<4x1xf32>
    %194 = vector.extract_strided_slice %36 {offsets = [0, 1], sizes = [4, 1], strides = [1, 1]} : vector<4x8xf32> to vector<4x1xf32>
    %195 = vector.extract_strided_slice %3 {offsets = [0, 3], sizes = [1, 1], strides = [1, 1]} : vector<1x8xf32> to vector<1x1xf32>
    %196 = vector.broadcast %195 : vector<1x1xf32> to vector<4x1xf32>
    %197 = arith.mulf %112, %196 : vector<4x1xf32>
    %198 = arith.addf %194, %197 : vector<4x1xf32>
    %199 = arith.negf %198 : vector<4x1xf32>
    %200 = math.exp %199 : vector<4x1xf32>
    %cst_29 = arith.constant 1.000000e+00 : f32
    %201 = vector.broadcast %cst_29 : f32 to vector<4x1xf32>
    %202 = arith.addf %201, %200 : vector<4x1xf32>
    %203 = arith.divf %201, %202 : vector<4x1xf32>
    %204 = arith.mulf %187, %110 : vector<4x1xf32>
    %205 = arith.mulf %177, %193 : vector<4x1xf32>
    %206 = arith.addf %204, %205 : vector<4x1xf32>
    %207 = math.tanh %206 : vector<4x1xf32>
    %208 = arith.mulf %203, %207 : vector<4x1xf32>
    %209 = vector.extract_strided_slice %44 {offsets = [0, 6], sizes = [4, 1], strides = [1, 1]} : vector<4x8xf32> to vector<4x1xf32>
    %210 = vector.extract_strided_slice %3 {offsets = [0, 4], sizes = [1, 1], strides = [1, 1]} : vector<1x8xf32> to vector<1x1xf32>
    %211 = vector.broadcast %210 : vector<1x1xf32> to vector<4x1xf32>
    %212 = arith.mulf %153, %211 : vector<4x1xf32>
    %213 = arith.addf %209, %212 : vector<4x1xf32>
    %214 = arith.negf %213 : vector<4x1xf32>
    %215 = math.exp %214 : vector<4x1xf32>
    %cst_30 = arith.constant 1.000000e+00 : f32
    %216 = vector.broadcast %cst_30 : f32 to vector<4x1xf32>
    %217 = arith.addf %216, %215 : vector<4x1xf32>
    %218 = arith.divf %216, %217 : vector<4x1xf32>
    %219 = vector.extract_strided_slice %52 {offsets = [0, 6], sizes = [4, 1], strides = [1, 1]} : vector<4x8xf32> to vector<4x1xf32>
    %220 = vector.extract_strided_slice %3 {offsets = [0, 5], sizes = [1, 1], strides = [1, 1]} : vector<1x8xf32> to vector<1x1xf32>
    %221 = vector.broadcast %220 : vector<1x1xf32> to vector<4x1xf32>
    %222 = arith.mulf %153, %221 : vector<4x1xf32>
    %223 = arith.addf %219, %222 : vector<4x1xf32>
    %224 = arith.negf %223 : vector<4x1xf32>
    %225 = math.exp %224 : vector<4x1xf32>
    %cst_31 = arith.constant 1.000000e+00 : f32
    %226 = vector.broadcast %cst_31 : f32 to vector<4x1xf32>
    %227 = arith.addf %226, %225 : vector<4x1xf32>
    %228 = arith.divf %226, %227 : vector<4x1xf32>
    %229 = vector.extract_strided_slice %60 {offsets = [0, 6], sizes = [4, 1], strides = [1, 1]} : vector<4x8xf32> to vector<4x1xf32>
    %230 = vector.extract_strided_slice %3 {offsets = [0, 6], sizes = [1, 1], strides = [1, 1]} : vector<1x8xf32> to vector<1x1xf32>
    %231 = vector.broadcast %230 : vector<1x1xf32> to vector<4x1xf32>
    %232 = arith.mulf %153, %231 : vector<4x1xf32>
    %233 = arith.addf %229, %232 : vector<4x1xf32>
    %234 = math.tanh %233 : vector<4x1xf32>
    %235 = vector.extract_strided_slice %68 {offsets = [0, 6], sizes = [4, 1], strides = [1, 1]} : vector<4x8xf32> to vector<4x1xf32>
    %236 = vector.extract_strided_slice %3 {offsets = [0, 7], sizes = [1, 1], strides = [1, 1]} : vector<1x8xf32> to vector<1x1xf32>
    %237 = vector.broadcast %236 : vector<1x1xf32> to vector<4x1xf32>
    %238 = arith.mulf %153, %237 : vector<4x1xf32>
    %239 = arith.addf %235, %238 : vector<4x1xf32>
    %240 = arith.negf %239 : vector<4x1xf32>
    %241 = math.exp %240 : vector<4x1xf32>
    %cst_32 = arith.constant 1.000000e+00 : f32
    %242 = vector.broadcast %cst_32 : f32 to vector<4x1xf32>
    %243 = arith.addf %242, %241 : vector<4x1xf32>
    %244 = arith.divf %242, %243 : vector<4x1xf32>
    %245 = arith.mulf %228, %151 : vector<4x1xf32>
    %246 = arith.mulf %218, %234 : vector<4x1xf32>
    %247 = arith.addf %245, %246 : vector<4x1xf32>
    %248 = math.tanh %247 : vector<4x1xf32>
    %249 = arith.mulf %244, %248 : vector<4x1xf32>
    %c1_i32 = arith.constant 1 : i32
    %250 = vector.broadcast %c1_i32 : i32 to vector<4x8xi32>
    %251 = arith.cmpi eq, %69, %250 : vector<4x8xi32>
    %cst_33 = arith.constant 0.000000e+00 : f32
    %252 = vector.shape_cast %208 : vector<4x1xf32> to vector<4x1xf32>
    %253 = vector.broadcast %252 : vector<4x1xf32> to vector<4x8xf32>
    %254 = vector.broadcast %cst_33 : f32 to vector<4x8xf32>
    %255 = arith.select %251, %253, %254 : vector<4x8xi1>, vector<4x8xf32>
    %256 = arith.addf %167, %255 : vector<4x8xf32>
    %c6_i32 = arith.constant 6 : i32
    %257 = vector.broadcast %c6_i32 : i32 to vector<4x8xi32>
    %258 = arith.cmpi eq, %69, %257 : vector<4x8xi32>
    %cst_34 = arith.constant 0.000000e+00 : f32
    %259 = vector.shape_cast %249 : vector<4x1xf32> to vector<4x1xf32>
    %260 = vector.broadcast %259 : vector<4x1xf32> to vector<4x8xf32>
    %261 = vector.broadcast %cst_34 : f32 to vector<4x8xf32>
    %262 = arith.select %258, %260, %261 : vector<4x8xi1>, vector<4x8xf32>
    %263 = arith.addf %256, %262 : vector<4x8xf32>
    %264 = vector.extract_strided_slice %12 {offsets = [0, 2], sizes = [4, 1], strides = [1, 1]} : vector<4x8xf32> to vector<4x1xf32>
    %265 = vector.extract_strided_slice %3 {offsets = [0, 0], sizes = [1, 1], strides = [1, 1]} : vector<1x8xf32> to vector<1x1xf32>
    %266 = vector.broadcast %265 : vector<1x1xf32> to vector<4x1xf32>
    %267 = arith.mulf %208, %266 : vector<4x1xf32>
    %268 = arith.addf %264, %267 : vector<4x1xf32>
    %269 = arith.negf %268 : vector<4x1xf32>
    %270 = math.exp %269 : vector<4x1xf32>
    %cst_35 = arith.constant 1.000000e+00 : f32
    %271 = vector.broadcast %cst_35 : f32 to vector<4x1xf32>
    %272 = arith.addf %271, %270 : vector<4x1xf32>
    %273 = arith.divf %271, %272 : vector<4x1xf32>
    %274 = vector.extract_strided_slice %20 {offsets = [0, 2], sizes = [4, 1], strides = [1, 1]} : vector<4x8xf32> to vector<4x1xf32>
    %275 = vector.extract_strided_slice %3 {offsets = [0, 1], sizes = [1, 1], strides = [1, 1]} : vector<1x8xf32> to vector<1x1xf32>
    %276 = vector.broadcast %275 : vector<1x1xf32> to vector<4x1xf32>
    %277 = arith.mulf %208, %276 : vector<4x1xf32>
    %278 = arith.addf %274, %277 : vector<4x1xf32>
    %279 = arith.negf %278 : vector<4x1xf32>
    %280 = math.exp %279 : vector<4x1xf32>
    %cst_36 = arith.constant 1.000000e+00 : f32
    %281 = vector.broadcast %cst_36 : f32 to vector<4x1xf32>
    %282 = arith.addf %281, %280 : vector<4x1xf32>
    %283 = arith.divf %281, %282 : vector<4x1xf32>
    %284 = vector.extract_strided_slice %28 {offsets = [0, 2], sizes = [4, 1], strides = [1, 1]} : vector<4x8xf32> to vector<4x1xf32>
    %285 = vector.extract_strided_slice %3 {offsets = [0, 2], sizes = [1, 1], strides = [1, 1]} : vector<1x8xf32> to vector<1x1xf32>
    %286 = vector.broadcast %285 : vector<1x1xf32> to vector<4x1xf32>
    %287 = arith.mulf %208, %286 : vector<4x1xf32>
    %288 = arith.addf %284, %287 : vector<4x1xf32>
    %289 = math.tanh %288 : vector<4x1xf32>
    %290 = vector.extract_strided_slice %36 {offsets = [0, 2], sizes = [4, 1], strides = [1, 1]} : vector<4x8xf32> to vector<4x1xf32>
    %291 = vector.extract_strided_slice %3 {offsets = [0, 3], sizes = [1, 1], strides = [1, 1]} : vector<1x8xf32> to vector<1x1xf32>
    %292 = vector.broadcast %291 : vector<1x1xf32> to vector<4x1xf32>
    %293 = arith.mulf %208, %292 : vector<4x1xf32>
    %294 = arith.addf %290, %293 : vector<4x1xf32>
    %295 = arith.negf %294 : vector<4x1xf32>
    %296 = math.exp %295 : vector<4x1xf32>
    %cst_37 = arith.constant 1.000000e+00 : f32
    %297 = vector.broadcast %cst_37 : f32 to vector<4x1xf32>
    %298 = arith.addf %297, %296 : vector<4x1xf32>
    %299 = arith.divf %297, %298 : vector<4x1xf32>
    %300 = arith.mulf %283, %206 : vector<4x1xf32>
    %301 = arith.mulf %273, %289 : vector<4x1xf32>
    %302 = arith.addf %300, %301 : vector<4x1xf32>
    %303 = math.tanh %302 : vector<4x1xf32>
    %304 = arith.mulf %299, %303 : vector<4x1xf32>
    %305 = vector.extract_strided_slice %44 {offsets = [0, 5], sizes = [4, 1], strides = [1, 1]} : vector<4x8xf32> to vector<4x1xf32>
    %306 = vector.extract_strided_slice %3 {offsets = [0, 4], sizes = [1, 1], strides = [1, 1]} : vector<1x8xf32> to vector<1x1xf32>
    %307 = vector.broadcast %306 : vector<1x1xf32> to vector<4x1xf32>
    %308 = arith.mulf %249, %307 : vector<4x1xf32>
    %309 = arith.addf %305, %308 : vector<4x1xf32>
    %310 = arith.negf %309 : vector<4x1xf32>
    %311 = math.exp %310 : vector<4x1xf32>
    %cst_38 = arith.constant 1.000000e+00 : f32
    %312 = vector.broadcast %cst_38 : f32 to vector<4x1xf32>
    %313 = arith.addf %312, %311 : vector<4x1xf32>
    %314 = arith.divf %312, %313 : vector<4x1xf32>
    %315 = vector.extract_strided_slice %52 {offsets = [0, 5], sizes = [4, 1], strides = [1, 1]} : vector<4x8xf32> to vector<4x1xf32>
    %316 = vector.extract_strided_slice %3 {offsets = [0, 5], sizes = [1, 1], strides = [1, 1]} : vector<1x8xf32> to vector<1x1xf32>
    %317 = vector.broadcast %316 : vector<1x1xf32> to vector<4x1xf32>
    %318 = arith.mulf %249, %317 : vector<4x1xf32>
    %319 = arith.addf %315, %318 : vector<4x1xf32>
    %320 = arith.negf %319 : vector<4x1xf32>
    %321 = math.exp %320 : vector<4x1xf32>
    %cst_39 = arith.constant 1.000000e+00 : f32
    %322 = vector.broadcast %cst_39 : f32 to vector<4x1xf32>
    %323 = arith.addf %322, %321 : vector<4x1xf32>
    %324 = arith.divf %322, %323 : vector<4x1xf32>
    %325 = vector.extract_strided_slice %60 {offsets = [0, 5], sizes = [4, 1], strides = [1, 1]} : vector<4x8xf32> to vector<4x1xf32>
    %326 = vector.extract_strided_slice %3 {offsets = [0, 6], sizes = [1, 1], strides = [1, 1]} : vector<1x8xf32> to vector<1x1xf32>
    %327 = vector.broadcast %326 : vector<1x1xf32> to vector<4x1xf32>
    %328 = arith.mulf %249, %327 : vector<4x1xf32>
    %329 = arith.addf %325, %328 : vector<4x1xf32>
    %330 = math.tanh %329 : vector<4x1xf32>
    %331 = vector.extract_strided_slice %68 {offsets = [0, 5], sizes = [4, 1], strides = [1, 1]} : vector<4x8xf32> to vector<4x1xf32>
    %332 = vector.extract_strided_slice %3 {offsets = [0, 7], sizes = [1, 1], strides = [1, 1]} : vector<1x8xf32> to vector<1x1xf32>
    %333 = vector.broadcast %332 : vector<1x1xf32> to vector<4x1xf32>
    %334 = arith.mulf %249, %333 : vector<4x1xf32>
    %335 = arith.addf %331, %334 : vector<4x1xf32>
    %336 = arith.negf %335 : vector<4x1xf32>
    %337 = math.exp %336 : vector<4x1xf32>
    %cst_40 = arith.constant 1.000000e+00 : f32
    %338 = vector.broadcast %cst_40 : f32 to vector<4x1xf32>
    %339 = arith.addf %338, %337 : vector<4x1xf32>
    %340 = arith.divf %338, %339 : vector<4x1xf32>
    %341 = arith.mulf %324, %247 : vector<4x1xf32>
    %342 = arith.mulf %314, %330 : vector<4x1xf32>
    %343 = arith.addf %341, %342 : vector<4x1xf32>
    %344 = math.tanh %343 : vector<4x1xf32>
    %345 = arith.mulf %340, %344 : vector<4x1xf32>
    %c2_i32 = arith.constant 2 : i32
    %346 = vector.broadcast %c2_i32 : i32 to vector<4x8xi32>
    %347 = arith.cmpi eq, %69, %346 : vector<4x8xi32>
    %cst_41 = arith.constant 0.000000e+00 : f32
    %348 = vector.shape_cast %304 : vector<4x1xf32> to vector<4x1xf32>
    %349 = vector.broadcast %348 : vector<4x1xf32> to vector<4x8xf32>
    %350 = vector.broadcast %cst_41 : f32 to vector<4x8xf32>
    %351 = arith.select %347, %349, %350 : vector<4x8xi1>, vector<4x8xf32>
    %352 = arith.addf %263, %351 : vector<4x8xf32>
    %c5_i32 = arith.constant 5 : i32
    %353 = vector.broadcast %c5_i32 : i32 to vector<4x8xi32>
    %354 = arith.cmpi eq, %69, %353 : vector<4x8xi32>
    %cst_42 = arith.constant 0.000000e+00 : f32
    %355 = vector.shape_cast %345 : vector<4x1xf32> to vector<4x1xf32>
    %356 = vector.broadcast %355 : vector<4x1xf32> to vector<4x8xf32>
    %357 = vector.broadcast %cst_42 : f32 to vector<4x8xf32>
    %358 = arith.select %354, %356, %357 : vector<4x8xi1>, vector<4x8xf32>
    %359 = arith.addf %352, %358 : vector<4x8xf32>
    %360 = vector.extract_strided_slice %12 {offsets = [0, 3], sizes = [4, 1], strides = [1, 1]} : vector<4x8xf32> to vector<4x1xf32>
    %361 = vector.extract_strided_slice %3 {offsets = [0, 0], sizes = [1, 1], strides = [1, 1]} : vector<1x8xf32> to vector<1x1xf32>
    %362 = vector.broadcast %361 : vector<1x1xf32> to vector<4x1xf32>
    %363 = arith.mulf %304, %362 : vector<4x1xf32>
    %364 = arith.addf %360, %363 : vector<4x1xf32>
    %365 = arith.negf %364 : vector<4x1xf32>
    %366 = math.exp %365 : vector<4x1xf32>
    %cst_43 = arith.constant 1.000000e+00 : f32
    %367 = vector.broadcast %cst_43 : f32 to vector<4x1xf32>
    %368 = arith.addf %367, %366 : vector<4x1xf32>
    %369 = arith.divf %367, %368 : vector<4x1xf32>
    %370 = vector.extract_strided_slice %20 {offsets = [0, 3], sizes = [4, 1], strides = [1, 1]} : vector<4x8xf32> to vector<4x1xf32>
    %371 = vector.extract_strided_slice %3 {offsets = [0, 1], sizes = [1, 1], strides = [1, 1]} : vector<1x8xf32> to vector<1x1xf32>
    %372 = vector.broadcast %371 : vector<1x1xf32> to vector<4x1xf32>
    %373 = arith.mulf %304, %372 : vector<4x1xf32>
    %374 = arith.addf %370, %373 : vector<4x1xf32>
    %375 = arith.negf %374 : vector<4x1xf32>
    %376 = math.exp %375 : vector<4x1xf32>
    %cst_44 = arith.constant 1.000000e+00 : f32
    %377 = vector.broadcast %cst_44 : f32 to vector<4x1xf32>
    %378 = arith.addf %377, %376 : vector<4x1xf32>
    %379 = arith.divf %377, %378 : vector<4x1xf32>
    %380 = vector.extract_strided_slice %28 {offsets = [0, 3], sizes = [4, 1], strides = [1, 1]} : vector<4x8xf32> to vector<4x1xf32>
    %381 = vector.extract_strided_slice %3 {offsets = [0, 2], sizes = [1, 1], strides = [1, 1]} : vector<1x8xf32> to vector<1x1xf32>
    %382 = vector.broadcast %381 : vector<1x1xf32> to vector<4x1xf32>
    %383 = arith.mulf %304, %382 : vector<4x1xf32>
    %384 = arith.addf %380, %383 : vector<4x1xf32>
    %385 = math.tanh %384 : vector<4x1xf32>
    %386 = vector.extract_strided_slice %36 {offsets = [0, 3], sizes = [4, 1], strides = [1, 1]} : vector<4x8xf32> to vector<4x1xf32>
    %387 = vector.extract_strided_slice %3 {offsets = [0, 3], sizes = [1, 1], strides = [1, 1]} : vector<1x8xf32> to vector<1x1xf32>
    %388 = vector.broadcast %387 : vector<1x1xf32> to vector<4x1xf32>
    %389 = arith.mulf %304, %388 : vector<4x1xf32>
    %390 = arith.addf %386, %389 : vector<4x1xf32>
    %391 = arith.negf %390 : vector<4x1xf32>
    %392 = math.exp %391 : vector<4x1xf32>
    %cst_45 = arith.constant 1.000000e+00 : f32
    %393 = vector.broadcast %cst_45 : f32 to vector<4x1xf32>
    %394 = arith.addf %393, %392 : vector<4x1xf32>
    %395 = arith.divf %393, %394 : vector<4x1xf32>
    %396 = arith.mulf %379, %302 : vector<4x1xf32>
    %397 = arith.mulf %369, %385 : vector<4x1xf32>
    %398 = arith.addf %396, %397 : vector<4x1xf32>
    %399 = math.tanh %398 : vector<4x1xf32>
    %400 = arith.mulf %395, %399 : vector<4x1xf32>
    %401 = vector.extract_strided_slice %44 {offsets = [0, 4], sizes = [4, 1], strides = [1, 1]} : vector<4x8xf32> to vector<4x1xf32>
    %402 = vector.extract_strided_slice %3 {offsets = [0, 4], sizes = [1, 1], strides = [1, 1]} : vector<1x8xf32> to vector<1x1xf32>
    %403 = vector.broadcast %402 : vector<1x1xf32> to vector<4x1xf32>
    %404 = arith.mulf %345, %403 : vector<4x1xf32>
    %405 = arith.addf %401, %404 : vector<4x1xf32>
    %406 = arith.negf %405 : vector<4x1xf32>
    %407 = math.exp %406 : vector<4x1xf32>
    %cst_46 = arith.constant 1.000000e+00 : f32
    %408 = vector.broadcast %cst_46 : f32 to vector<4x1xf32>
    %409 = arith.addf %408, %407 : vector<4x1xf32>
    %410 = arith.divf %408, %409 : vector<4x1xf32>
    %411 = vector.extract_strided_slice %52 {offsets = [0, 4], sizes = [4, 1], strides = [1, 1]} : vector<4x8xf32> to vector<4x1xf32>
    %412 = vector.extract_strided_slice %3 {offsets = [0, 5], sizes = [1, 1], strides = [1, 1]} : vector<1x8xf32> to vector<1x1xf32>
    %413 = vector.broadcast %412 : vector<1x1xf32> to vector<4x1xf32>
    %414 = arith.mulf %345, %413 : vector<4x1xf32>
    %415 = arith.addf %411, %414 : vector<4x1xf32>
    %416 = arith.negf %415 : vector<4x1xf32>
    %417 = math.exp %416 : vector<4x1xf32>
    %cst_47 = arith.constant 1.000000e+00 : f32
    %418 = vector.broadcast %cst_47 : f32 to vector<4x1xf32>
    %419 = arith.addf %418, %417 : vector<4x1xf32>
    %420 = arith.divf %418, %419 : vector<4x1xf32>
    %421 = vector.extract_strided_slice %60 {offsets = [0, 4], sizes = [4, 1], strides = [1, 1]} : vector<4x8xf32> to vector<4x1xf32>
    %422 = vector.extract_strided_slice %3 {offsets = [0, 6], sizes = [1, 1], strides = [1, 1]} : vector<1x8xf32> to vector<1x1xf32>
    %423 = vector.broadcast %422 : vector<1x1xf32> to vector<4x1xf32>
    %424 = arith.mulf %345, %423 : vector<4x1xf32>
    %425 = arith.addf %421, %424 : vector<4x1xf32>
    %426 = math.tanh %425 : vector<4x1xf32>
    %427 = vector.extract_strided_slice %68 {offsets = [0, 4], sizes = [4, 1], strides = [1, 1]} : vector<4x8xf32> to vector<4x1xf32>
    %428 = vector.extract_strided_slice %3 {offsets = [0, 7], sizes = [1, 1], strides = [1, 1]} : vector<1x8xf32> to vector<1x1xf32>
    %429 = vector.broadcast %428 : vector<1x1xf32> to vector<4x1xf32>
    %430 = arith.mulf %345, %429 : vector<4x1xf32>
    %431 = arith.addf %427, %430 : vector<4x1xf32>
    %432 = arith.negf %431 : vector<4x1xf32>
    %433 = math.exp %432 : vector<4x1xf32>
    %cst_48 = arith.constant 1.000000e+00 : f32
    %434 = vector.broadcast %cst_48 : f32 to vector<4x1xf32>
    %435 = arith.addf %434, %433 : vector<4x1xf32>
    %436 = arith.divf %434, %435 : vector<4x1xf32>
    %437 = arith.mulf %420, %343 : vector<4x1xf32>
    %438 = arith.mulf %410, %426 : vector<4x1xf32>
    %439 = arith.addf %437, %438 : vector<4x1xf32>
    %440 = math.tanh %439 : vector<4x1xf32>
    %441 = arith.mulf %436, %440 : vector<4x1xf32>
    %c3_i32 = arith.constant 3 : i32
    %442 = vector.broadcast %c3_i32 : i32 to vector<4x8xi32>
    %443 = arith.cmpi eq, %69, %442 : vector<4x8xi32>
    %cst_49 = arith.constant 0.000000e+00 : f32
    %444 = vector.shape_cast %400 : vector<4x1xf32> to vector<4x1xf32>
    %445 = vector.broadcast %444 : vector<4x1xf32> to vector<4x8xf32>
    %446 = vector.broadcast %cst_49 : f32 to vector<4x8xf32>
    %447 = arith.select %443, %445, %446 : vector<4x8xi1>, vector<4x8xf32>
    %448 = arith.addf %359, %447 : vector<4x8xf32>
    %c4_i32 = arith.constant 4 : i32
    %449 = vector.broadcast %c4_i32 : i32 to vector<4x8xi32>
    %450 = arith.cmpi eq, %69, %449 : vector<4x8xi32>
    %cst_50 = arith.constant 0.000000e+00 : f32
    %451 = vector.shape_cast %441 : vector<4x1xf32> to vector<4x1xf32>
    %452 = vector.broadcast %451 : vector<4x1xf32> to vector<4x8xf32>
    %453 = vector.broadcast %cst_50 : f32 to vector<4x8xf32>
    %454 = arith.select %450, %452, %453 : vector<4x8xi1>, vector<4x8xf32>
    %455 = arith.addf %448, %454 : vector<4x8xf32>
    %456 = vector.extract_strided_slice %12 {offsets = [0, 4], sizes = [4, 1], strides = [1, 1]} : vector<4x8xf32> to vector<4x1xf32>
    %457 = vector.extract_strided_slice %3 {offsets = [0, 0], sizes = [1, 1], strides = [1, 1]} : vector<1x8xf32> to vector<1x1xf32>
    %458 = vector.broadcast %457 : vector<1x1xf32> to vector<4x1xf32>
    %459 = arith.mulf %400, %458 : vector<4x1xf32>
    %460 = arith.addf %456, %459 : vector<4x1xf32>
    %461 = arith.negf %460 : vector<4x1xf32>
    %462 = math.exp %461 : vector<4x1xf32>
    %cst_51 = arith.constant 1.000000e+00 : f32
    %463 = vector.broadcast %cst_51 : f32 to vector<4x1xf32>
    %464 = arith.addf %463, %462 : vector<4x1xf32>
    %465 = arith.divf %463, %464 : vector<4x1xf32>
    %466 = vector.extract_strided_slice %20 {offsets = [0, 4], sizes = [4, 1], strides = [1, 1]} : vector<4x8xf32> to vector<4x1xf32>
    %467 = vector.extract_strided_slice %3 {offsets = [0, 1], sizes = [1, 1], strides = [1, 1]} : vector<1x8xf32> to vector<1x1xf32>
    %468 = vector.broadcast %467 : vector<1x1xf32> to vector<4x1xf32>
    %469 = arith.mulf %400, %468 : vector<4x1xf32>
    %470 = arith.addf %466, %469 : vector<4x1xf32>
    %471 = arith.negf %470 : vector<4x1xf32>
    %472 = math.exp %471 : vector<4x1xf32>
    %cst_52 = arith.constant 1.000000e+00 : f32
    %473 = vector.broadcast %cst_52 : f32 to vector<4x1xf32>
    %474 = arith.addf %473, %472 : vector<4x1xf32>
    %475 = arith.divf %473, %474 : vector<4x1xf32>
    %476 = vector.extract_strided_slice %28 {offsets = [0, 4], sizes = [4, 1], strides = [1, 1]} : vector<4x8xf32> to vector<4x1xf32>
    %477 = vector.extract_strided_slice %3 {offsets = [0, 2], sizes = [1, 1], strides = [1, 1]} : vector<1x8xf32> to vector<1x1xf32>
    %478 = vector.broadcast %477 : vector<1x1xf32> to vector<4x1xf32>
    %479 = arith.mulf %400, %478 : vector<4x1xf32>
    %480 = arith.addf %476, %479 : vector<4x1xf32>
    %481 = math.tanh %480 : vector<4x1xf32>
    %482 = vector.extract_strided_slice %36 {offsets = [0, 4], sizes = [4, 1], strides = [1, 1]} : vector<4x8xf32> to vector<4x1xf32>
    %483 = vector.extract_strided_slice %3 {offsets = [0, 3], sizes = [1, 1], strides = [1, 1]} : vector<1x8xf32> to vector<1x1xf32>
    %484 = vector.broadcast %483 : vector<1x1xf32> to vector<4x1xf32>
    %485 = arith.mulf %400, %484 : vector<4x1xf32>
    %486 = arith.addf %482, %485 : vector<4x1xf32>
    %487 = arith.negf %486 : vector<4x1xf32>
    %488 = math.exp %487 : vector<4x1xf32>
    %cst_53 = arith.constant 1.000000e+00 : f32
    %489 = vector.broadcast %cst_53 : f32 to vector<4x1xf32>
    %490 = arith.addf %489, %488 : vector<4x1xf32>
    %491 = arith.divf %489, %490 : vector<4x1xf32>
    %492 = arith.mulf %475, %398 : vector<4x1xf32>
    %493 = arith.mulf %465, %481 : vector<4x1xf32>
    %494 = arith.addf %492, %493 : vector<4x1xf32>
    %495 = math.tanh %494 : vector<4x1xf32>
    %496 = arith.mulf %491, %495 : vector<4x1xf32>
    %497 = vector.extract_strided_slice %44 {offsets = [0, 3], sizes = [4, 1], strides = [1, 1]} : vector<4x8xf32> to vector<4x1xf32>
    %498 = vector.extract_strided_slice %3 {offsets = [0, 4], sizes = [1, 1], strides = [1, 1]} : vector<1x8xf32> to vector<1x1xf32>
    %499 = vector.broadcast %498 : vector<1x1xf32> to vector<4x1xf32>
    %500 = arith.mulf %441, %499 : vector<4x1xf32>
    %501 = arith.addf %497, %500 : vector<4x1xf32>
    %502 = arith.negf %501 : vector<4x1xf32>
    %503 = math.exp %502 : vector<4x1xf32>
    %cst_54 = arith.constant 1.000000e+00 : f32
    %504 = vector.broadcast %cst_54 : f32 to vector<4x1xf32>
    %505 = arith.addf %504, %503 : vector<4x1xf32>
    %506 = arith.divf %504, %505 : vector<4x1xf32>
    %507 = vector.extract_strided_slice %52 {offsets = [0, 3], sizes = [4, 1], strides = [1, 1]} : vector<4x8xf32> to vector<4x1xf32>
    %508 = vector.extract_strided_slice %3 {offsets = [0, 5], sizes = [1, 1], strides = [1, 1]} : vector<1x8xf32> to vector<1x1xf32>
    %509 = vector.broadcast %508 : vector<1x1xf32> to vector<4x1xf32>
    %510 = arith.mulf %441, %509 : vector<4x1xf32>
    %511 = arith.addf %507, %510 : vector<4x1xf32>
    %512 = arith.negf %511 : vector<4x1xf32>
    %513 = math.exp %512 : vector<4x1xf32>
    %cst_55 = arith.constant 1.000000e+00 : f32
    %514 = vector.broadcast %cst_55 : f32 to vector<4x1xf32>
    %515 = arith.addf %514, %513 : vector<4x1xf32>
    %516 = arith.divf %514, %515 : vector<4x1xf32>
    %517 = vector.extract_strided_slice %60 {offsets = [0, 3], sizes = [4, 1], strides = [1, 1]} : vector<4x8xf32> to vector<4x1xf32>
    %518 = vector.extract_strided_slice %3 {offsets = [0, 6], sizes = [1, 1], strides = [1, 1]} : vector<1x8xf32> to vector<1x1xf32>
    %519 = vector.broadcast %518 : vector<1x1xf32> to vector<4x1xf32>
    %520 = arith.mulf %441, %519 : vector<4x1xf32>
    %521 = arith.addf %517, %520 : vector<4x1xf32>
    %522 = math.tanh %521 : vector<4x1xf32>
    %523 = vector.extract_strided_slice %68 {offsets = [0, 3], sizes = [4, 1], strides = [1, 1]} : vector<4x8xf32> to vector<4x1xf32>
    %524 = vector.extract_strided_slice %3 {offsets = [0, 7], sizes = [1, 1], strides = [1, 1]} : vector<1x8xf32> to vector<1x1xf32>
    %525 = vector.broadcast %524 : vector<1x1xf32> to vector<4x1xf32>
    %526 = arith.mulf %441, %525 : vector<4x1xf32>
    %527 = arith.addf %523, %526 : vector<4x1xf32>
    %528 = arith.negf %527 : vector<4x1xf32>
    %529 = math.exp %528 : vector<4x1xf32>
    %cst_56 = arith.constant 1.000000e+00 : f32
    %530 = vector.broadcast %cst_56 : f32 to vector<4x1xf32>
    %531 = arith.addf %530, %529 : vector<4x1xf32>
    %532 = arith.divf %530, %531 : vector<4x1xf32>
    %533 = arith.mulf %516, %439 : vector<4x1xf32>
    %534 = arith.mulf %506, %522 : vector<4x1xf32>
    %535 = arith.addf %533, %534 : vector<4x1xf32>
    %536 = math.tanh %535 : vector<4x1xf32>
    %537 = arith.mulf %532, %536 : vector<4x1xf32>
    %c4_i32_57 = arith.constant 4 : i32
    %538 = vector.broadcast %c4_i32_57 : i32 to vector<4x8xi32>
    %539 = arith.cmpi eq, %69, %538 : vector<4x8xi32>
    %cst_58 = arith.constant 0.000000e+00 : f32
    %540 = vector.shape_cast %496 : vector<4x1xf32> to vector<4x1xf32>
    %541 = vector.broadcast %540 : vector<4x1xf32> to vector<4x8xf32>
    %542 = vector.broadcast %cst_58 : f32 to vector<4x8xf32>
    %543 = arith.select %539, %541, %542 : vector<4x8xi1>, vector<4x8xf32>
    %544 = arith.addf %455, %543 : vector<4x8xf32>
    %c3_i32_59 = arith.constant 3 : i32
    %545 = vector.broadcast %c3_i32_59 : i32 to vector<4x8xi32>
    %546 = arith.cmpi eq, %69, %545 : vector<4x8xi32>
    %cst_60 = arith.constant 0.000000e+00 : f32
    %547 = vector.shape_cast %537 : vector<4x1xf32> to vector<4x1xf32>
    %548 = vector.broadcast %547 : vector<4x1xf32> to vector<4x8xf32>
    %549 = vector.broadcast %cst_60 : f32 to vector<4x8xf32>
    %550 = arith.select %546, %548, %549 : vector<4x8xi1>, vector<4x8xf32>
    %551 = arith.addf %544, %550 : vector<4x8xf32>
    %552 = vector.extract_strided_slice %12 {offsets = [0, 5], sizes = [4, 1], strides = [1, 1]} : vector<4x8xf32> to vector<4x1xf32>
    %553 = vector.extract_strided_slice %3 {offsets = [0, 0], sizes = [1, 1], strides = [1, 1]} : vector<1x8xf32> to vector<1x1xf32>
    %554 = vector.broadcast %553 : vector<1x1xf32> to vector<4x1xf32>
    %555 = arith.mulf %496, %554 : vector<4x1xf32>
    %556 = arith.addf %552, %555 : vector<4x1xf32>
    %557 = arith.negf %556 : vector<4x1xf32>
    %558 = math.exp %557 : vector<4x1xf32>
    %cst_61 = arith.constant 1.000000e+00 : f32
    %559 = vector.broadcast %cst_61 : f32 to vector<4x1xf32>
    %560 = arith.addf %559, %558 : vector<4x1xf32>
    %561 = arith.divf %559, %560 : vector<4x1xf32>
    %562 = vector.extract_strided_slice %20 {offsets = [0, 5], sizes = [4, 1], strides = [1, 1]} : vector<4x8xf32> to vector<4x1xf32>
    %563 = vector.extract_strided_slice %3 {offsets = [0, 1], sizes = [1, 1], strides = [1, 1]} : vector<1x8xf32> to vector<1x1xf32>
    %564 = vector.broadcast %563 : vector<1x1xf32> to vector<4x1xf32>
    %565 = arith.mulf %496, %564 : vector<4x1xf32>
    %566 = arith.addf %562, %565 : vector<4x1xf32>
    %567 = arith.negf %566 : vector<4x1xf32>
    %568 = math.exp %567 : vector<4x1xf32>
    %cst_62 = arith.constant 1.000000e+00 : f32
    %569 = vector.broadcast %cst_62 : f32 to vector<4x1xf32>
    %570 = arith.addf %569, %568 : vector<4x1xf32>
    %571 = arith.divf %569, %570 : vector<4x1xf32>
    %572 = vector.extract_strided_slice %28 {offsets = [0, 5], sizes = [4, 1], strides = [1, 1]} : vector<4x8xf32> to vector<4x1xf32>
    %573 = vector.extract_strided_slice %3 {offsets = [0, 2], sizes = [1, 1], strides = [1, 1]} : vector<1x8xf32> to vector<1x1xf32>
    %574 = vector.broadcast %573 : vector<1x1xf32> to vector<4x1xf32>
    %575 = arith.mulf %496, %574 : vector<4x1xf32>
    %576 = arith.addf %572, %575 : vector<4x1xf32>
    %577 = math.tanh %576 : vector<4x1xf32>
    %578 = vector.extract_strided_slice %36 {offsets = [0, 5], sizes = [4, 1], strides = [1, 1]} : vector<4x8xf32> to vector<4x1xf32>
    %579 = vector.extract_strided_slice %3 {offsets = [0, 3], sizes = [1, 1], strides = [1, 1]} : vector<1x8xf32> to vector<1x1xf32>
    %580 = vector.broadcast %579 : vector<1x1xf32> to vector<4x1xf32>
    %581 = arith.mulf %496, %580 : vector<4x1xf32>
    %582 = arith.addf %578, %581 : vector<4x1xf32>
    %583 = arith.negf %582 : vector<4x1xf32>
    %584 = math.exp %583 : vector<4x1xf32>
    %cst_63 = arith.constant 1.000000e+00 : f32
    %585 = vector.broadcast %cst_63 : f32 to vector<4x1xf32>
    %586 = arith.addf %585, %584 : vector<4x1xf32>
    %587 = arith.divf %585, %586 : vector<4x1xf32>
    %588 = arith.mulf %571, %494 : vector<4x1xf32>
    %589 = arith.mulf %561, %577 : vector<4x1xf32>
    %590 = arith.addf %588, %589 : vector<4x1xf32>
    %591 = math.tanh %590 : vector<4x1xf32>
    %592 = arith.mulf %587, %591 : vector<4x1xf32>
    %593 = vector.extract_strided_slice %44 {offsets = [0, 2], sizes = [4, 1], strides = [1, 1]} : vector<4x8xf32> to vector<4x1xf32>
    %594 = vector.extract_strided_slice %3 {offsets = [0, 4], sizes = [1, 1], strides = [1, 1]} : vector<1x8xf32> to vector<1x1xf32>
    %595 = vector.broadcast %594 : vector<1x1xf32> to vector<4x1xf32>
    %596 = arith.mulf %537, %595 : vector<4x1xf32>
    %597 = arith.addf %593, %596 : vector<4x1xf32>
    %598 = arith.negf %597 : vector<4x1xf32>
    %599 = math.exp %598 : vector<4x1xf32>
    %cst_64 = arith.constant 1.000000e+00 : f32
    %600 = vector.broadcast %cst_64 : f32 to vector<4x1xf32>
    %601 = arith.addf %600, %599 : vector<4x1xf32>
    %602 = arith.divf %600, %601 : vector<4x1xf32>
    %603 = vector.extract_strided_slice %52 {offsets = [0, 2], sizes = [4, 1], strides = [1, 1]} : vector<4x8xf32> to vector<4x1xf32>
    %604 = vector.extract_strided_slice %3 {offsets = [0, 5], sizes = [1, 1], strides = [1, 1]} : vector<1x8xf32> to vector<1x1xf32>
    %605 = vector.broadcast %604 : vector<1x1xf32> to vector<4x1xf32>
    %606 = arith.mulf %537, %605 : vector<4x1xf32>
    %607 = arith.addf %603, %606 : vector<4x1xf32>
    %608 = arith.negf %607 : vector<4x1xf32>
    %609 = math.exp %608 : vector<4x1xf32>
    %cst_65 = arith.constant 1.000000e+00 : f32
    %610 = vector.broadcast %cst_65 : f32 to vector<4x1xf32>
    %611 = arith.addf %610, %609 : vector<4x1xf32>
    %612 = arith.divf %610, %611 : vector<4x1xf32>
    %613 = vector.extract_strided_slice %60 {offsets = [0, 2], sizes = [4, 1], strides = [1, 1]} : vector<4x8xf32> to vector<4x1xf32>
    %614 = vector.extract_strided_slice %3 {offsets = [0, 6], sizes = [1, 1], strides = [1, 1]} : vector<1x8xf32> to vector<1x1xf32>
    %615 = vector.broadcast %614 : vector<1x1xf32> to vector<4x1xf32>
    %616 = arith.mulf %537, %615 : vector<4x1xf32>
    %617 = arith.addf %613, %616 : vector<4x1xf32>
    %618 = math.tanh %617 : vector<4x1xf32>
    %619 = vector.extract_strided_slice %68 {offsets = [0, 2], sizes = [4, 1], strides = [1, 1]} : vector<4x8xf32> to vector<4x1xf32>
    %620 = vector.extract_strided_slice %3 {offsets = [0, 7], sizes = [1, 1], strides = [1, 1]} : vector<1x8xf32> to vector<1x1xf32>
    %621 = vector.broadcast %620 : vector<1x1xf32> to vector<4x1xf32>
    %622 = arith.mulf %537, %621 : vector<4x1xf32>
    %623 = arith.addf %619, %622 : vector<4x1xf32>
    %624 = arith.negf %623 : vector<4x1xf32>
    %625 = math.exp %624 : vector<4x1xf32>
    %cst_66 = arith.constant 1.000000e+00 : f32
    %626 = vector.broadcast %cst_66 : f32 to vector<4x1xf32>
    %627 = arith.addf %626, %625 : vector<4x1xf32>
    %628 = arith.divf %626, %627 : vector<4x1xf32>
    %629 = arith.mulf %612, %535 : vector<4x1xf32>
    %630 = arith.mulf %602, %618 : vector<4x1xf32>
    %631 = arith.addf %629, %630 : vector<4x1xf32>
    %632 = math.tanh %631 : vector<4x1xf32>
    %633 = arith.mulf %628, %632 : vector<4x1xf32>
    %c5_i32_67 = arith.constant 5 : i32
    %634 = vector.broadcast %c5_i32_67 : i32 to vector<4x8xi32>
    %635 = arith.cmpi eq, %69, %634 : vector<4x8xi32>
    %cst_68 = arith.constant 0.000000e+00 : f32
    %636 = vector.shape_cast %592 : vector<4x1xf32> to vector<4x1xf32>
    %637 = vector.broadcast %636 : vector<4x1xf32> to vector<4x8xf32>
    %638 = vector.broadcast %cst_68 : f32 to vector<4x8xf32>
    %639 = arith.select %635, %637, %638 : vector<4x8xi1>, vector<4x8xf32>
    %640 = arith.addf %551, %639 : vector<4x8xf32>
    %c2_i32_69 = arith.constant 2 : i32
    %641 = vector.broadcast %c2_i32_69 : i32 to vector<4x8xi32>
    %642 = arith.cmpi eq, %69, %641 : vector<4x8xi32>
    %cst_70 = arith.constant 0.000000e+00 : f32
    %643 = vector.shape_cast %633 : vector<4x1xf32> to vector<4x1xf32>
    %644 = vector.broadcast %643 : vector<4x1xf32> to vector<4x8xf32>
    %645 = vector.broadcast %cst_70 : f32 to vector<4x8xf32>
    %646 = arith.select %642, %644, %645 : vector<4x8xi1>, vector<4x8xf32>
    %647 = arith.addf %640, %646 : vector<4x8xf32>
    %648 = vector.extract_strided_slice %12 {offsets = [0, 6], sizes = [4, 1], strides = [1, 1]} : vector<4x8xf32> to vector<4x1xf32>
    %649 = vector.extract_strided_slice %3 {offsets = [0, 0], sizes = [1, 1], strides = [1, 1]} : vector<1x8xf32> to vector<1x1xf32>
    %650 = vector.broadcast %649 : vector<1x1xf32> to vector<4x1xf32>
    %651 = arith.mulf %592, %650 : vector<4x1xf32>
    %652 = arith.addf %648, %651 : vector<4x1xf32>
    %653 = arith.negf %652 : vector<4x1xf32>
    %654 = math.exp %653 : vector<4x1xf32>
    %cst_71 = arith.constant 1.000000e+00 : f32
    %655 = vector.broadcast %cst_71 : f32 to vector<4x1xf32>
    %656 = arith.addf %655, %654 : vector<4x1xf32>
    %657 = arith.divf %655, %656 : vector<4x1xf32>
    %658 = vector.extract_strided_slice %20 {offsets = [0, 6], sizes = [4, 1], strides = [1, 1]} : vector<4x8xf32> to vector<4x1xf32>
    %659 = vector.extract_strided_slice %3 {offsets = [0, 1], sizes = [1, 1], strides = [1, 1]} : vector<1x8xf32> to vector<1x1xf32>
    %660 = vector.broadcast %659 : vector<1x1xf32> to vector<4x1xf32>
    %661 = arith.mulf %592, %660 : vector<4x1xf32>
    %662 = arith.addf %658, %661 : vector<4x1xf32>
    %663 = arith.negf %662 : vector<4x1xf32>
    %664 = math.exp %663 : vector<4x1xf32>
    %cst_72 = arith.constant 1.000000e+00 : f32
    %665 = vector.broadcast %cst_72 : f32 to vector<4x1xf32>
    %666 = arith.addf %665, %664 : vector<4x1xf32>
    %667 = arith.divf %665, %666 : vector<4x1xf32>
    %668 = vector.extract_strided_slice %28 {offsets = [0, 6], sizes = [4, 1], strides = [1, 1]} : vector<4x8xf32> to vector<4x1xf32>
    %669 = vector.extract_strided_slice %3 {offsets = [0, 2], sizes = [1, 1], strides = [1, 1]} : vector<1x8xf32> to vector<1x1xf32>
    %670 = vector.broadcast %669 : vector<1x1xf32> to vector<4x1xf32>
    %671 = arith.mulf %592, %670 : vector<4x1xf32>
    %672 = arith.addf %668, %671 : vector<4x1xf32>
    %673 = math.tanh %672 : vector<4x1xf32>
    %674 = vector.extract_strided_slice %36 {offsets = [0, 6], sizes = [4, 1], strides = [1, 1]} : vector<4x8xf32> to vector<4x1xf32>
    %675 = vector.extract_strided_slice %3 {offsets = [0, 3], sizes = [1, 1], strides = [1, 1]} : vector<1x8xf32> to vector<1x1xf32>
    %676 = vector.broadcast %675 : vector<1x1xf32> to vector<4x1xf32>
    %677 = arith.mulf %592, %676 : vector<4x1xf32>
    %678 = arith.addf %674, %677 : vector<4x1xf32>
    %679 = arith.negf %678 : vector<4x1xf32>
    %680 = math.exp %679 : vector<4x1xf32>
    %cst_73 = arith.constant 1.000000e+00 : f32
    %681 = vector.broadcast %cst_73 : f32 to vector<4x1xf32>
    %682 = arith.addf %681, %680 : vector<4x1xf32>
    %683 = arith.divf %681, %682 : vector<4x1xf32>
    %684 = arith.mulf %667, %590 : vector<4x1xf32>
    %685 = arith.mulf %657, %673 : vector<4x1xf32>
    %686 = arith.addf %684, %685 : vector<4x1xf32>
    %687 = math.tanh %686 : vector<4x1xf32>
    %688 = arith.mulf %683, %687 : vector<4x1xf32>
    %689 = vector.extract_strided_slice %44 {offsets = [0, 1], sizes = [4, 1], strides = [1, 1]} : vector<4x8xf32> to vector<4x1xf32>
    %690 = vector.extract_strided_slice %3 {offsets = [0, 4], sizes = [1, 1], strides = [1, 1]} : vector<1x8xf32> to vector<1x1xf32>
    %691 = vector.broadcast %690 : vector<1x1xf32> to vector<4x1xf32>
    %692 = arith.mulf %633, %691 : vector<4x1xf32>
    %693 = arith.addf %689, %692 : vector<4x1xf32>
    %694 = arith.negf %693 : vector<4x1xf32>
    %695 = math.exp %694 : vector<4x1xf32>
    %cst_74 = arith.constant 1.000000e+00 : f32
    %696 = vector.broadcast %cst_74 : f32 to vector<4x1xf32>
    %697 = arith.addf %696, %695 : vector<4x1xf32>
    %698 = arith.divf %696, %697 : vector<4x1xf32>
    %699 = vector.extract_strided_slice %52 {offsets = [0, 1], sizes = [4, 1], strides = [1, 1]} : vector<4x8xf32> to vector<4x1xf32>
    %700 = vector.extract_strided_slice %3 {offsets = [0, 5], sizes = [1, 1], strides = [1, 1]} : vector<1x8xf32> to vector<1x1xf32>
    %701 = vector.broadcast %700 : vector<1x1xf32> to vector<4x1xf32>
    %702 = arith.mulf %633, %701 : vector<4x1xf32>
    %703 = arith.addf %699, %702 : vector<4x1xf32>
    %704 = arith.negf %703 : vector<4x1xf32>
    %705 = math.exp %704 : vector<4x1xf32>
    %cst_75 = arith.constant 1.000000e+00 : f32
    %706 = vector.broadcast %cst_75 : f32 to vector<4x1xf32>
    %707 = arith.addf %706, %705 : vector<4x1xf32>
    %708 = arith.divf %706, %707 : vector<4x1xf32>
    %709 = vector.extract_strided_slice %60 {offsets = [0, 1], sizes = [4, 1], strides = [1, 1]} : vector<4x8xf32> to vector<4x1xf32>
    %710 = vector.extract_strided_slice %3 {offsets = [0, 6], sizes = [1, 1], strides = [1, 1]} : vector<1x8xf32> to vector<1x1xf32>
    %711 = vector.broadcast %710 : vector<1x1xf32> to vector<4x1xf32>
    %712 = arith.mulf %633, %711 : vector<4x1xf32>
    %713 = arith.addf %709, %712 : vector<4x1xf32>
    %714 = math.tanh %713 : vector<4x1xf32>
    %715 = vector.extract_strided_slice %68 {offsets = [0, 1], sizes = [4, 1], strides = [1, 1]} : vector<4x8xf32> to vector<4x1xf32>
    %716 = vector.extract_strided_slice %3 {offsets = [0, 7], sizes = [1, 1], strides = [1, 1]} : vector<1x8xf32> to vector<1x1xf32>
    %717 = vector.broadcast %716 : vector<1x1xf32> to vector<4x1xf32>
    %718 = arith.mulf %633, %717 : vector<4x1xf32>
    %719 = arith.addf %715, %718 : vector<4x1xf32>
    %720 = arith.negf %719 : vector<4x1xf32>
    %721 = math.exp %720 : vector<4x1xf32>
    %cst_76 = arith.constant 1.000000e+00 : f32
    %722 = vector.broadcast %cst_76 : f32 to vector<4x1xf32>
    %723 = arith.addf %722, %721 : vector<4x1xf32>
    %724 = arith.divf %722, %723 : vector<4x1xf32>
    %725 = arith.mulf %708, %631 : vector<4x1xf32>
    %726 = arith.mulf %698, %714 : vector<4x1xf32>
    %727 = arith.addf %725, %726 : vector<4x1xf32>
    %728 = math.tanh %727 : vector<4x1xf32>
    %729 = arith.mulf %724, %728 : vector<4x1xf32>
    %c6_i32_77 = arith.constant 6 : i32
    %730 = vector.broadcast %c6_i32_77 : i32 to vector<4x8xi32>
    %731 = arith.cmpi eq, %69, %730 : vector<4x8xi32>
    %cst_78 = arith.constant 0.000000e+00 : f32
    %732 = vector.shape_cast %688 : vector<4x1xf32> to vector<4x1xf32>
    %733 = vector.broadcast %732 : vector<4x1xf32> to vector<4x8xf32>
    %734 = vector.broadcast %cst_78 : f32 to vector<4x8xf32>
    %735 = arith.select %731, %733, %734 : vector<4x8xi1>, vector<4x8xf32>
    %736 = arith.addf %647, %735 : vector<4x8xf32>
    %c1_i32_79 = arith.constant 1 : i32
    %737 = vector.broadcast %c1_i32_79 : i32 to vector<4x8xi32>
    %738 = arith.cmpi eq, %69, %737 : vector<4x8xi32>
    %cst_80 = arith.constant 0.000000e+00 : f32
    %739 = vector.shape_cast %729 : vector<4x1xf32> to vector<4x1xf32>
    %740 = vector.broadcast %739 : vector<4x1xf32> to vector<4x8xf32>
    %741 = vector.broadcast %cst_80 : f32 to vector<4x8xf32>
    %742 = arith.select %738, %740, %741 : vector<4x8xi1>, vector<4x8xf32>
    %743 = arith.addf %736, %742 : vector<4x8xf32>
    %744 = vector.extract_strided_slice %12 {offsets = [0, 7], sizes = [4, 1], strides = [1, 1]} : vector<4x8xf32> to vector<4x1xf32>
    %745 = vector.extract_strided_slice %3 {offsets = [0, 0], sizes = [1, 1], strides = [1, 1]} : vector<1x8xf32> to vector<1x1xf32>
    %746 = vector.broadcast %745 : vector<1x1xf32> to vector<4x1xf32>
    %747 = arith.mulf %688, %746 : vector<4x1xf32>
    %748 = arith.addf %744, %747 : vector<4x1xf32>
    %749 = arith.negf %748 : vector<4x1xf32>
    %750 = math.exp %749 : vector<4x1xf32>
    %cst_81 = arith.constant 1.000000e+00 : f32
    %751 = vector.broadcast %cst_81 : f32 to vector<4x1xf32>
    %752 = arith.addf %751, %750 : vector<4x1xf32>
    %753 = arith.divf %751, %752 : vector<4x1xf32>
    %754 = vector.extract_strided_slice %20 {offsets = [0, 7], sizes = [4, 1], strides = [1, 1]} : vector<4x8xf32> to vector<4x1xf32>
    %755 = vector.extract_strided_slice %3 {offsets = [0, 1], sizes = [1, 1], strides = [1, 1]} : vector<1x8xf32> to vector<1x1xf32>
    %756 = vector.broadcast %755 : vector<1x1xf32> to vector<4x1xf32>
    %757 = arith.mulf %688, %756 : vector<4x1xf32>
    %758 = arith.addf %754, %757 : vector<4x1xf32>
    %759 = arith.negf %758 : vector<4x1xf32>
    %760 = math.exp %759 : vector<4x1xf32>
    %cst_82 = arith.constant 1.000000e+00 : f32
    %761 = vector.broadcast %cst_82 : f32 to vector<4x1xf32>
    %762 = arith.addf %761, %760 : vector<4x1xf32>
    %763 = arith.divf %761, %762 : vector<4x1xf32>
    %764 = vector.extract_strided_slice %28 {offsets = [0, 7], sizes = [4, 1], strides = [1, 1]} : vector<4x8xf32> to vector<4x1xf32>
    %765 = vector.extract_strided_slice %3 {offsets = [0, 2], sizes = [1, 1], strides = [1, 1]} : vector<1x8xf32> to vector<1x1xf32>
    %766 = vector.broadcast %765 : vector<1x1xf32> to vector<4x1xf32>
    %767 = arith.mulf %688, %766 : vector<4x1xf32>
    %768 = arith.addf %764, %767 : vector<4x1xf32>
    %769 = math.tanh %768 : vector<4x1xf32>
    %770 = vector.extract_strided_slice %36 {offsets = [0, 7], sizes = [4, 1], strides = [1, 1]} : vector<4x8xf32> to vector<4x1xf32>
    %771 = vector.extract_strided_slice %3 {offsets = [0, 3], sizes = [1, 1], strides = [1, 1]} : vector<1x8xf32> to vector<1x1xf32>
    %772 = vector.broadcast %771 : vector<1x1xf32> to vector<4x1xf32>
    %773 = arith.mulf %688, %772 : vector<4x1xf32>
    %774 = arith.addf %770, %773 : vector<4x1xf32>
    %775 = arith.negf %774 : vector<4x1xf32>
    %776 = math.exp %775 : vector<4x1xf32>
    %cst_83 = arith.constant 1.000000e+00 : f32
    %777 = vector.broadcast %cst_83 : f32 to vector<4x1xf32>
    %778 = arith.addf %777, %776 : vector<4x1xf32>
    %779 = arith.divf %777, %778 : vector<4x1xf32>
    %780 = arith.mulf %763, %686 : vector<4x1xf32>
    %781 = arith.mulf %753, %769 : vector<4x1xf32>
    %782 = arith.addf %780, %781 : vector<4x1xf32>
    %783 = math.tanh %782 : vector<4x1xf32>
    %784 = arith.mulf %779, %783 : vector<4x1xf32>
    %785 = vector.extract_strided_slice %44 {offsets = [0, 0], sizes = [4, 1], strides = [1, 1]} : vector<4x8xf32> to vector<4x1xf32>
    %786 = vector.extract_strided_slice %3 {offsets = [0, 4], sizes = [1, 1], strides = [1, 1]} : vector<1x8xf32> to vector<1x1xf32>
    %787 = vector.broadcast %786 : vector<1x1xf32> to vector<4x1xf32>
    %788 = arith.mulf %729, %787 : vector<4x1xf32>
    %789 = arith.addf %785, %788 : vector<4x1xf32>
    %790 = arith.negf %789 : vector<4x1xf32>
    %791 = math.exp %790 : vector<4x1xf32>
    %cst_84 = arith.constant 1.000000e+00 : f32
    %792 = vector.broadcast %cst_84 : f32 to vector<4x1xf32>
    %793 = arith.addf %792, %791 : vector<4x1xf32>
    %794 = arith.divf %792, %793 : vector<4x1xf32>
    %795 = vector.extract_strided_slice %52 {offsets = [0, 0], sizes = [4, 1], strides = [1, 1]} : vector<4x8xf32> to vector<4x1xf32>
    %796 = vector.extract_strided_slice %3 {offsets = [0, 5], sizes = [1, 1], strides = [1, 1]} : vector<1x8xf32> to vector<1x1xf32>
    %797 = vector.broadcast %796 : vector<1x1xf32> to vector<4x1xf32>
    %798 = arith.mulf %729, %797 : vector<4x1xf32>
    %799 = arith.addf %795, %798 : vector<4x1xf32>
    %800 = arith.negf %799 : vector<4x1xf32>
    %801 = math.exp %800 : vector<4x1xf32>
    %cst_85 = arith.constant 1.000000e+00 : f32
    %802 = vector.broadcast %cst_85 : f32 to vector<4x1xf32>
    %803 = arith.addf %802, %801 : vector<4x1xf32>
    %804 = arith.divf %802, %803 : vector<4x1xf32>
    %805 = vector.extract_strided_slice %60 {offsets = [0, 0], sizes = [4, 1], strides = [1, 1]} : vector<4x8xf32> to vector<4x1xf32>
    %806 = vector.extract_strided_slice %3 {offsets = [0, 6], sizes = [1, 1], strides = [1, 1]} : vector<1x8xf32> to vector<1x1xf32>
    %807 = vector.broadcast %806 : vector<1x1xf32> to vector<4x1xf32>
    %808 = arith.mulf %729, %807 : vector<4x1xf32>
    %809 = arith.addf %805, %808 : vector<4x1xf32>
    %810 = math.tanh %809 : vector<4x1xf32>
    %811 = vector.extract_strided_slice %68 {offsets = [0, 0], sizes = [4, 1], strides = [1, 1]} : vector<4x8xf32> to vector<4x1xf32>
    %812 = vector.extract_strided_slice %3 {offsets = [0, 7], sizes = [1, 1], strides = [1, 1]} : vector<1x8xf32> to vector<1x1xf32>
    %813 = vector.broadcast %812 : vector<1x1xf32> to vector<4x1xf32>
    %814 = arith.mulf %729, %813 : vector<4x1xf32>
    %815 = arith.addf %811, %814 : vector<4x1xf32>
    %816 = arith.negf %815 : vector<4x1xf32>
    %817 = math.exp %816 : vector<4x1xf32>
    %cst_86 = arith.constant 1.000000e+00 : f32
    %818 = vector.broadcast %cst_86 : f32 to vector<4x1xf32>
    %819 = arith.addf %818, %817 : vector<4x1xf32>
    %820 = arith.divf %818, %819 : vector<4x1xf32>
    %821 = arith.mulf %804, %727 : vector<4x1xf32>
    %822 = arith.mulf %794, %810 : vector<4x1xf32>
    %823 = arith.addf %821, %822 : vector<4x1xf32>
    %824 = math.tanh %823 : vector<4x1xf32>
    %825 = arith.mulf %820, %824 : vector<4x1xf32>
    %c7_i32_87 = arith.constant 7 : i32
    %826 = vector.broadcast %c7_i32_87 : i32 to vector<4x8xi32>
    %827 = arith.cmpi eq, %69, %826 : vector<4x8xi32>
    %cst_88 = arith.constant 0.000000e+00 : f32
    %828 = vector.shape_cast %784 : vector<4x1xf32> to vector<4x1xf32>
    %829 = vector.broadcast %828 : vector<4x1xf32> to vector<4x8xf32>
    %830 = vector.broadcast %cst_88 : f32 to vector<4x8xf32>
    %831 = arith.select %827, %829, %830 : vector<4x8xi1>, vector<4x8xf32>
    %832 = arith.addf %743, %831 : vector<4x8xf32>
    %c0_i32_89 = arith.constant 0 : i32
    %833 = vector.broadcast %c0_i32_89 : i32 to vector<4x8xi32>
    %834 = arith.cmpi eq, %69, %833 : vector<4x8xi32>
    %cst_90 = arith.constant 0.000000e+00 : f32
    %835 = vector.shape_cast %825 : vector<4x1xf32> to vector<4x1xf32>
    %836 = vector.broadcast %835 : vector<4x1xf32> to vector<4x8xf32>
    %837 = vector.broadcast %cst_90 : f32 to vector<4x8xf32>
    %838 = arith.select %834, %836, %837 : vector<4x8xi1>, vector<4x8xf32>
    %839 = arith.addf %832, %838 : vector<4x8xf32>
    %cst_91 = arith.constant 5.000000e-01 : f32
    %840 = vector.broadcast %cst_91 : f32 to vector<4x8xf32>
    %841 = arith.cmpf ogt, %1, %840 : vector<4x8xf32>
    %cst_92 = arith.constant 0xFF800000 : f32
    %842 = vector.broadcast %cst_92 : f32 to vector<4x8xf32>
    %843 = arith.select %841, %839, %842 : vector<4x8xi1>, vector<4x8xf32>
    %cst_93 = arith.constant dense<0xFF800000> : vector<4xf32>
    %844 = vector.multi_reduction <maximumf>, %843, %cst_93 [1] : vector<4x8xf32> to vector<4xf32>
    %845 = vector.shape_cast %844 : vector<4xf32> to vector<4x1xf32>
    %846 = vector.broadcast %845 : vector<4x1xf32> to vector<4x8xf32>
    %847 = arith.subf %843, %846 : vector<4x8xf32>
    %848 = math.exp %847 : vector<4x8xf32>
    %cst_94 = arith.constant dense<0.000000e+00> : vector<4xf32>
    %849 = vector.multi_reduction <add>, %848, %cst_94 [1] : vector<4x8xf32> to vector<4xf32>
    %850 = vector.shape_cast %849 : vector<4xf32> to vector<4x1xf32>
    %851 = vector.broadcast %850 : vector<4x1xf32> to vector<4x8xf32>
    %852 = arith.divf %848, %851 : vector<4x8xf32>
    %cst_95 = arith.constant 1.000000e-01 : f32
    %853 = vector.broadcast %cst_95 : f32 to vector<4x8xf32>
    %854 = arith.cmpf oge, %852, %853 : vector<4x8xf32>
    %cst_96 = arith.constant 1.000000e+00 : f32
    %cst_97 = arith.constant 0.000000e+00 : f32
    %855 = vector.broadcast %cst_96 : f32 to vector<4x8xf32>
    %856 = vector.broadcast %cst_97 : f32 to vector<4x8xf32>
    %857 = arith.select %854, %855, %856 : vector<4x8xi1>, vector<4x8xf32>
    %cst_98 = arith.constant dense<0xFF800000> : vector<4xf32>
    %858 = vector.multi_reduction <maximumf>, %857, %cst_98 [1] : vector<4x8xf32> to vector<4xf32>
    %859 = vector.shape_cast %858 : vector<4xf32> to vector<4x1xf32>
    %860 = arith.sitofp %69 : vector<4x8xi32> to vector<4x8xf32>
    %cst_99 = arith.constant dense<0xFF800000> : vector<4xf32>
    %861 = vector.multi_reduction <maximumf>, %852, %cst_99 [1] : vector<4x8xf32> to vector<4xf32>
    %862 = vector.shape_cast %861 : vector<4xf32> to vector<4x1xf32>
    %863 = vector.broadcast %862 : vector<4x1xf32> to vector<4x8xf32>
    %864 = arith.cmpf oeq, %852, %863 : vector<4x8xf32>
    %cst_100 = arith.constant 1.000000e+00 : f32
    %cst_101 = arith.constant 0.000000e+00 : f32
    %865 = vector.broadcast %cst_100 : f32 to vector<4x8xf32>
    %866 = vector.broadcast %cst_101 : f32 to vector<4x8xf32>
    %867 = arith.select %864, %865, %866 : vector<4x8xi1>, vector<4x8xf32>
    %cst_102 = arith.constant 5.000000e-01 : f32
    %868 = vector.broadcast %cst_102 : f32 to vector<4x8xf32>
    %869 = arith.cmpf ogt, %867, %868 : vector<4x8xf32>
    %cst_103 = arith.constant 8.000000e+00 : f32
    %870 = vector.broadcast %cst_103 : f32 to vector<4x8xf32>
    %871 = arith.select %869, %860, %870 : vector<4x8xi1>, vector<4x8xf32>
    %cst_104 = arith.constant dense<0x7F800000> : vector<4xf32>
    %872 = vector.multi_reduction <minimumf>, %871, %cst_104 [1] : vector<4x8xf32> to vector<4xf32>
    %873 = vector.shape_cast %872 : vector<4xf32> to vector<4x1xf32>
    %874 = vector.broadcast %873 : vector<4x1xf32> to vector<4x8xf32>
    %875 = arith.cmpf oeq, %860, %874 : vector<4x8xf32>
    %cst_105 = arith.constant 1.000000e+00 : f32
    %cst_106 = arith.constant 0.000000e+00 : f32
    %876 = vector.broadcast %cst_105 : f32 to vector<4x8xf32>
    %877 = vector.broadcast %cst_106 : f32 to vector<4x8xf32>
    %878 = arith.select %875, %876, %877 : vector<4x8xi1>, vector<4x8xf32>
    %cst_107 = arith.constant 5.000000e-01 : f32
    %879 = vector.broadcast %cst_107 : f32 to vector<4x1xf32>
    %880 = arith.cmpf ogt, %859, %879 : vector<4x1xf32>
    %881 = vector.shape_cast %880 : vector<4x1xi1> to vector<4x1xi1>
    %882 = vector.broadcast %881 : vector<4x1xi1> to vector<4x8xi1>
    %883 = arith.select %882, %857, %878 : vector<4x8xi1>, vector<4x8xf32>
    %884 = arith.mulf %852, %883 : vector<4x8xf32>
    %885 = vector.shape_cast %0 : vector<4x8x32xf32> to vector<32x32xf32>
    %886 = tpu.concatenate %884, %884, %884, %884 in 1 : vector<4x8xf32>, vector<4x8xf32>, vector<4x8xf32>, vector<4x8xf32> -> vector<4x32xf32>
    %887 = tpu.iota {dimensions = array<i32: 0>} : vector<4x32xi32>
    %888 = tpu.iota {dimensions = array<i32: 1>} : vector<4x32xi32>
    %c8_i32 = arith.constant 8 : i32
    %889 = vector.broadcast %c8_i32 : i32 to vector<4x32xi32>
    %890 = arith.muli %887, %889 : vector<4x32xi32>
    %891 = arith.cmpi sge, %888, %890 : vector<4x32xi32>
    %c1_i32_108 = arith.constant 1 : i32
    %892 = vector.broadcast %c1_i32_108 : i32 to vector<4x32xi32>
    %893 = arith.addi %887, %892 : vector<4x32xi32>
    %c8_i32_109 = arith.constant 8 : i32
    %894 = vector.broadcast %c8_i32_109 : i32 to vector<4x32xi32>
    %895 = arith.muli %893, %894 : vector<4x32xi32>
    %896 = arith.cmpi slt, %888, %895 : vector<4x32xi32>
    %897 = arith.andi %891, %896 : vector<4x32xi1>
    %cst_110 = arith.constant 0.000000e+00 : f32
    %898 = vector.broadcast %cst_110 : f32 to vector<4x32xf32>
    %899 = arith.select %897, %886, %898 : vector<4x32xi1>, vector<4x32xf32>
    %cst_111 = arith.constant dense<0.000000e+00> : vector<4x32xf32>
    %900 = tpu.matmul %899, %885, %cst_111 {dimension_numbers = #tpu.dot_dimension_numbers<[1], [0], [0], [1], [0, 0, 1, 1], [], []>} : vector<4x32xf32>, vector<32x32xf32>, vector<4x32xf32> -> vector<4x32xf32>
    %c0_112 = arith.constant 0 : index
    %c0_113 = arith.constant 0 : index
    %901 = vector.load %arg7[%c0_112, %c0_113] : memref<4x8xf32, #tpu.memory_space<vmem>>, vector<4x8xf32>
    tpu.vector_store %arg7[%c0_112, %c0_113], %852 {strides = array<i32>} : memref<4x8xf32, #tpu.memory_space<vmem>>, vector<4x8xf32>,
    %c0_114 = arith.constant 0 : index
    %c0_115 = arith.constant 0 : index
    %902 = vector.load %arg6[%c0_114, %c0_115] : memref<4x32xf32, #tpu.memory_space<vmem>>, vector<4x32xf32>
    tpu.vector_store %arg6[%c0_114, %c0_115], %900 {strides = array<i32>} : memref<4x32xf32, #tpu.memory_space<vmem>>, vector<4x32xf32>,
    return
  }
  func.func @transform_0(%arg0: i32) -> (i32, i32, i32) {
    %c0_i32 = arith.constant 0 : i32
    %c0_i32_0 = arith.constant 0 : i32
    %c0_i32_1 = arith.constant 0 : i32
    return %arg0, %c0_i32, %c0_i32_0 : i32, i32, i32
  }
  func.func @transform_1(%arg0: i32) -> (i32, i32) {
    %c0_i32 = arith.constant 0 : i32
    %c0_i32_0 = arith.constant 0 : i32
    return %arg0, %c0_i32 : i32, i32
  }
  func.func @transform_2(%arg0: i32) -> (i32, i32) {
    %c0_i32 = arith.constant 0 : i32
    %c0_i32_0 = arith.constant 0 : i32
    %c0_i32_1 = arith.constant 0 : i32
    return %c0_i32, %c0_i32_0 : i32, i32
  }
  func.func @transform_3(%arg0: i32) -> (i32, i32) {
    %c0_i32 = arith.constant 0 : i32
    %c0_i32_0 = arith.constant 0 : i32
    %c0_i32_1 = arith.constant 0 : i32
    return %c0_i32, %c0_i32_0 : i32, i32
  }
  func.func @transform_4(%arg0: i32) -> (i32, i32) {
    %c0_i32 = arith.constant 0 : i32
    %c0_i32_0 = arith.constant 0 : i32
    %c0_i32_1 = arith.constant 0 : i32
    return %c0_i32, %c0_i32_0 : i32, i32
  }
  func.func @transform_5(%arg0: i32) -> (i32, i32) {
    %c0_i32 = arith.constant 0 : i32
    %c0_i32_0 = arith.constant 0 : i32
    return %arg0, %c0_i32 : i32, i32
  }
  func.func @transform_6(%arg0: i32) -> (i32, i32) {
    %c0_i32 = arith.constant 0 : i32
    %c0_i32_0 = arith.constant 0 : i32
    return %arg0, %c0_i32 : i32, i32
  }
}

</mosaic_0001>

<bundles_post_ra>
// kernel: tpu_custom_call.1
= control target key start
LH: loop header
LB: loop body
LE: loop exit
PB: predicated region body
PF: predicated region fallthrough
CT: control target
= control target key end

     0   :  { %12 = vsyncpa [#allocation3], 0  ;;  %s7334_s0 = inlined_call_operand.hbm [shape: f32[4,8,32], index: 0, kind: input, shape index: {}]   ;;  %s7335_s1 = inlined_call_operand.hbm [shape: f32[4,8], index: 1, kind: input, shape index: {}]   ;;  %s7336_s2 = inlined_call_operand.hbm [shape: f32[8,32], index: 2, kind: input, shape index: {}]   ;;  %s7337_s3 = inlined_call_operand.vmem [shape: f32[1,8], index: 3, kind: input, shape index: {}]   ;;  %s7338_s4 = inlined_call_operand.vmem [shape: f32[1,8], index: 4, kind: input, shape index: {}]   ;;  %s7339_s5 = inlined_call_operand.hbm [shape: f32[4,32], index: 5, kind: output, shape index: {0}]   ;;  %s7340_s6 = inlined_call_operand.hbm [shape: f32[4,8], index: 6, kind: output, shape index: {1}]  }
   0x1   :  { %13 = vsyncpa [#allocation6], 0 }
   0x2   :  { %14 = vsyncpa [#allocation4], 0 }
   0x3   :  { %15 = vsyncpa [#allocation10], 0  ;;  %s5447_s21 = smov [#allocation5]   ;;  %s5448_s23 = smov [#allocation2]  }
   0x4   :  { %s34_s22 = sshll.u32 %s5447_s21, 4  ;;  %s21_s24 = sshll.u32 %s5448_s23, 4  ;;  %s35_s22 = int_to_ptr.vmem [resolvable:$true] %s34_s22  ;;  %s5502_s24 = int_to_ptr.vmem [resolvable:$true] %s21_s24 }
   0x5   :  { %s5329_s27 = scalar_lea.hbm %s7335_s1, 64 }
   0x6   :  { %p5330_p0 = scmp.ne.s32.totalorder %s7335_s1, %s5329_s27  ;;  %p5333_p1 = scmp.lt.u32.totalorder %s5329_s27, %s7335_s1 }
   0x8   :  { %p5335_p2 = pnand %p5333_p1, %p5330_p0 }
   0xa   :  { %5338 = shalt.err (!%p5335_p2)
}
   0xb   :  { %s5339_s8 = scalar_lea.vmem %s35_s22, 64  ;;  %p5344_p4 = scmp.lt.s32.totalorder %s35_s22, %s35_s22 }
   0xc   :  { %p5340_p3 = scmp.ne.s32.totalorder %s35_s22, %s5339_s8  ;;  %p5345_p5 = scmp.lt.s32.totalorder %s5339_s8, %s5339_s8 }
   0xe   :  { %p5346_p6 = por %p5345_p5, %p5344_p4 }
  0x10   :  { %p5347_p7 = pnand %p5346_p6, %p5340_p3 }
  0x12   :  { %5350 = shalt.err (!%p5347_p7)
}
  0x13   :  { %37 = dma.hbm_to_vmem [thread:$0]  %s7335_s1, 64, %s35_s22, [#allocation6]  }
  0x14   :  { %s5351_s13 = scalar_lea.hbm %s7334_s0, 512 }
  0x15   :  { %p5352_p8 = scmp.ne.s32.totalorder %s7334_s0, %s5351_s13  ;;  %p5355_p9 = scmp.lt.u32.totalorder %s5351_s13, %s7334_s0 }
  0x17   :  { %p5357_p10 = pnand %p5355_p9, %p5352_p8 }
  0x19   :  { %5360 = shalt.err (!%p5357_p10)
}
  0x1a   :  { %s5361_s18 = scalar_lea.vmem %s5502_s24, 512  ;;  %p5366_p12 = scmp.lt.s32.totalorder %s5502_s24, %s5502_s24 }
  0x1b   :  { %p5362_p11 = scmp.ne.s32.totalorder %s5502_s24, %s5361_s18  ;;  %p5367_p13 = scmp.lt.s32.totalorder %s5361_s18, %s5361_s18 }
  0x1d   :  { %p5368_p0 = por %p5367_p13, %p5366_p12 }
  0x1f   :  { %p5369_p1 = pnand %p5368_p0, %p5362_p11 }
  0x21   :  { %5372 = shalt.err (!%p5369_p1)
}
  0x22   :  { %s5449_s1 = smov 128   ;;  %s5450_s19 = smov 8  }
  0x23   :  { %27 = dma.hbm_to_vmem [thread:$0]  %s7334_s0, 512, %s5502_s24, [#allocation3], %s5449_s1, %s5449_s1, %s5450_s19  }
  0x24   :  { %s5451_s22 = smov [#allocation7]   ;;  %s5373_s27 = scalar_lea.hbm %s7336_s2, 128 }
  0x25   :  { %s44_s23 = sshll.u32 %s5451_s22, 4  ;;  %p5374_p2 = scmp.ne.s32.totalorder %s7336_s2, %s5373_s27  ;;  %s45_s23 = int_to_ptr.vmem [resolvable:$true] %s44_s23 }
  0x26   :  { %p5377_p3 = scmp.lt.u32.totalorder %s5373_s27, %s7336_s2 }
  0x28   :  { %p5379_p4 = pnand %p5377_p3, %p5374_p2 }
  0x2a   :  { %5382 = shalt.err (!%p5379_p4)
}
  0x2b   :  { %s5383_s8 = scalar_lea.vmem %s45_s23, 128  ;;  %p5388_p6 = scmp.lt.s32.totalorder %s45_s23, %s45_s23 }
  0x2c   :  { %p5384_p5 = scmp.ne.s32.totalorder %s45_s23, %s5383_s8  ;;  %p5389_p7 = scmp.lt.s32.totalorder %s5383_s8, %s5383_s8 }
  0x2e   :  { %p5390_p8 = por %p5389_p7, %p5388_p6 }
  0x30   :  { %p5391_p9 = pnand %p5390_p8, %p5384_p5 }
  0x32   :  { %5394 = shalt.err (!%p5391_p9)
}
  0x33   :  { %47 = dma.hbm_to_vmem [thread:$0]  %s7336_s2, 128, %s45_s23, [#allocation6]  }
  0x34   :  { %5439 = dma.done.wait [#allocation3], 512  }
  0x35   :  { %5440 = vsyncadd [#allocation3], 4294966784 }
  0x36   :  { %5441 = dma.done.wait [#allocation6], 192  }
  0x37   :  { %5442 = vsyncadd [#allocation6], 4294967104  ;;  %v7341_v0 = vlaneseq  ;;  %v5452_v1 = vmov 1   ;;  %v5453_v2 = vmov 0   ;;  %v5556_v6 = vld [vmem:[#allocation2] sm:$0xff]  ;;  %v5560_v8 = vld [vmem:[#allocation2 + $0x8] sm:$0xff] }
  0x38   :  { %4288 = vset.pattern.permute.xlu1 %v5452_v1  ;;  %4287 = vset.pattern.permute.xlu0 %v5453_v2  ;;  %v5558_v7 = vld [vmem:[#allocation7] sm:$0xff]  ;;  %vm77_vm0 = vcmask 261120   ;;  %v5570_v15 = vld [vmem:[#allocation2 + $0x10] sm:$0xff]  ;;  %v5581_v23 = vld [vmem:[#allocation2 + $0x18] sm:$0xff]  ;;  %v5454_v50 = vmov 4   ;;  %v5455_v51 = vmov 5  }
  0x39   :  { %v5548_v3 = vshrl.u32 %v7341_v0, 7  ;;  %v5615_v49 = vld [vmem:[%s7338_s4] ss:$0 sm:$0xff]  ;;  %v5456_v54 = vmov 2   ;;  %vm600_vm1 = vcmask 1041409   ;;  %vm602_vm2 = vcmask 1042434  }
  0x3a   :  { %vm604_vm3 = vcmask 1043459   ;;  %vm3884_vm13 = vcmask 60416   ;;  %s5464_s11 = smov 24   ;;  %s5465_s12 = smov [#allocation9]  }
  0x3b   :  { %7476 = vst [vmem:[#allocation15_spill] sm:$0xff] %v5548_v3  ;;  %v5551_v4 = vsub.s32 1, %v5548_v3  ;;  %v5554_v5 = vsub.s32 0, %v5548_v3  ;;  %v5575_v18 = vsub.s32 4, %v5548_v3  ;;  %v5586_v25 = vsub.s32 5, %v5548_v3  ;;  %s4036_s13 = sshll.u32 %s5465_s12, 4  ;;  %s4037_s13 = int_to_ptr.vmem [resolvable:$true] %s4036_s13 }
  0x3c   :  { %v5622_v52 = vsub.s32 2, %v5548_v3  ;;  %v5629_v57 = vsub.s32 3, %v5548_v3  ;;  %s5395_s14 = scalar_lea.vmem %s4037_s13, 64  ;;  %p5400_p11 = scmp.lt.s32.totalorder %s4037_s13, %s4037_s13 }
  0x3d   :  { %7477 = vst [vmem:[#allocation16_spill] sm:$0xff] %v5551_v4  ;;  %7478 = vst [vmem:[#allocation17_spill] sm:$0xff] %v5554_v5  ;;  %v106_v9 = vrot.slane %v5558_v7, %v5551_v4  ;;  %v72_v10 = vrot.slane %v5558_v7, %v5554_v5  ;;  %v190_v24 = vrot.slane %v5558_v7, %v5575_v18  ;;  %p5396_p10 = scmp.ne.s32.totalorder %s4037_s13, %s5395_s14  ;;  %p5401_p12 = scmp.lt.s32.totalorder %s5395_s14, %s5395_s14 }
  0x3e   :  { %7479 = vst [vmem:[#allocation18_spill] sm:$0xff] %v5575_v18  ;;  %7480 = vst [vmem:[#allocation19_spill] sm:$0xff] %v5586_v25  ;;  %v218_v30 = vrot.slane %v5558_v7, %v5586_v25  ;;  %v134_v53 = vrot.slane %v5558_v7, %v5622_v52  ;;  %v162_v59 = vrot.slane %v5558_v7, %v5629_v57 }
  0x3f   :  { %v107_v11 = vmul.f32 %v106_v9, %v5556_v6  ;;  %v73_v12 = vmul.f32 %v72_v10, %v5556_v6  ;;  %v108_v13 = vmul.f32 %v106_v9, %v5560_v8  ;;  %v74_v14 = vmul.f32 %v72_v10, %v5560_v8  ;;  %7481 = vst [vmem:[#allocation20_spill] sm:$0xff] %v5622_v52  ;;  %p5402_p13 = por %p5401_p12, %p5400_p11 }
  0x40   :  { %v109_v21 = vmul.f32 %v106_v9, %v5570_v15  ;;  %v75_v22 = vmul.f32 %v72_v10, %v5570_v15  ;;  %v110_v28 = vmul.f32 %v106_v9, %v5581_v23  ;;  %v76_v29 = vmul.f32 %v72_v10, %v5581_v23  ;;  %7482 = vst [vmem:[#allocation21_spill] sm:$0xff] %v5629_v57  ;;  %v5643_v10 = vld [vmem:[%s7337_s3] ss:$0 sm:$0xff]  ;;  %s5463_s3 = smov 16  }
  0x41   :  { %v111_v16 = vsel %vm77_vm0, %v107_v11, 0.0  ;;  %v78_v17 = vsel %vm77_vm0, %v73_v12, 0.0  ;;  %v114_v19 = vsel %vm77_vm0, %v108_v13, 0.0  ;;  %v81_v20 = vsel %vm77_vm0, %v74_v14, 0.0  ;;  %p5403_p0 = pnand %p5402_p13, %p5396_p10 }
  0x42   :  { %112 = vadd.xlane.f32.xlu1 %v111_v16  ;;  %79 = vadd.xlane.f32.xlu0 %v78_v17  ;;  %v117_v26 = vsel %vm77_vm0, %v109_v21, 0.0  ;;  %v84_v27 = vsel %vm77_vm0, %v75_v22, 0.0  ;;  %v120_v31 = vsel %vm77_vm0, %v110_v28, 0.0  ;;  %v87_v32 = vsel %vm77_vm0, %v76_v29, 0.0 }
  0x43   :  { %v192_v33 = vmul.f32 %v190_v24, %v5560_v8  ;;  %v191_v34 = vmul.f32 %v190_v24, %v5556_v6  ;;  %v220_v37 = vmul.f32 %v218_v30, %v5560_v8  ;;  %v219_v38 = vmul.f32 %v218_v30, %v5556_v6 }
  0x44   :  { %v221_v41 = vmul.f32 %v218_v30, %v5570_v15  ;;  %v193_v42 = vmul.f32 %v190_v24, %v5570_v15  ;;  %v222_v45 = vmul.f32 %v218_v30, %v5581_v23  ;;  %v194_v46 = vmul.f32 %v190_v24, %v5581_v23 }
  0x45   :  { %v198_v35 = vsel %vm77_vm0, %v192_v33, 0.0  ;;  %v195_v36 = vsel %vm77_vm0, %v191_v34, 0.0  ;;  %v226_v39 = vsel %vm77_vm0, %v220_v37, 0.0  ;;  %v223_v40 = vsel %vm77_vm0, %v219_v38, 0.0 }
  0x46   :  { %115 = vadd.xlane.f32.xlu1 %v114_v19  ;;  %82 = vadd.xlane.f32.xlu0 %v81_v20  ;;  %v229_v43 = vsel %vm77_vm0, %v221_v41, 0.0  ;;  %v201_v44 = vsel %vm77_vm0, %v193_v42, 0.0  ;;  %v232_v47 = vsel %vm77_vm0, %v222_v45, 0.0  ;;  %v204_v48 = vsel %vm77_vm0, %v194_v46, 0.0 }
  0x47   :  { %v136_v55 = vmul.f32 %v134_v53, %v5560_v8  ;;  %v135_v58 = vmul.f32 %v134_v53, %v5556_v6  ;;  %v163_v61 = vmul.f32 %v162_v59, %v5556_v6  ;;  %v164_v63 = vmul.f32 %v162_v59, %v5560_v8 }
  0x48   :  { %v137_v9 = vmul.f32 %v134_v53, %v5570_v15  ;;  %v5646_v11 = vmul.f32 0.0, %v5643_v10  ;;  %v165_v13 = vmul.f32 %v162_v59, %v5570_v15  ;;  %v5457_v16 = vmov 3  }
  0x49   :  { %v142_v56 = vsel %vm77_vm0, %v136_v55, 0.0  ;;  %v139_v60 = vsel %vm77_vm0, %v135_v58, 0.0  ;;  %v167_v62 = vsel %vm77_vm0, %v163_v61, 0.0  ;;  %v170_v1 = vsel %vm77_vm0, %v164_v63, 0.0 }
  0x4a   :  { %118 = vadd.xlane.f32.xlu1 %v117_v26  ;;  %85 = vadd.xlane.f32.xlu0 %v84_v27  ;;  %v145_v12 = vsel %vm77_vm0, %v137_v9, 0.0  ;;  %v173_v14 = vsel %vm77_vm0, %v165_v13, 0.0  ;;  %v5653_v17 = vsub.s32 6, %v5548_v3  ;;  %v166_v19 = vmul.f32 %v162_v59, %v5581_v23 }
  0x4b   :  { %v5660_v21 = vsub.s32 7, %v5548_v3  ;;  %v5458_v41 = vmov 6  }
  0x4c   :  { %7483 = vst [vmem:[#allocation22_spill] sm:$0xff] %v5653_v17  ;;  %v246_v20 = vrot.slane %v5558_v7, %v5653_v17  ;;  %v176_v22 = vsel %vm77_vm0, %v166_v19, 0.0 }
  0x4d   :  { %7484 = vst [vmem:[#allocation23_spill] sm:$0xff] %v5660_v21  ;;  %v274_v26 = vrot.slane %v5558_v7, %v5660_v21 }
  0x4e   :  { %121 = vadd.xlane.f32.xlu1 %v120_v31  ;;  %88 = vadd.xlane.f32.xlu0 %v87_v32  ;;  %v247_v24 = vmul.f32 %v246_v20, %v5556_v6  ;;  %v249_v30 = vmul.f32 %v246_v20, %v5570_v15  ;;  %v138_v32 = vmul.f32 %v134_v53, %v5581_v23 }
  0x4f   :  { %v275_v28 = vmul.f32 %v274_v26, %v5556_v6  ;;  %v248_v7 = vmul.f32 %v246_v20, %v5560_v8  ;;  %v276_v6 = vmul.f32 %v274_v26, %v5560_v8  ;;  %v278_v38 = vmul.f32 %v274_v26, %v5581_v23 }
  0x50   :  { %v251_v27 = vsel %vm77_vm0, %v247_v24, 0.0  ;;  %v257_v31 = vsel %vm77_vm0, %v249_v30, 0.0  ;;  %v148_v33 = vsel %vm77_vm0, %v138_v32, 0.0  ;;  %v250_v8 = vmul.f32 %v246_v20, %v5581_v23 }
  0x51   :  { %v279_v29 = vsel %vm77_vm0, %v275_v28, 0.0  ;;  %v254_v34 = vsel %vm77_vm0, %v248_v7, 0.0 }
  0x52   :  { %199 = vadd.xlane.f32.xlu1 %v198_v35  ;;  %196 = vadd.xlane.f32.xlu0 %v195_v36  ;;  %v282_v35 = vsel %vm77_vm0, %v276_v6, 0.0  ;;  %v277_v36 = vmul.f32 %v274_v26, %v5570_v15 }
  0x54   :  { %v285_v37 = vsel %vm77_vm0, %v277_v36, 0.0 }
  0x56   :  { %227 = vadd.xlane.f32.xlu1 %v226_v39  ;;  %224 = vadd.xlane.f32.xlu0 %v223_v40  ;;  %v288_v39 = vsel %vm77_vm0, %v278_v38, 0.0  ;;  %v260_v40 = vsel %vm77_vm0, %v250_v8, 0.0 }
  0x5a   :  { %230 = vadd.xlane.f32.xlu1 %v229_v43  ;;  %202 = vadd.xlane.f32.xlu0 %v201_v44  ;;  %v5459_v43 = vmov 7  }
  0x5e   :  { %233 = vadd.xlane.f32.xlu1 %v232_v47  ;;  %205 = vadd.xlane.f32.xlu0 %v204_v48 }
  0x6f   :  { %124 = vperm.xlu1 %4288, %v5615_v49  }
  0x73   :  { %4289 = vset.pattern.permute.xlu1 %v5454_v50 }
  0x74   :  { %208 = vperm.xlu1 %4289, %v5615_v49   ;;  %96 = vperm.xlu0 %4287, %v5615_v49  }
  0x78   :  { %4290 = vset.pattern.permute.xlu1 %v5455_v51  ;;  %4291 = vset.pattern.permute.xlu0 %v5456_v54 }
  0x79   :  { %236 = vperm.xlu1 %4290, %v5615_v49  }
  0x7d   :  { %4292 = vset.pattern.permute.xlu1 %v5457_v16 }
  0x93   :  { %143 = vadd.xlane.f32.xlu0 %v142_v56 }
  0x9d   :  { %140 = vadd.xlane.f32.xlu1 %v139_v60 }
  0xa1   :  { %168 = vadd.xlane.f32.xlu1 %v167_v62 }
  0xa5   :  { %171 = vadd.xlane.f32.xlu1 %v170_v1 }
  0xa9   :  { %146 = vadd.xlane.f32.xlu1 %v145_v12  ;;  %310 = vbcast.lane.b32.xlu0 %v5646_v11, 256 }
  0xad   :  { %174 = vadd.xlane.f32.xlu1 %v173_v14 }
  0xbe   :  { %343 = vbcast.lane.b32.xlu1 %v5646_v11, 257 }
  0xc8   :  { %177 = vadd.xlane.f32.xlu0 %v176_v22 }
  0xcc   :  { %252 = vadd.xlane.f32.xlu0 %v251_v27 }
  0xcf   :  { %v113_v15 = vpop.xlane.xlu1 %112  ;;  %v80_v46 = vpop.xlane.xlu0 %79 }
  0xd0   :  { %280 = vadd.xlane.f32.xlu0 %v279_v29 }
  0xd3   :  { %v116_v23 = vpop.xlane.xlu1 %115  ;;  %v83_v48 = vpop.xlane.xlu0 %82 }
  0xd4   :  { %258 = vadd.xlane.f32.xlu0 %v257_v31 }
  0xd7   :  { %v119_v42 = vpop.xlane.xlu1 %118  ;;  %v86_v50 = vpop.xlane.xlu0 %85 }
  0xdb   :  { %v122_v44 = vpop.xlane.xlu1 %121  ;;  %v89_v51 = vpop.xlane.xlu0 %88 }
  0xdf   :  { %v5699_v45 = vpop.xlane.xlu1 %199  ;;  %v197_v54 = vpop.xlane.xlu0 %196 }
  0xe2   :  { %149 = vadd.xlane.f32.xlu1 %v148_v33 }
  0xe3   :  { %v5702_v47 = vpop.xlane.xlu1 %227  ;;  %v225_v56 = vpop.xlane.xlu0 %224 }
  0xe6   :  { %255 = vadd.xlane.f32.xlu1 %v254_v34 }
  0xe7   :  { %v203_v60 = vpop.xlane.xlu0 %202 }
  0xea   :  { %283 = vadd.xlane.f32.xlu1 %v282_v35  ;;  %442 = vbcast.lane.b32.xlu0 %v5646_v11, 509 }
  0xeb   :  { %v5723_v62 = vpop.xlane.xlu0 %205 }
  0xee   :  { %286 = vadd.xlane.f32.xlu1 %v285_v37 }
  0xf3   :  { %v97_v1 = vpop.permute.xlu0 %96 }
  0xf4   :  { %v5745_v24 = vadd.f32 %v97_v1, %v80_v46  ;;  %v5749_v27 = vadd.f32 %v97_v1, %v83_v48  ;;  %v5751_v28 = vadd.f32 %v97_v1, %v86_v50  ;;  %v5753_v29 = vadd.f32 %v97_v1, %v89_v51 }
  0xf6   :  { %7485 = vst [vmem:[#allocation24_spill] sm:$0xff] %v5745_v24  ;;  %7486 = vst [vmem:[#allocation25_spill] sm:$0xff] %v5749_v27 }
  0xf7   :  { %7487 = vst [vmem:[#allocation26_spill] sm:$0xff] %v5751_v28  ;;  %7488 = vst [vmem:[#allocation27_spill] sm:$0xff] %v5753_v29 }
  0xff   :  { %475 = vbcast.lane.b32.xlu1 %v5646_v11, 510 }
 0x109   :  { %289 = vadd.xlane.f32.xlu0 %v288_v39 }
 0x11f   :  { %152 = vperm.xlu0 %4291, %v5615_v49  }
 0x120   :  { %v5727_v9 = vpop.xlane.xlu0 %143 }
 0x123   :  { %261 = vadd.xlane.f32.xlu1 %v260_v40  ;;  %857 = vbcast.lane.b32.xlu0 %v5643_v10, 509 }
 0x124   :  { %4296 = vset.pattern.permute.xlu0 %v5453_v2  ;;  %v5731_v12 = vpop.permute.xlu0 %310 }
 0x125   :  { %v313_v26 = vadd.f32 %v5731_v12, %v5745_v24  ;;  %v314_v30 = vadd.f32 %v5731_v12, %v5749_v27  ;;  %v315_v7 = vadd.f32 %v5731_v12, %v5751_v28  ;;  %v316_v35 = vadd.f32 %v5731_v12, %v5753_v29 }
 0x127   :  { %747 = vbcast.lane.b32.xlu0 %v5643_v10, 258  ;;  %v4052_v34 = vmul.f32 -1.442695, %v313_v26  ;;  %v4053_v38 = vmul.f32 -1.442695, %v314_v30 }
 0x128   :  { %v4054_v40 = vmul.f32 -1.442695, %v315_v7 }
 0x129   :  { %4297 = vpow2.f32 %v4052_v34 }
 0x12a   :  { %4299 = vpow2.f32 %v4053_v38 }
 0x12b   :  { %955 = vbcast.lane.b32.xlu0 %v5643_v10, 511  ;;  %4301 = vpow2.f32 %v4054_v40 }
 0x12f   :  { %2803 = vbcast.lane.b32.xlu0 %v5643_v10, 260 }
 0x133   :  { %3265 = vbcast.lane.b32.xlu0 %v5643_v10, 261 }
 0x134   :  { %180 = vperm.xlu1 %4292, %v5615_v49  }
 0x137   :  { %3727 = vbcast.lane.b32.xlu0 %v5643_v10, 262 }
 0x138   :  { %4293 = vset.pattern.permute.xlu1 %v5458_v41 }
 0x139   :  { %264 = vperm.xlu1 %4293, %v5615_v49  }
 0x13d   :  { %4294 = vset.pattern.permute.xlu1 %v5459_v43 }
 0x13e   :  { %292 = vperm.xlu1 %4294, %v5615_v49   ;;  %v5706_v49 = vpop.xlane.xlu1 %230 }
 0x142   :  { %376 = vbcast.lane.b32.xlu1 %v5646_v11, 258 }
 0x143   :  { %4295 = vset.pattern.permute.xlu1 %v5453_v2  ;;  %v5709_v2 = vpop.xlane.xlu1 %233 }
 0x146   :  { %389 = vbcast.lane.b32.xlu1 %v5646_v11, 259 }
 0x147   :  { %v125_v53 = vpop.permute.xlu1 %124 }
 0x148   :  { %v5761_v33 = vadd.f32 %v125_v53, %v113_v15  ;;  %v5765_v6 = vadd.f32 %v125_v53, %v116_v23  ;;  %v5770_v37 = vadd.f32 %v125_v53, %v119_v42  ;;  %v5773_v8 = vadd.f32 %v125_v53, %v122_v44 }
 0x149   :  { %v4055_v15 = vmul.f32 -1.442695, %v316_v35  ;;  %v4298_v35 = vpop.eup %4297 }
 0x14a   :  { %508 = vbcast.lane.b32.xlu1 %v5646_v11, 511  ;;  %7489 = vst [vmem:[#allocation28_spill] sm:$0xff] %v5761_v33  ;;  %7490 = vst [vmem:[#allocation29_spill] sm:$0xff] %v5765_v6  ;;  %v4300_v40 = vpop.eup %4299 }
 0x14b   :  { %v5714_v55 = vpop.permute.xlu1 %208  ;;  %7491 = vst [vmem:[#allocation30_spill] sm:$0xff] %v5770_v37  ;;  %7492 = vst [vmem:[#allocation31_spill] sm:$0xff] %v5773_v8  ;;  %4303 = vpow2.f32 %v4055_v15  ;;  %v329_v15 = vadd.f32 1.0, %v4298_v35 }
 0x14c   :  { %v5779_v46 = vadd.f32 %v5714_v55, %v197_v54  ;;  %v5784_v50 = vadd.f32 %v5714_v55, %v5699_v45  ;;  %v5787_v51 = vadd.f32 %v5714_v55, %v203_v60 }
 0x14e   :  { %649 = vbcast.lane.b32.xlu1 %v5643_v10, 256  ;;  %7493 = vst [vmem:[#allocation32_spill] sm:$0xff] %v5779_v46  ;;  %7494 = vst [vmem:[#allocation33_spill] sm:$0xff] %v5784_v50 }
 0x14f   :  { %v5717_v58 = vpop.permute.xlu1 %236  ;;  %7495 = vst [vmem:[#allocation34_spill] sm:$0xff] %v5787_v51 }
 0x150   :  { %v5793_v45 = vadd.f32 %v5717_v58, %v225_v56  ;;  %v5797_v60 = vadd.f32 %v5717_v58, %v5702_v47 }
 0x152   :  { %698 = vbcast.lane.b32.xlu1 %v5643_v10, 257  ;;  %7496 = vst [vmem:[#allocation35_spill] sm:$0xff] %v5793_v45  ;;  %7497 = vst [vmem:[#allocation36_spill] sm:$0xff] %v5797_v60 }
 0x153   :  { %v5719_v59 = vpop.xlane.xlu1 %140 }
 0x155   :  { %v5735_v13 = vpop.xlane.xlu0 %177 }
 0x156   :  { %906 = vbcast.lane.b32.xlu1 %v5643_v10, 510 }
 0x157   :  { %v5721_v61 = vpop.xlane.xlu1 %168 }
 0x159   :  { %v5737_v16 = vpop.xlane.xlu0 %252 }
 0x15a   :  { %776 = vbcast.lane.b32.xlu1 %v5643_v10, 259 }
 0x15b   :  { %v5725_v63 = vpop.xlane.xlu1 %171 }
 0x15d   :  { %v5741_v20 = vpop.xlane.xlu0 %280 }
 0x15e   :  { %2498 = vbcast.lane.b32.xlu1 %v5643_v10, 508 }
 0x15f   :  { %v5729_v11 = vpop.xlane.xlu1 %146 }
 0x161   :  { %v5757_v31 = vpop.xlane.xlu0 %258 }
 0x162   :  { %2960 = vbcast.lane.b32.xlu1 %v5643_v10, 507 }
 0x165   :  { %v443_v43 = vpop.permute.xlu0 %442 }
 0x166   :  { %3422 = vbcast.lane.b32.xlu1 %v5643_v10, 506  ;;  %v5733_v10 = vpop.xlane.xlu1 %174  ;;  %v445_v53 = vadd.f32 %v443_v43, %v5779_v46  ;;  %v446_v54 = vadd.f32 %v443_v43, %v5784_v50 }
 0x168   :  { %v4064_v7 = vmul.f32 -1.442695, %v445_v53  ;;  %v4065_v34 = vmul.f32 -1.442695, %v446_v54 }
 0x16a   :  { %v344_v14 = vpop.permute.xlu1 %343 }
 0x16b   :  { %v346_v36 = vadd.f32 %v344_v14, %v5761_v33  ;;  %v347_v39 = vadd.f32 %v344_v14, %v5765_v6  ;;  %v348_v41 = vadd.f32 %v344_v14, %v5770_v37  ;;  %v349_v48 = vadd.f32 %v344_v14, %v5773_v8 }
 0x16c   :  { %v447_v14 = vadd.f32 %v443_v43, %v5787_v51 }
 0x16d   :  { %v4056_v42 = vmul.f32 -1.442695, %v346_v36  ;;  %v4057_v44 = vmul.f32 -1.442695, %v347_v39  ;;  %v4058_v1 = vmul.f32 -1.442695, %v348_v41  ;;  %v4302_v41 = vpop.eup %4301 }
 0x16e   :  { %v4059_v26 = vmul.f32 -1.442695, %v349_v48  ;;  %v4066_v36 = vmul.f32 -1.442695, %v447_v14  ;;  %v4304_v47 = vpop.eup %4303 }
 0x16f   :  { %v5739_v19 = vpop.xlane.xlu1 %149  ;;  %4305 = vpow2.f32 %v4056_v42  ;;  %v5805_v42 = vadd.f32 %v5717_v58, %v5706_v49  ;;  %v332_v35 = vadd.f32 1.0, %v4304_v47 }
 0x170   :  { %4307 = vpow2.f32 %v4057_v44 }
 0x171   :  { %4309 = vpow2.f32 %v4058_v1  ;;  %7498 = vst [vmem:[#allocation37_spill] sm:$0xff] %v5805_v42  ;;  %v330_v1 = vadd.f32 1.0, %v4300_v40 }
 0x172   :  { %4311 = vpow2.f32 %v4059_v26  ;;  %v331_v26 = vadd.f32 1.0, %v4302_v41 }
 0x173   :  { %v5743_v22 = vpop.xlane.xlu1 %255  ;;  %4313 = vpow2.f32 %v4064_v7 }
 0x174   :  { %4315 = vpow2.f32 %v4065_v34  ;;  %v5812_v34 = vadd.f32 %v5714_v55, %v5723_v62  ;;  %v5821_v55 = vadd.f32 %v5717_v58, %v5709_v2 }
 0x175   :  { %4317 = vpow2.f32 %v4066_v36 }
 0x176   :  { %4319 = vrcp.f32 %v329_v15  ;;  %7499 = vst [vmem:[#allocation38_spill] sm:$0xff] %v5812_v34  ;;  %v448_v40 = vadd.f32 %v443_v43, %v5812_v34  ;;  %7500 = vst [vmem:[#allocation39_spill] sm:$0xff] %v5821_v55 }
 0x177   :  { %v5759_v32 = vpop.xlane.xlu1 %283 }
 0x178   :  { %v4067_v43 = vmul.f32 -1.442695, %v448_v40 }
 0x179   :  { %v4306_v53 = vpop.eup %4305 }
 0x17a   :  { %v4308_v54 = vpop.eup %4307 }
 0x17b   :  { %v5776_v23 = vpop.xlane.xlu1 %286  ;;  %v4310_v36 = vpop.eup %4309 }
 0x17c   :  { %v4312_v49 = vpop.eup %4311  ;;  %v364_v62 = vadd.f32 1.0, %v4310_v36 }
 0x17d   :  { %v4314_v15 = vpop.eup %4313  ;;  %v365_v47 = vadd.f32 1.0, %v4312_v49 }
 0x17f   :  { %v476_v30 = vpop.permute.xlu1 %475 }
 0x180   :  { %v478_v38 = vadd.f32 %v476_v30, %v5793_v45  ;;  %v479_v39 = vadd.f32 %v476_v30, %v5797_v60  ;;  %v480_v14 = vadd.f32 %v476_v30, %v5805_v42 }
 0x182   :  { %v4068_v48 = vmul.f32 -1.442695, %v478_v38  ;;  %v4069_v44 = vmul.f32 -1.442695, %v479_v39  ;;  %v362_v38 = vadd.f32 1.0, %v4306_v53  ;;  %v363_v39 = vadd.f32 1.0, %v4308_v54 }
 0x183   :  { %v4070_v41 = vmul.f32 -1.442695, %v480_v14  ;;  %v481_v53 = vadd.f32 %v476_v30, %v5821_v55 }
 0x184   :  { %4321 = vpow2.f32 %v4068_v48  ;;  %v4316_v48 = vpop.eup %4315 }
 0x185   :  { %4323 = vpow2.f32 %v4069_v44  ;;  %v4318_v44 = vpop.eup %4317  ;;  %v462_v54 = vadd.f32 1.0, %v4316_v48 }
 0x186   :  { %4325 = vrcp.f32 %v330_v1  ;;  %v461_v1 = vadd.f32 1.0, %v4314_v15  ;;  %v5826_v18 = vpop.eup %4319  ;;  %v463_v2 = vadd.f32 1.0, %v4318_v44 }
 0x187   :  { %4327 = vrcp.f32 %v331_v26 }
 0x188   :  { %4329 = vrcp.f32 %v332_v35  ;;  %v4071_v35 = vmul.f32 -1.442695, %v481_v53 }
 0x189   :  { %4331 = vrcp.f32 %v362_v38 }
 0x18a   :  { %4333 = vrcp.f32 %v363_v39 }
 0x18b   :  { %4335 = vpow2.f32 %v4070_v41 }
 0x18c   :  { %4337 = vrcp.f32 %v364_v62 }
 0x18d   :  { %4339 = vrcp.f32 %v365_v47 }
 0x18e   :  { %v4322_v58 = vpop.eup %4321  ;;  %4341 = vpow2.f32 %v4067_v43 }
 0x18f   :  { %v4324_v36 = vpop.eup %4323  ;;  %4343 = vrcp.f32 %v461_v1  ;;  %v494_v41 = vadd.f32 1.0, %v4322_v58 }
 0x190   :  { %v5834_v49 = vpop.eup %4325  ;;  %4345 = vrcp.f32 %v462_v54 }
 0x191   :  { %v5836_v40 = vpop.eup %4327  ;;  %4347 = vrcp.f32 %v463_v2 }
 0x192   :  { %v5840_v48 = vpop.eup %4329  ;;  %4349 = vpow2.f32 %v4071_v35 }
 0x193   :  { %v4332_v44 = vpop.eup %4331 }
 0x196   :  { %v5815_v0 = vpop.xlane.xlu0 %289 }
 0x19e   :  { %v153_v26 = vpop.permute.xlu0 %152 }
 0x19f   :  { %v5829_v38 = vadd.f32 %v153_v26, %v5719_v59  ;;  %v5832_v30 = vadd.f32 %v153_v26, %v5727_v9  ;;  %v495_v59 = vadd.f32 1.0, %v4324_v36  ;;  %v5843_v47 = vadd.f32 %v153_v26, %v5729_v11  ;;  %v4334_v11 = vpop.eup %4333 }
 0x1a1   :  { %7501 = vst [vmem:[#allocation40_spill] sm:$0xff] %v5829_v38  ;;  %7502 = vst [vmem:[#allocation41_spill] sm:$0xff] %v5832_v30 }
 0x1a2   :  { %7503 = vst [vmem:[#allocation42_spill] sm:$0xff] %v5843_v47 }
 0x1b0   :  { %v5801_v56 = vpop.xlane.xlu1 %261 }
 0x1b4   :  { %v5808_v7 = vpop.permute.xlu1 %180 }
 0x1b5   :  { %v5851_v43 = vadd.f32 %v5808_v7, %v5721_v61  ;;  %v5855_v53 = vadd.f32 %v5808_v7, %v5725_v63  ;;  %v5859_v1 = vadd.f32 %v5808_v7, %v5733_v10  ;;  %v4336_v61 = vpop.eup %4335  ;;  %v5881_v17 = vadd.f32 %v5808_v7, %v5735_v13 }
 0x1b6   :  { %v5869_v10 = vpop.eup %4337  ;;  %v496_v52 = vadd.f32 1.0, %v4336_v61 }
 0x1b7   :  { %7505 = vst [vmem:[#allocation44_spill] sm:$0xff] %v5851_v43  ;;  %7506 = vst [vmem:[#allocation45_spill] sm:$0xff] %v5855_v53 }
 0x1b8   :  { %v5817_v3 = vpop.permute.xlu1 %264  ;;  %7507 = vst [vmem:[#allocation46_spill] sm:$0xff] %v5859_v1  ;;  %7510 = vst [vmem:[#allocation49_spill] sm:$0xff] %v5881_v17 }
 0x1b9   :  { %v5896_v7 = vadd.f32 %v5817_v3, %v5743_v22 }
 0x1bb   :  { %7512 = vst [vmem:[#allocation51_spill] sm:$0xff] %v5896_v7 }
 0x1bd   :  { %v5824_v14 = vpop.permute.xlu1 %292 }
 0x1be   :  { %v5847_v9 = vadd.f32 %v5824_v14, %v5741_v20  ;;  %v5863_v54 = vadd.f32 %v5824_v14, %v5759_v32  ;;  %v5873_v32 = vpop.eup %4339 }
 0x1bf   :  { %v4342_v25 = vpop.eup %4341 }
 0x1c0   :  { %7504 = vst [vmem:[#allocation43_spill] sm:$0xff] %v5847_v9  ;;  %7508 = vst [vmem:[#allocation47_spill] sm:$0xff] %v5863_v54  ;;  %v519_v36 = vadd.f32 %v5731_v12, %v5847_v9  ;;  %v520_v4 = vadd.f32 %v5731_v12, %v5863_v54  ;;  %v4344_v34 = vpop.eup %4343  ;;  %v5886_v9 = vadd.f32 %v153_v26, %v5739_v19 }
 0x1c1   :  { %v377_v39 = vpop.permute.xlu1 %376 }
 0x1c2   :  { %v379_v15 = vadd.f32 %v377_v39, %v5829_v38  ;;  %v380_v62 = vadd.f32 %v377_v39, %v5832_v30  ;;  %v381_v20 = vadd.f32 %v377_v39, %v5843_v47  ;;  %7511 = vst [vmem:[#allocation50_spill] sm:$0xff] %v5886_v9  ;;  %v4073_v26 = vmul.f32 -1.442695, %v520_v4 }
 0x1c4   :  { %4351 = vtanh.f32 %v379_v15  ;;  %v5877_v15 = vadd.f32 %v5817_v3, %v5737_v16 }
 0x1c5   :  { %4353 = vtanh.f32 %v380_v62  ;;  %v390_v2 = vpop.permute.xlu1 %389 }
 0x1c6   :  { %4355 = vrcp.f32 %v494_v41  ;;  %v392_v58 = vadd.f32 %v390_v2, %v5851_v43  ;;  %v393_v63 = vadd.f32 %v390_v2, %v5855_v53  ;;  %v394_v35 = vadd.f32 %v390_v2, %v5859_v1  ;;  %7509 = vst [vmem:[#allocation48_spill] sm:$0xff] %v5877_v15 }
 0x1c7   :  { %4357 = vrcp.f32 %v495_v59  ;;  %v395_v61 = vadd.f32 %v390_v2, %v5881_v17 }
 0x1c8   :  { %v4060_v62 = vmul.f32 -1.442695, %v392_v58  ;;  %v4061_v41 = vmul.f32 -1.442695, %v393_v63  ;;  %v4062_v57 = vmul.f32 -1.442695, %v394_v35  ;;  %4359 = vtanh.f32 %v381_v20  ;;  %v5889_v58 = vpop.eup %4345 }
 0x1c9   :  { %v509_v59 = vpop.permute.xlu1 %508  ;;  %v4072_v63 = vmul.f32 -1.442695, %v519_v36  ;;  %v5892_v13 = vpop.eup %4347  ;;  %v382_v20 = vadd.f32 %v377_v39, %v5886_v9  ;;  %v4063_v22 = vmul.f32 -1.442695, %v395_v61  ;;  %v421_v39 = vmul.f32 0.0, %v4334_v11 }
 0x1ca   :  { %4361 = vpow2.f32 %v4060_v62  ;;  %v511_v16 = vadd.f32 %v509_v59, %v5877_v15  ;;  %v4350_v19 = vpop.eup %4349  ;;  %v5901_v62 = vadd.f32 %v5817_v3, %v5757_v31  ;;  %v512_v2 = vadd.f32 %v509_v59, %v5896_v7 }
 0x1cb   :  { %4363 = vpow2.f32 %v4061_v41  ;;  %v420_v41 = vmul.f32 0.0, %v4332_v44 }
 0x1cc   :  { %4365 = vpow2.f32 %v4062_v57  ;;  %7513 = vst [vmem:[#allocation52_spill] sm:$0xff] %v5901_v62  ;;  %v513_v4 = vadd.f32 %v509_v59, %v5901_v62 }
 0x1cd   :  { %4367 = vrcp.f32 %v496_v52 }
 0x1ce   :  { %v4352_v35 = vpop.eup %4351  ;;  %4369 = vtanh.f32 %v511_v16 }
 0x1cf   :  { %v4354_v36 = vpop.eup %4353  ;;  %v424_v55 = vmul.f32 %v4352_v35, %v5826_v18  ;;  %4371 = vpow2.f32 %v4072_v63  ;;  %v5913_v18 = vadd.f32 %v5817_v3, %v5801_v56  ;;  %v464_v63 = vadd.f32 1.0, %v4342_v25 }
 0x1d0   :  { %v4356_v54 = vpop.eup %4355  ;;  %4373 = vtanh.f32 %v382_v20  ;;  %v425_v52 = vmul.f32 %v4354_v36, %v5834_v49  ;;  %v5919_v20 = vadd.f32 %v5824_v14, %v5776_v23  ;;  %v497_v56 = vadd.f32 1.0, %v4350_v19 }
 0x1d1   :  { %v4358_v57 = vpop.eup %4357  ;;  %v5907_v1 = vadd.f32 %v424_v55, %v420_v41  ;;  %4375 = vpow2.f32 %v4073_v26  ;;  %7514 = vst [vmem:[#allocation53_spill] sm:$0xff] %v5913_v18  ;;  %v514_v61 = vadd.f32 %v509_v59, %v5913_v18  ;;  %v422_v36 = vmul.f32 0.0, %v5869_v10 }
 0x1d2   :  { %v5909_v31 = vadd.f32 %v425_v52, %v421_v39  ;;  %4377 = vtanh.f32 %v512_v2  ;;  %v4360_v16 = vpop.eup %4359  ;;  %7515 = vst [vmem:[#allocation54_spill] sm:$0xff] %v5919_v20  ;;  %v547_v59 = vmul.f32 0.0, %v4356_v54  ;;  %v521_v23 = vadd.f32 %v5731_v12, %v5919_v20 }
 0x1d3   :  { %4379 = vpow2.f32 %v4063_v22  ;;  %v426_v35 = vmul.f32 %v4360_v16, %v5836_v40 }
 0x1d4   :  { %v4362_v44 = vpop.eup %4361  ;;  %4381 = vtanh.f32 %v513_v4 }
 0x1d5   :  { %v4364_v11 = vpop.eup %4363  ;;  %4383 = vtanh.f32 %v5907_v1  ;;  %v408_v49 = vadd.f32 1.0, %v4362_v44  ;;  %v5926_v19 = vadd.f32 %v426_v35, %v422_v36  ;;  %v5930_v44 = vpop.permute.xlu1 %649 }
 0x1d6   :  { %v4366_v55 = vpop.eup %4365  ;;  %4385 = vtanh.f32 %v5909_v31  ;;  %v409_v26 = vadd.f32 1.0, %v4364_v11 }
 0x1d7   :  { %v4368_v3 = vpop.eup %4367  ;;  %4387 = vrcp.f32 %v408_v49  ;;  %v410_v22 = vadd.f32 1.0, %v4366_v55 }
 0x1d8   :  { %v4370_v2 = vpop.eup %4369  ;;  %4389 = vrcp.f32 %v409_v26  ;;  %v423_v26 = vmul.f32 0.0, %v5873_v32  ;;  %v549_v36 = vmul.f32 0.0, %v4368_v3 }
 0x1d9   :  { %v4372_v41 = vpop.eup %4371  ;;  %4391 = vtanh.f32 %v514_v61  ;;  %v551_v25 = vmul.f32 %v4370_v2, %v4344_v34  ;;  %v4074_v34 = vmul.f32 -1.442695, %v521_v23  ;;  %v5950_v32 = vpop.permute.xlu1 %698 }
 0x1da   :  { %v4374_v39 = vpop.eup %4373  ;;  %4393 = vrcp.f32 %v464_v63  ;;  %v535_v16 = vadd.f32 1.0, %v4372_v41 }
 0x1db   :  { %v4376_v52 = vpop.eup %4375  ;;  %4395 = vrcp.f32 %v497_v56  ;;  %v5928_v40 = vadd.f32 %v551_v25, %v547_v59  ;;  %v427_v49 = vmul.f32 %v4374_v39, %v5840_v48  ;;  %v548_v56 = vmul.f32 0.0, %v4358_v57  ;;  %v5938_v59 = vpop.permute.xlu0 %857 }
 0x1dc   :  { %v4378_v4 = vpop.eup %4377  ;;  %4397 = vrcp.f32 %v410_v22  ;;  %7516 = vst [vmem:[#allocation55_spill] sm:$0xff] %v5938_v59 }
 0x1dd   :  { %v4380_v10 = vpop.eup %4379  ;;  %4399 = vtanh.f32 %v5928_v40  ;;  %v552_v61 = vmul.f32 %v4378_v4, %v5889_v58  ;;  %v5944_v58 = vadd.f32 %v5824_v14, %v5815_v0  ;;  %v5946_v25 = vadd.f32 %v427_v49, %v423_v26 }
 0x1de   :  { %v4382_v54 = vpop.eup %4381  ;;  %4401 = vtanh.f32 %v5926_v19  ;;  %v411_v35 = vadd.f32 1.0, %v4380_v10  ;;  %v536_v0 = vadd.f32 1.0, %v4376_v52 }
 0x1df   :  { %v4384_v11 = vpop.eup %4383  ;;  %4403 = vrcp.f32 %v535_v16  ;;  %v553_v41 = vmul.f32 %v4382_v54, %v5892_v13  ;;  %7517 = vst [vmem:[#allocation56_spill] sm:$0xff] %v5944_v58  ;;  %v5948_v39 = vadd.f32 %v552_v61, %v548_v56 }
 0x1e0   :  { %v4386_v55 = vpop.eup %4385  ;;  %4405 = vpow2.f32 %v4074_v34 }
 0x1e1   :  { %v4388_v63 = vpop.eup %4387  ;;  %4407 = vrcp.f32 %v411_v35  ;;  %v5970_v35 = vpop.permute.xlu0 %747 }
 0x1e2   :  { %v4390_v2 = vpop.eup %4389  ;;  %v5940_v22 = vmul.f32 %v4388_v63, %v4384_v11  ;;  %v5966_v11 = vadd.f32 %v553_v41, %v549_v36  ;;  %4409 = vtanh.f32 %v5948_v39 }
 0x1e3   :  { %v4392_v48 = vpop.eup %4391  ;;  %v5952_v57 = vmul.f32 %v4390_v2, %v4386_v55  ;;  %4411 = vtanh.f32 %v5946_v25 }
 0x1e4   :  { %v4394_v3 = vpop.eup %4393  ;;  %v571_v13 = vrot.slane %v5940_v22, %v5554_v5  ;;  %v652_v23 = vmul.f32 %v5930_v44, %v5940_v22  ;;  %v701_v4 = vmul.f32 %v5950_v32, %v5940_v22  ;;  %7518 = vst [vmem:[#allocation57_spill] sm:$0xff] %v5966_v11  ;;  %4413 = vrcp.f32 %v536_v0 }
 0x1e5   :  { %v4396_v14 = vpop.eup %4395  ;;  %v575_v16 = vrot.slane %v5952_v57, %v5554_v5  ;;  %v653_v10 = vmul.f32 %v5930_v44, %v5952_v57  ;;  %v702_v54 = vmul.f32 %v5950_v32, %v5952_v57  ;;  %v554_v34 = vmul.f32 %v4394_v3, %v4392_v48 }
 0x1e6   :  { %v660_v49 = vrot.slane %v652_v23, 7  ;;  %v709_v61 = vrot.slane %v701_v4, 7  ;;  %589 = vperm.xlu1 %4295, %v571_v13   ;;  %v4398_v55 = vpop.eup %4397  ;;  %v550_v56 = vmul.f32 0.0, %v4396_v14  ;;  %4415 = vtanh.f32 %v5966_v11 }
 0x1e7   :  { %v661_v52 = vrot.slane %v653_v10, 7  ;;  %v710_v63 = vrot.slane %v702_v54, 7  ;;  %592 = vperm.xlu0 %4296, %v575_v16   ;;  %v4400_v26 = vpop.eup %4399  ;;  %v522_v14 = vadd.f32 %v5731_v12, %v5944_v58  ;;  %v751_v54 = vmul.f32 %v5970_v35, %v5952_v57 }
 0x1e8   :  { %v668_v2 = vadd.f32 %v660_v49, %v5745_v24  ;;  %v4402_v48 = vpop.eup %4401  ;;  %v717_v3 = vadd.f32 %v709_v61, %v5761_v33  ;;  %v5976_v23 = vadd.f32 %v554_v34, %v550_v56  ;;  %v750_v56 = vmul.f32 %v5970_v35, %v5940_v22  ;;  %v6004_v24 = vpop.permute.xlu0 %955 }
 0x1e9   :  { %v669_v36 = vadd.f32 %v661_v52, %v5749_v27  ;;  %v718_v41 = vadd.f32 %v710_v63, %v5765_v6  ;;  %v4404_v13 = vpop.eup %4403  ;;  %v5979_v4 = vmul.f32 %v4402_v48, %v4398_v55  ;;  %v5993_v63 = vpop.permute.xlu1 %906  ;;  %v4075_v11 = vmul.f32 -1.442695, %v522_v14 }
 0x1ea   :  { %7519 = vst [vmem:[#allocation58_spill] sm:$0xff] %v5976_v23  ;;  %v5985_v49 = vmul.f32 %v4404_v13, %v4400_v26  ;;  %v4406_v52 = vpop.eup %4405  ;;  %v4076_v61 = vmul.f32 -1.442695, %v668_v2  ;;  %7520 = vst [vmem:[#allocation59_spill] sm:$0xff] %v5993_v63  ;;  %v4080_v12 = vmul.f32 -1.442695, %v717_v3 }
 0x1eb   :  { %v4077_v16 = vmul.f32 -1.442695, %v669_v36  ;;  %v4081_v10 = vmul.f32 -1.442695, %v718_v41  ;;  %v579_v0 = vrot.slane %v5979_v4, %v5554_v5  ;;  %v654_v34 = vmul.f32 %v5930_v44, %v5979_v4  ;;  %v4408_v41 = vpop.eup %4407 }
 0x1ec   :  { %v703_v55 = vmul.f32 %v5950_v32, %v5979_v4  ;;  %v613_v26 = vrot.slane %v5985_v49, %v5660_v21  ;;  %v909_v36 = vmul.f32 %v5993_v63, %v5985_v49  ;;  %v759_v13 = vrot.slane %v751_v54, 7 }
 0x1ed   :  { %4417 = vpow2.f32 %v4077_v16  ;;  %v662_v2 = vrot.slane %v654_v34, 7  ;;  %595 = vperm.xlu0 %4296, %v579_v0   ;;  %v752_v3 = vmul.f32 %v5970_v35, %v5979_v4  ;;  %v537_v16 = vadd.f32 1.0, %v4406_v52 }
 0x1ee   :  { %4419 = vpow2.f32 %v4081_v10  ;;  %v711_v48 = vrot.slane %v703_v55, 7  ;;  %631 = vperm.xlu1 %4295, %v613_v26   ;;  %v917_v0 = vrot.slane %v909_v36, 1  ;;  %v4410_v55 = vpop.eup %4409  ;;  %v758_v33 = vrot.slane %v750_v56, 7  ;;  %v6018_v36 = vpop.permute.xlu1 %776 }
 0x1ef   :  { %4421 = vtanh.f32 %v5976_v23  ;;  %v670_v10 = vadd.f32 %v662_v2, %v5751_v28  ;;  %v4412_v20 = vpop.eup %4411  ;;  %v860_v52 = vmul.f32 %v5938_v59, %v5985_v49  ;;  %v760_v26 = vrot.slane %v752_v3, 7  ;;  %7521 = vst [vmem:[#allocation60_spill] sm:$0xff] %v6018_v36 }
 0x1f0   :  { %4423 = vpow2.f32 %v4076_v61  ;;  %v719_v34 = vadd.f32 %v711_v48, %v5770_v37  ;;  %v925_v27 = vadd.f32 %v917_v0, %v5793_v45  ;;  %v4414_v61 = vpop.eup %4413  ;;  %v958_v2 = vmul.f32 %v6004_v24, %v5985_v49 }
 0x1f1   :  { %4425 = vpow2.f32 %v4080_v12  ;;  %v4078_v23 = vmul.f32 -1.442695, %v670_v10  ;;  %v6013_v28 = vmul.f32 %v4412_v20, %v4408_v41  ;;  %v4416_v48 = vpop.eup %4415  ;;  %v767_v12 = vadd.f32 %v759_v13, %v5832_v30 }
 0x1f2   :  { %v4082_v54 = vmul.f32 -1.442695, %v719_v34  ;;  %4427 = vrcp.f32 %v537_v16  ;;  %v4092_v14 = vmul.f32 -1.442695, %v925_v27  ;;  %v6016_v56 = vmul.f32 %v4414_v61, %v4410_v55 }
 0x1f3   :  { %4429 = vpow2.f32 %v4078_v23  ;;  %v868_v10 = vrot.slane %v860_v52, 1  ;;  %v966_v34 = vrot.slane %v958_v2, 1  ;;  %v583_v3 = vrot.slane %v6013_v28, %v5554_v5 }
 0x1f4   :  { %v655_v0 = vmul.f32 %v5930_v44, %v6013_v28  ;;  %v766_v20 = vadd.f32 %v758_v33, %v5829_v38  ;;  %4431 = vpow2.f32 %v4082_v54  ;;  %v704_v41 = vmul.f32 %v5950_v32, %v6013_v28 }
 0x1f5   :  { %v768_v27 = vadd.f32 %v760_v26, %v5843_v47  ;;  %598 = vperm.xlu0 %4296, %v583_v3   ;;  %v617_v16 = vrot.slane %v6016_v56, %v5660_v21  ;;  %4433 = vpow2.f32 %v4075_v11  ;;  %v780_v52 = vmul.f32 %v6018_v36, %v5952_v57 }
 0x1f6   :  { %v663_v13 = vrot.slane %v655_v0, 7  ;;  %4435 = vtanh.f32 %v767_v12  ;;  %v974_v33 = vadd.f32 %v966_v34, %v5877_v15  ;;  %v712_v54 = vrot.slane %v704_v41, 7 }
 0x1f7   :  { %v4418_v23 = vpop.eup %4417  ;;  %4437 = vpow2.f32 %v4092_v14  ;;  %v876_v26 = vadd.f32 %v868_v10, %v5779_v46  ;;  %634 = vperm.xlu1 %4295, %v617_v16   ;;  %v910_v34 = vmul.f32 %v5993_v63, %v6016_v56  ;;  %v788_v14 = vrot.slane %v780_v52, 7 }
 0x1f8   :  { %v4420_v55 = vpop.eup %4419  ;;  %v685_v2 = vadd.f32 1.0, %v4418_v23  ;;  %v671_v3 = vadd.f32 %v663_v13, %v5753_v29  ;;  %4439 = vtanh.f32 %v766_v20  ;;  %v720_v11 = vadd.f32 %v712_v54, %v5773_v8 }
 0x1f9   :  { %v6033_v61 = vpop.eup %4421  ;;  %v734_v5 = vadd.f32 1.0, %v4420_v55  ;;  %4441 = vtanh.f32 %v768_v27  ;;  %v4088_v10 = vmul.f32 -1.442695, %v876_v26  ;;  %v861_v23 = vmul.f32 %v5938_v59, %v6016_v56 }
 0x1fa   :  { %v4424_v0 = vpop.eup %4423  ;;  %v4079_v57 = vmul.f32 -1.442695, %v671_v3  ;;  %4443 = vtanh.f32 %v974_v33  ;;  %v4083_v12 = vmul.f32 -1.442695, %v720_v11  ;;  %v918_v16 = vrot.slane %v910_v34, 1 }
 0x1fb   :  { %v4426_v45 = vpop.eup %4425  ;;  %4445 = vrcp.f32 %v685_v2  ;;  %v684_v20 = vadd.f32 1.0, %v4424_v0  ;;  %v869_v33 = vrot.slane %v861_v23, 1  ;;  %v796_v52 = vadd.f32 %v788_v14, %v5855_v53 }
 0x1fc   :  { %v4428_v41 = vpop.eup %4427  ;;  %4447 = vrcp.f32 %v734_v5  ;;  %v733_v27 = vadd.f32 1.0, %v4426_v45  ;;  %v926_v11 = vadd.f32 %v918_v16, %v5797_v60  ;;  %v779_v26 = vmul.f32 %v6018_v36, %v5940_v22 }
 0x1fd   :  { %v4430_v13 = vpop.eup %4429  ;;  %v6042_v55 = vmul.f32 %v4428_v41, %v4416_v48  ;;  %4449 = vpow2.f32 %v4079_v57  ;;  %v877_v5 = vadd.f32 %v869_v33, %v5784_v50 }
 0x1fe   :  { %v4432_v54 = vpop.eup %4431  ;;  %v686_v3 = vadd.f32 1.0, %v4430_v13  ;;  %4451 = vpow2.f32 %v4083_v12  ;;  %v4093_v48 = vmul.f32 -1.442695, %v926_v11  ;;  %v787_v16 = vrot.slane %v779_v26, 7 }
 0x1ff   :  { %v4434_v2 = vpop.eup %4433  ;;  %4453 = vpow2.f32 %v4088_v10  ;;  %v621_v45 = vrot.slane %v6042_v55, %v5660_v21  ;;  %v911_v57 = vmul.f32 %v5993_v63, %v6042_v55  ;;  %v735_v34 = vadd.f32 1.0, %v4432_v54 }
 0x200   :  { %v4436_v0 = vpop.eup %4435  ;;  %4455 = vrcp.f32 %v684_v20  ;;  %v4089_v41 = vmul.f32 -1.442695, %v877_v5  ;;  %v862_v14 = vmul.f32 %v5938_v59, %v6042_v55  ;;  %v753_v10 = vmul.f32 %v5970_v35, %v6013_v28 }
 0x201   :  { %v4438_v12 = vpop.eup %4437  ;;  %4457 = vrcp.f32 %v733_v27  ;;  %v919_v23 = vrot.slane %v911_v57, 1  ;;  %637 = vperm.xlu1 %4295, %v621_v45   ;;  %v538_v13 = vadd.f32 1.0, %v4434_v2  ;;  %v4085_v27 = vmul.f32 -1.442695, %v796_v52 }
 0x202   :  { %v6055_v22 = vpop.eup %4439  ;;  %4459 = vrcp.f32 %v686_v3  ;;  %v870_v33 = vrot.slane %v862_v14, 1  ;;  %v941_v11 = vadd.f32 1.0, %v4438_v12  ;;  %v782_v2 = vmul.f32 %v6018_v36, %v6013_v28 }
 0x203   :  { %v6059_v20 = vpop.eup %4441  ;;  %4461 = vpow2.f32 %v4093_v48  ;;  %v927_v5 = vadd.f32 %v919_v23, %v5805_v42  ;;  %v761_v45 = vrot.slane %v753_v10, 7  ;;  %v828_v52 = vrot.slane %v5909_v31, 7 }
 0x204   :  { %v6061_v54 = vpop.eup %4443  ;;  %4463 = vpow2.f32 %v4089_v41  ;;  %v878_v3 = vadd.f32 %v870_v33, %v5787_v51  ;;  %v795_v48 = vadd.f32 %v787_v16, %v5851_v43  ;;  %v781_v12 = vmul.f32 %v6018_v36, %v5979_v4 }
 0x205   :  { %v4446_v15 = vpop.eup %4445  ;;  %4465 = vrcp.f32 %v735_v34  ;;  %v4094_v57 = vmul.f32 -1.442695, %v927_v5  ;;  %v959_v14 = vmul.f32 %v6004_v24, %v6016_v56  ;;  %v790_v42 = vrot.slane %v782_v2, 7 }
 0x206   :  { %v4448_v53 = vpop.eup %4447  ;;  %4467 = vrcp.f32 %v538_v13  ;;  %v4090_v10 = vmul.f32 -1.442695, %v878_v3  ;;  %v840_v13 = vmul.f32 %v4446_v15, %v4436_v0  ;;  %v769_v31 = vadd.f32 %v761_v45, %v5886_v9 }
 0x207   :  { %v4450_v26 = vpop.eup %4449  ;;  %4469 = vpow2.f32 %v4085_v27  ;;  %v836_v33 = vmul.f32 %v4448_v53, %v828_v52  ;;  %v789_v51 = vrot.slane %v781_v12, 7  ;;  %v4084_v4 = vmul.f32 -1.442695, %v795_v48  ;;  %v7522_v48 = vld [vmem:[#allocation46_spill] sm:$0xff] }
 0x208   :  { %v4452_v41 = vpop.eup %4451  ;;  %4471 = vrcp.f32 %v941_v11  ;;  %v687_v34 = vadd.f32 1.0, %v4450_v26  ;;  %v983_v26 = vmul.f32 %v5930_v44, %v6016_v56  ;;  %v967_v36 = vrot.slane %v959_v14, 1 }
 0x209   :  { %v4454_v23 = vpop.eup %4453  ;;  %v736_v28 = vadd.f32 1.0, %v4452_v41  ;;  %4473 = vpow2.f32 %v4094_v57  ;;  %v960_v53 = vmul.f32 %v6004_v24, %v6042_v55  ;;  %v6078_v15 = vadd.f32 %v840_v13, %v836_v33 }
 0x20a   :  { %v4456_v5 = vpop.eup %4455  ;;  %4475 = vrcp.f32 %v687_v34  ;;  %v892_v11 = vadd.f32 1.0, %v4454_v23  ;;  %v827_v3 = vrot.slane %v5907_v1, 7  ;;  %v798_v2 = vadd.f32 %v790_v42, %v5881_v17 }
 0x20b   :  { %v4458_v16 = vpop.eup %4457  ;;  %4477 = vrcp.f32 %v736_v28  ;;  %v829_v52 = vrot.slane %v5926_v19, 7  ;;  %v797_v56 = vadd.f32 %v789_v51, %v7522_v48  ;;  %v982_v14 = vmul.f32 %v5930_v44, %v5985_v49 }
 0x20c   :  { %v4460_v27 = vpop.eup %4459  ;;  %4479 = vpow2.f32 %v4090_v10  ;;  %v991_v23 = vrot.slane %v983_v26, 1  ;;  %v975_v28 = vadd.f32 %v967_v36, %v5896_v7  ;;  %v968_v10 = vrot.slane %v960_v53, 1 }
 0x20d   :  { %v4462_v41 = vpop.eup %4461  ;;  %4481 = vtanh.f32 %v769_v31  ;;  %v835_v33 = vmul.f32 %v4458_v16, %v827_v3  ;;  %v839_v13 = vmul.f32 %v4456_v5, %v6055_v22  ;;  %v4087_v31 = vmul.f32 -1.442695, %v798_v2 }
 0x20e   :  { %v4464_v0 = vpop.eup %4463  ;;  %v942_v45 = vadd.f32 1.0, %v4462_v41  ;;  %4483 = vpow2.f32 %v4084_v4  ;;  %v841_v41 = vmul.f32 %v4460_v27, %v6059_v20  ;;  %v976_v53 = vadd.f32 %v968_v10, %v5901_v62  ;;  %v7524_v27 = vld [vmem:[#allocation39_spill] sm:$0xff] }
 0x20f   :  { %v4466_v57 = vpop.eup %4465  ;;  %v893_v12 = vadd.f32 1.0, %v4464_v0  ;;  %4485 = vrcp.f32 %v892_v11  ;;  %v4086_v11 = vmul.f32 -1.442695, %v797_v56  ;;  %v830_v5 = vrot.slane %v5946_v25, 7  ;;  %v7523_v56 = vld [vmem:[#allocation47_spill] sm:$0xff] }
 0x210   :  { %v4468_v34 = vpop.eup %4467  ;;  %4487 = vtanh.f32 %v6078_v15  ;;  %v990_v3 = vrot.slane %v982_v14, 1  ;;  %v6096_v2 = vadd.f32 %v839_v13, %v835_v33  ;;  %v7525_v14 = vld [vmem:[#allocation43_spill] sm:$0xff] }
 0x211   :  { %v4470_v1 = vpop.eup %4469  ;;  %v566_v42 = vmul.f32 %v4468_v34, %v6033_v61  ;;  %4489 = vrcp.f32 %v942_v45  ;;  %v837_v61 = vmul.f32 %v4466_v57, %v829_v52 }
 0x212   :  { %v4472_v19 = vpop.eup %4471  ;;  %v812_v51 = vadd.f32 1.0, %v4470_v1  ;;  %4491 = vrcp.f32 %v893_v12  ;;  %v999_v12 = vadd.f32 %v991_v23, %v7523_v56  ;;  %v998_v33 = vadd.f32 %v990_v3, %v7525_v14 }
 0x213   :  { %v625_v49 = vrot.slane %v566_v42, %v5660_v21  ;;  %v912_v4 = vmul.f32 %v5993_v63, %v566_v42  ;;  %v4474_v36 = vpop.eup %4473  ;;  %v863_v26 = vmul.f32 %v5938_v59, %v566_v42  ;;  %v984_v3 = vmul.f32 %v5930_v44, %v6042_v55  ;;  %v7531_v59 = vld [vmem:[#allocation28_spill] sm:$0xff] }
 0x214   :  { %4493 = vrcp.f32 %v812_v51  ;;  %v4476_v16 = vpop.eup %4475  ;;  %v943_v34 = vadd.f32 1.0, %v4474_v36  ;;  %v4097_v36 = vmul.f32 -1.442695, %v999_v12 }
 0x215   :  { %4495 = vtanh.f32 %v975_v28  ;;  %v920_v0 = vrot.slane %v912_v4, 1  ;;  %640 = vperm.xlu1 %4295, %v625_v49   ;;  %v4478_v22 = vpop.eup %4477  ;;  %v871_v57 = vrot.slane %v863_v26, 1  ;;  %v6100_v28 = vadd.f32 %v841_v41, %v837_v61  ;;  %v7526_v4 = vld [vmem:[#allocation38_spill] sm:$0xff] }
 0x216   :  { %4497 = vpow2.f32 %v4087_v31  ;;  %v4480_v45 = vpop.eup %4479  ;;  %v838_v10 = vmul.f32 %v4478_v22, %v830_v5  ;;  %v985_v49 = vmul.f32 %v5930_v44, %v566_v42  ;;  %v1030_v61 = vrot.slane %v5928_v40, 1 }
 0x217   :  { %4499 = vpow2.f32 %v4086_v11  ;;  %v4482_v20 = vpop.eup %4481  ;;  %v928_v52 = vadd.f32 %v920_v0, %v7524_v27  ;;  %v894_v13 = vadd.f32 1.0, %v4480_v45  ;;  %v879_v11 = vadd.f32 %v871_v57, %v7526_v4 }
 0x218   :  { %v4484_v1 = vpop.eup %4483  ;;  %4501 = vtanh.f32 %v976_v53  ;;  %v842_v51 = vmul.f32 %v4482_v20, %v4476_v16  ;;  %v961_v16 = vmul.f32 %v6004_v24, %v566_v42  ;;  %v1031_v0 = vrot.slane %v5948_v39, 1 }
 0x219   :  { %v4486_v25 = vpop.eup %4485  ;;  %v811_v31 = vadd.f32 1.0, %v4484_v1  ;;  %4503 = vtanh.f32 %v6096_v2  ;;  %v4095_v41 = vmul.f32 -1.442695, %v928_v52  ;;  %v4096_v45 = vmul.f32 -1.442695, %v998_v33 }
 0x21a   :  { %v4488_v23 = vpop.eup %4487  ;;  %4505 = vrcp.f32 %v943_v34  ;;  %v6110_v22 = vadd.f32 %v842_v51, %v838_v10  ;;  %v1038_v12 = vmul.f32 %v4472_v19, %v1030_v61  ;;  %v993_v40 = vrot.slane %v985_v49, 1  ;;  %v7527_v51 = vld [vmem:[#allocation16_spill] sm:$0xff] }
 0x21b   :  { %v4490_v26 = vpop.eup %4489  ;;  %4507 = vtanh.f32 %v6100_v28  ;;  %v4091_v57 = vmul.f32 -1.442695, %v879_v11  ;;  %v969_v52 = vrot.slane %v961_v16, 1  ;;  %v1042_v1 = vmul.f32 %v4486_v25, %v6061_v54 }
 0x21c   :  { %v4492_v53 = vpop.eup %4491  ;;  %4509 = vrcp.f32 %v811_v31  ;;  %v1039_v39 = vmul.f32 %v4490_v26, %v1031_v0  ;;  %v1001_v11 = vadd.f32 %v993_v40, %v5944_v58 }
 0x21d   :  { %4511 = vrcp.f32 %v894_v13  ;;  %v977_v26 = vadd.f32 %v969_v52, %v5913_v18  ;;  %v6132_v40 = vadd.f32 %v1042_v1, %v1038_v12  ;;  %v7529_v52 = vld [vmem:[#allocation54_spill] sm:$0xff] }
 0x21e   :  { %v4494_v5 = vpop.eup %4493  ;;  %4513 = vpow2.f32 %v4097_v36  ;;  %v992_v36 = vrot.slane %v984_v3, 1  ;;  %v4099_v3 = vmul.f32 -1.442695, %v1001_v11 }
 0x21f   :  { %v4496_v34 = vpop.eup %4495  ;;  %v6114_v20 = vmul.f32 %v4494_v5, %v4488_v23  ;;  %4515 = vpow2.f32 %v4095_v41 }
 0x220   :  { %v4498_v42 = vpop.eup %4497  ;;  %4517 = vtanh.f32 %v6110_v22  ;;  %v1043_v19 = vmul.f32 %v4496_v34, %v4492_v53 }
 0x221   :  { %v4500_v10 = vpop.eup %4499  ;;  %v1066_v31 = vrot.slane %v6114_v20, %v7527_v51  ;;  %v1181_v55 = vmul.f32 %v6114_v20, %v5930_v44  ;;  %v1137_v33 = vmul.f32 %v6004_v24, %v6114_v20  ;;  %v814_v13 = vadd.f32 1.0, %v4498_v42 }
 0x222   :  { %v813_v23 = vadd.f32 1.0, %v4500_v10  ;;  %4519 = vpow2.f32 %v4096_v45  ;;  %v4502_v49 = vpop.eup %4501  ;;  %v1225_v53 = vmul.f32 %v6114_v20, %v5950_v32  ;;  %v6129_v0 = vadd.f32 %v1043_v19, %v1039_v39  ;;  %v7528_v45 = vld [vmem:[#allocation25_spill] sm:$0xff] }
 0x223   :  { %4521 = vpow2.f32 %v4091_v57  ;;  %v1189_v54 = vrot.slane %v1181_v55, 7  ;;  %1083 = vperm.xlu1 %4295, %v1066_v31   ;;  %v4504_v25 = vpop.eup %4503  ;;  %v1145_v61 = vrot.slane %v1137_v33, 7  ;;  %v1000_v10 = vadd.f32 %v992_v36, %v7529_v52 }
 0x224   :  { %4523 = vrcp.f32 %v814_v13  ;;  %v4506_v41 = vpop.eup %4505  ;;  %v1233_v13 = vrot.slane %v1225_v53, 7 }
 0x225   :  { %v1197_v16 = vadd.f32 %v1189_v54, %v5765_v6  ;;  %4525 = vrcp.f32 %v813_v23  ;;  %v4508_v5 = vpop.eup %4507  ;;  %v1153_v34 = vadd.f32 %v1145_v61, %v7528_v45  ;;  %v7530_v23 = vld [vmem:[#allocation57_spill] sm:$0xff]  ;;  %v4098_v53 = vmul.f32 -1.442695, %v1000_v10 }
 0x226   :  { %v4510_v57 = vpop.eup %4509  ;;  %4527 = vtanh.f32 %v977_v26  ;;  %v1032_v11 = vrot.slane %v7530_v23, 1 }
 0x227   :  { %v4512_v42 = vpop.eup %4511  ;;  %v4105_v31 = vmul.f32 -1.442695, %v1197_v16  ;;  %v6135_v55 = vmul.f32 %v4510_v57, %v4504_v25  ;;  %v4101_v54 = vmul.f32 -1.442695, %v1153_v34  ;;  %4529 = vtanh.f32 %v6129_v0 }
 0x228   :  { %v4514_v33 = vpop.eup %4513  ;;  %4531 = vtanh.f32 %v6132_v40  ;;  %v1241_v57 = vadd.f32 %v1233_v13, %v5832_v30 }
 0x229   :  { %v4516_v39 = vpop.eup %4515  ;;  %v1062_v19 = vrot.slane %v6135_v55, %v7527_v51  ;;  %v1180_v12 = vmul.f32 %v6135_v55, %v5930_v44  ;;  %v1136_v25 = vmul.f32 %v6004_v24, %v6135_v55  ;;  %v1015_v36 = vadd.f32 1.0, %v4514_v33 }
 0x22a   :  { %v4518_v1 = vpop.eup %4517  ;;  %4533 = vpow2.f32 %v4099_v3  ;;  %v1224_v16 = vmul.f32 %v6135_v55, %v5950_v32  ;;  %v1040_v33 = vmul.f32 %v4506_v41, %v1032_v11  ;;  %v1044_v3 = vmul.f32 %v4512_v42, %v4502_v49 }
 0x22b   :  { %4535 = vpow2.f32 %v4105_v31  ;;  %v1188_v61 = vrot.slane %v1180_v12, 7  ;;  %1080 = vperm.xlu0 %4296, %v1062_v19   ;;  %v1144_v21 = vrot.slane %v1136_v25, 7  ;;  %v944_v31 = vadd.f32 1.0, %v4516_v39  ;;  %v7532_v12 = vld [vmem:[#allocation24_spill] sm:$0xff] }
 0x22c   :  { %v4520_v26 = vpop.eup %4519  ;;  %4537 = vpow2.f32 %v4101_v54  ;;  %v1232_v62 = vrot.slane %v1224_v16, 7 }
 0x22d   :  { %v4522_v34 = vpop.eup %4521  ;;  %v1014_v52 = vadd.f32 1.0, %v4520_v26  ;;  %v1196_v58 = vadd.f32 %v1188_v61, %v7531_v59  ;;  %4539 = vrcp.f32 %v1015_v36  ;;  %v1152_v6 = vadd.f32 %v1144_v21, %v7532_v12 }
 0x22e   :  { %v4524_v23 = vpop.eup %4523  ;;  %v895_v10 = vadd.f32 1.0, %v4522_v34 }
 0x22f   :  { %v4526_v14 = vpop.eup %4525  ;;  %v6151_v45 = vmul.f32 %v4524_v23, %v4518_v1  ;;  %4541 = vrcp.f32 %v1014_v52  ;;  %v4104_v19 = vmul.f32 -1.442695, %v1196_v58  ;;  %v4100_v54 = vmul.f32 -1.442695, %v1152_v6 }
 0x230   :  { %v6153_v13 = vmul.f32 %v4526_v14, %v4508_v5  ;;  %4543 = vtanh.f32 %v1241_v57  ;;  %v6159_v41 = vpop.eup %4527  ;;  %v6169_v52 = vadd.f32 %v1044_v3, %v1040_v33  ;;  %v1240_v1 = vadd.f32 %v1232_v62, %v5829_v38 }
 0x231   :  { %v1074_v25 = vrot.slane %v6151_v45, %v7527_v51  ;;  %v1183_v49 = vmul.f32 %v6151_v45, %v5930_v44  ;;  %4545 = vpow2.f32 %v4104_v19  ;;  %v1227_v21 = vmul.f32 %v6151_v45, %v5950_v32  ;;  %v4530_v5 = vpop.eup %4529 }
 0x232   :  { %v1139_v58 = vmul.f32 %v6004_v24, %v6151_v45  ;;  %v1070_v14 = vrot.slane %v6153_v13, %v7527_v51  ;;  %4547 = vpow2.f32 %v4100_v54  ;;  %v1182_v42 = vmul.f32 %v6153_v13, %v5930_v44  ;;  %v4532_v39 = vpop.eup %4531 }
 0x233   :  { %v1191_v6 = vrot.slane %v1183_v49, 7  ;;  %1089 = vperm.xlu1 %4295, %v1074_v25   ;;  %4549 = vrcp.f32 %v944_v31  ;;  %v1226_v36 = vmul.f32 %v6153_v13, %v5950_v32  ;;  %v1235_v57 = vrot.slane %v1227_v21, 7 }
 0x234   :  { %v1147_v11 = vrot.slane %v1139_v58, 7  ;;  %1086 = vperm.xlu0 %4296, %v1070_v14   ;;  %v6174_v26 = vpop.eup %4533  ;;  %4551 = vrcp.f32 %v895_v10  ;;  %v1190_v16 = vrot.slane %v1182_v42, 7  ;;  %v1138_v10 = vmul.f32 %v6004_v24, %v6153_v13 }
 0x235   :  { %v1199_v61 = vadd.f32 %v1191_v6, %v5773_v8  ;;  %v4536_v34 = vpop.eup %4535  ;;  %4553 = vpow2.f32 %v4098_v53  ;;  %v1234_v54 = vrot.slane %v1226_v36, 7  ;;  %v1243_v14 = vadd.f32 %v1235_v57, %v5886_v9  ;;  %v7534_v57 = vld [vmem:[#allocation26_spill] sm:$0xff] }
 0x236   :  { %v1155_v23 = vadd.f32 %v1147_v11, %v5753_v29  ;;  %v4538_v33 = vpop.eup %4537  ;;  %v1198_v62 = vadd.f32 %v1190_v16, %v5770_v37  ;;  %4555 = vtanh.f32 %v6169_v52  ;;  %v1213_v49 = vadd.f32 1.0, %v4536_v34 }
 0x237   :  { %v4107_v3 = vmul.f32 -1.442695, %v1199_v61  ;;  %v4540_v31 = vpop.eup %4539  ;;  %4557 = vtanh.f32 %v1240_v1  ;;  %v1169_v53 = vadd.f32 1.0, %v4538_v33  ;;  %v1146_v6 = vrot.slane %v1138_v10, 7  ;;  %v7533_v1 = vld [vmem:[#allocation22_spill] sm:$0xff] }
 0x238   :  { %v4103_v19 = vmul.f32 -1.442695, %v1155_v23  ;;  %v4106_v21 = vmul.f32 -1.442695, %v1198_v62  ;;  %v6182_v58 = vmul.f32 %v4540_v31, %v4530_v5  ;;  %v1249_v34 = vmul.f32 %v6114_v20, %v5970_v35 }
 0x239   :  { %v4542_v25 = vpop.eup %4541  ;;  %4559 = vpow2.f32 %v4107_v3  ;;  %v1154_v23 = vadd.f32 %v1146_v6, %v7534_v57 }
 0x23a   :  { %v6185_v42 = vmul.f32 %v4542_v25, %v4532_v39  ;;  %v6187_v11 = vpop.eup %4543  ;;  %4561 = vpow2.f32 %v4103_v19  ;;  %v1105_v36 = vrot.slane %v6182_v58, %v7533_v1  ;;  %v1325_v61 = vmul.f32 %v6182_v58, %v5993_v63  ;;  %v7535_v19 = vld [vmem:[#allocation58_spill] sm:$0xff] }
 0x23b   :  { %v1369_v16 = vmul.f32 %v6182_v58, %v6004_v24  ;;  %v4546_v5 = vpop.eup %4545  ;;  %4563 = vpow2.f32 %v4106_v21  ;;  %v1242_v39 = vadd.f32 %v1234_v54, %v5843_v47  ;;  %v1033_v10 = vrot.slane %v7535_v19, 1  ;;  %v7536_v47 = vld [vmem:[#allocation35_spill] sm:$0xff] }
 0x23c   :  { %v4548_v33 = vpop.eup %4547  ;;  %4565 = vrcp.f32 %v1213_v49  ;;  %v1333_v3 = vrot.slane %v1325_v61, 1  ;;  %1122 = vperm.xlu1 %4295, %v1105_v36   ;;  %v1212_v25 = vadd.f32 1.0, %v4546_v5  ;;  %v4102_v51 = vmul.f32 -1.442695, %v1154_v23 }
 0x23d   :  { %v1377_v62 = vrot.slane %v1369_v16, 1  ;;  %v4550_v31 = vpop.eup %4549  ;;  %4567 = vrcp.f32 %v1169_v53  ;;  %v1101_v54 = vrot.slane %v6185_v42, %v7533_v1  ;;  %v1257_v49 = vrot.slane %v1249_v34, 7 }
 0x23e   :  { %v4552_v37 = vpop.eup %4551  ;;  %4569 = vtanh.f32 %v1243_v14  ;;  %v1341_v20 = vadd.f32 %v1333_v3, %v5784_v50  ;;  %v1168_v61 = vadd.f32 1.0, %v4548_v33  ;;  %v1324_v36 = vmul.f32 %v6185_v42, %v5993_v63 }
 0x23f   :  { %v1385_v21 = vadd.f32 %v1377_v62, %v5797_v60  ;;  %v4554_v6 = vpop.eup %4553  ;;  %4571 = vtanh.f32 %v1242_v39  ;;  %v1368_v14 = vmul.f32 %v6185_v42, %v6004_v24  ;;  %1119 = vperm.xlu0 %4296, %v1101_v54   ;;  %v1248_v34 = vmul.f32 %v6135_v55, %v5970_v35  ;;  %v7537_v60 = vld [vmem:[#allocation45_spill] sm:$0xff] }
 0x240   :  { %v6206_v16 = vpop.eup %4555  ;;  %4573 = vpow2.f32 %v4102_v51  ;;  %v4113_v53 = vmul.f32 -1.442695, %v1341_v20  ;;  %v1332_v33 = vrot.slane %v1324_v36, 1  ;;  %v1017_v39 = vadd.f32 1.0, %v6174_v26 }
 0x241   :  { %v4117_v5 = vmul.f32 -1.442695, %v1385_v21  ;;  %v6210_v23 = vpop.eup %4557  ;;  %4575 = vrcp.f32 %v1212_v25  ;;  %v1376_v62 = vrot.slane %v1368_v14, 1  ;;  %v1041_v19 = vmul.f32 %v4550_v31, %v1033_v10 }
 0x242   :  { %4577 = vpow2.f32 %v4113_v53  ;;  %v1045_v51 = vmul.f32 %v4552_v37, %v6159_v41  ;;  %v1413_v21 = vmul.f32 %v6182_v58, %v5930_v44  ;;  %v1340_v54 = vadd.f32 %v1332_v33, %v5779_v46 }
 0x243   :  { %v4560_v3 = vpop.eup %4559  ;;  %4579 = vpow2.f32 %v4117_v5  ;;  %v1384_v55 = vadd.f32 %v1376_v62, %v7536_v47  ;;  %v1265_v53 = vadd.f32 %v1257_v49, %v7537_v60  ;;  %v1256_v37 = vrot.slane %v1248_v34, 7 }
 0x244   :  { %v1215_v20 = vadd.f32 1.0, %v4560_v3  ;;  %v4562_v25 = vpop.eup %4561  ;;  %4581 = vrcp.f32 %v1168_v61  ;;  %v6220_v36 = vadd.f32 %v1045_v51, %v1041_v19  ;;  %v4112_v14 = vmul.f32 -1.442695, %v1340_v54 }
 0x245   :  { %v4564_v26 = vpop.eup %4563  ;;  %4583 = vrcp.f32 %v1017_v39  ;;  %v4116_v10 = vmul.f32 -1.442695, %v1384_v55  ;;  %v1171_v33 = vadd.f32 1.0, %v4562_v25  ;;  %v1421_v3 = vrot.slane %v1413_v21, 1 }
 0x246   :  { %v4566_v31 = vpop.eup %4565  ;;  %v1214_v41 = vadd.f32 1.0, %v4564_v26  ;;  %4585 = vtanh.f32 %v6220_v36  ;;  %v1251_v62 = vmul.f32 %v6151_v45, %v5970_v35  ;;  %v1412_v49 = vmul.f32 %v6185_v42, %v5930_v44 }
 0x247   :  { %v4568_v5 = vpop.eup %4567  ;;  %4587 = vrcp.f32 %v1215_v20  ;;  %v1016_v39 = vadd.f32 1.0, %v4554_v6  ;;  %v1264_v51 = vadd.f32 %v1256_v37, %v5851_v43  ;;  %v4109_v20 = vmul.f32 -1.442695, %v1265_v53 }
 0x248   :  { %v6224_v61 = vpop.eup %4569  ;;  %4589 = vrcp.f32 %v1214_v41  ;;  %v1429_v25 = vadd.f32 %v1421_v3, %v5896_v7  ;;  %v1259_v45 = vrot.slane %v1251_v62, 7  ;;  %v1420_v26 = vrot.slane %v1412_v49, 1 }
 0x249   :  { %v6230_v19 = vpop.eup %4571  ;;  %4591 = vpow2.f32 %v4112_v14  ;;  %v1297_v14 = vrot.slane %v6078_v15, 7  ;;  %v4108_v37 = vmul.f32 -1.442695, %v1264_v51  ;;  %v1296_v53 = vrot.slane %v6096_v2, 7  ;;  %v7538_v15 = vld [vmem:[#allocation48_spill] sm:$0xff] }
 0x24a   :  { %v4574_v34 = vpop.eup %4573  ;;  %4593 = vpow2.f32 %v4116_v10  ;;  %v1298_v3 = vrot.slane %v6100_v28, 7  ;;  %v1267_v49 = vadd.f32 %v1259_v45, %v5881_v17  ;;  %v6246_v2 = vmul.f32 %v6182_v58, %v5950_v32 }
 0x24b   :  { %v4576_v54 = vpop.eup %4575  ;;  %4595 = vrcp.f32 %v1171_v33  ;;  %v1170_v21 = vadd.f32 1.0, %v4574_v34  ;;  %v1299_v33 = vrot.slane %v6110_v22, 7  ;;  %v1428_v34 = vadd.f32 %v1420_v26, %v7538_v15 }
 0x24c   :  { %v4578_v55 = vpop.eup %4577  ;;  %4597 = vrcp.f32 %v1016_v39  ;;  %v6241_v39 = vmul.f32 %v6153_v13, %v5970_v35  ;;  %v1485_v22 = vrot.slane %v6129_v0, 1  ;;  %v1304_v13 = vmul.f32 %v4576_v54, %v1296_v53 }
 0x24d   :  { %v4580_v41 = vpop.eup %4579  ;;  %4599 = vrcp.f32 %v1170_v21  ;;  %v1357_v6 = vadd.f32 1.0, %v4578_v55  ;;  %v1305_v21 = vmul.f32 %v4566_v31, %v1297_v14  ;;  %v1445_v53 = vrot.slane %v6246_v2, 1 }
 0x24e   :  { %v4582_v47 = vpop.eup %4581  ;;  %v1401_v46 = vadd.f32 1.0, %v4580_v41  ;;  %4601 = vpow2.f32 %v4109_v20  ;;  %v1258_v41 = vrot.slane %v6241_v39, 7 }
 0x24f   :  { %v4584_v10 = vpop.eup %4583  ;;  %4603 = vtanh.f32 %v1429_v25  ;;  %v1309_v25 = vmul.f32 %v4568_v5, %v6187_v11  ;;  %v1308_v0 = vmul.f32 %v4582_v47, %v6210_v23  ;;  %v4111_v11 = vmul.f32 -1.442695, %v1267_v49 }
 0x250   :  { %v4586_v62 = vpop.eup %4585  ;;  %4605 = vrcp.f32 %v1401_v46 }
 0x251   :  { %v4588_v20 = vpop.eup %4587  ;;  %4607 = vrcp.f32 %v1357_v6  ;;  %v6249_v28 = vmul.f32 %v4586_v62, %v4584_v10  ;;  %v6263_v62 = vadd.f32 %v1309_v25, %v1305_v21 }
 0x252   :  { %v4590_v51 = vpop.eup %4589  ;;  %4609 = vpow2.f32 %v4108_v37 }
 0x253   :  { %v4592_v55 = vpop.eup %4591  ;;  %v1113_v46 = vrot.slane %v6249_v28, %v7533_v1  ;;  %v1327_v45 = vmul.f32 %v6249_v28, %v5993_v63  ;;  %v1371_v58 = vmul.f32 %v6249_v28, %v6004_v24  ;;  %4611 = vtanh.f32 %v1428_v34 }
 0x254   :  { %v4594_v26 = vpop.eup %4593  ;;  %v1356_v31 = vadd.f32 1.0, %v4592_v55  ;;  %v1415_v37 = vmul.f32 %v6249_v28, %v5930_v44  ;;  %v1306_v47 = vmul.f32 %v4590_v51, %v1298_v3  ;;  %v6267_v34 = vadd.f32 %v1308_v0, %v1304_v13 }
 0x255   :  { %v4596_v5 = vpop.eup %4595  ;;  %v1400_v54 = vadd.f32 1.0, %v4594_v26  ;;  %v1335_v6 = vrot.slane %v1327_v45, 1  ;;  %v1379_v14 = vrot.slane %v1371_v58, 1  ;;  %1128 = vperm.xlu1 %4295, %v1113_v46   ;;  %v1307_v46 = vmul.f32 %v4588_v20, %v1299_v33 }
 0x256   :  { %v4598_v10 = vpop.eup %4597  ;;  %4613 = vrcp.f32 %v1356_v31  ;;  %v1423_v3 = vrot.slane %v1415_v37, 1  ;;  %v1266_v37 = vadd.f32 %v1258_v41, %v7522_v48 }
 0x257   :  { %v4600_v23 = vpop.eup %4599  ;;  %4615 = vrcp.f32 %v1400_v54  ;;  %v1343_v39 = vadd.f32 %v1335_v6, %v7526_v4  ;;  %v1387_v49 = vadd.f32 %v1379_v14, %v7524_v27  ;;  %v6270_v45 = vmul.f32 %v4598_v10, %v6206_v16 }
 0x258   :  { %v4602_v55 = vpop.eup %4601  ;;  %4617 = vpow2.f32 %v4111_v11  ;;  %v1310_v2 = vmul.f32 %v4600_v23, %v6230_v19  ;;  %v1311_v19 = vmul.f32 %v4596_v5, %v6224_v61  ;;  %v1431_v10 = vadd.f32 %v1423_v3, %v5913_v18  ;;  %v7540_v5 = vld [vmem:[#allocation37_spill] sm:$0xff] }
 0x259   :  { %v4604_v58 = vpop.eup %4603  ;;  %v4115_v21 = vmul.f32 -1.442695, %v1343_v39  ;;  %v4119_v25 = vmul.f32 -1.442695, %v1387_v49  ;;  %v1281_v51 = vadd.f32 1.0, %v4602_v55  ;;  %v1109_v31 = vrot.slane %v6270_v45, %v7533_v1  ;;  %v7539_v49 = vld [vmem:[#allocation34_spill] sm:$0xff] }
 0x25a   :  { %v4606_v26 = vpop.eup %4605  ;;  %v1326_v13 = vmul.f32 %v6270_v45, %v5993_v63  ;;  %v1370_v16 = vmul.f32 %v6270_v45, %v6004_v24  ;;  %4619 = vtanh.f32 %v6263_v62  ;;  %v6281_v20 = vadd.f32 %v1310_v2, %v1306_v47 }
 0x25b   :  { %v4608_v33 = vpop.eup %4607  ;;  %4621 = vpow2.f32 %v4115_v21  ;;  %v1493_v0 = vmul.f32 %v4606_v26, %v1485_v22  ;;  %v1414_v14 = vmul.f32 %v6270_v45, %v5930_v44  ;;  %1125 = vperm.xlu0 %4296, %v1109_v31   ;;  %v1453_v22 = vadd.f32 %v1445_v53, %v7523_v56 }
 0x25c   :  { %v4610_v11 = vpop.eup %4609  ;;  %4623 = vpow2.f32 %v4119_v25  ;;  %v1334_v54 = vrot.slane %v1326_v13, 1  ;;  %v1378_v6 = vrot.slane %v1370_v16, 1  ;;  %v1484_v55 = vrot.slane %v6132_v40, 1 }
 0x25d   :  { %4625 = vrcp.f32 %v1281_v51  ;;  %v1280_v23 = vadd.f32 1.0, %v4610_v11  ;;  %v4612_v39 = vpop.eup %4611  ;;  %v6292_v2 = vadd.f32 %v1311_v19, %v1307_v46  ;;  %v1497_v21 = vmul.f32 %v4608_v33, %v4604_v58  ;;  %v7541_v19 = vld [vmem:[#allocation52_spill] sm:$0xff] }
 0x25e   :  { %v1342_v61 = vadd.f32 %v1334_v54, %v7539_v49  ;;  %v1386_v47 = vadd.f32 %v1378_v6, %v7540_v5  ;;  %4627 = vtanh.f32 %v6267_v34  ;;  %v1422_v3 = vrot.slane %v1414_v14, 1 }
 0x25f   :  { %4629 = vrcp.f32 %v1280_v23  ;;  %v4110_v31 = vmul.f32 -1.442695, %v1266_v37  ;;  %v6294_v13 = vadd.f32 %v1497_v21, %v1493_v0  ;;  %v4121_v40 = vmul.f32 -1.442695, %v1453_v22 }
 0x260   :  { %v4614_v25 = vpop.eup %4613  ;;  %v4114_v41 = vmul.f32 -1.442695, %v1342_v61  ;;  %v4118_v26 = vmul.f32 -1.442695, %v1386_v47  ;;  %4631 = vtanh.f32 %v1431_v10  ;;  %v1430_v58 = vadd.f32 %v1422_v3, %v7541_v19  ;;  %v7542_v47 = vld [vmem:[#allocation20_spill] sm:$0xff] }
 0x261   :  { %v4616_v51 = vpop.eup %4615  ;;  %v1496_v16 = vmul.f32 %v4614_v25, %v4612_v39 }
 0x262   :  { %v4618_v11 = vpop.eup %4617  ;;  %4633 = vpow2.f32 %v4114_v41  ;;  %v1492_v54 = vmul.f32 %v4616_v51, %v1484_v55 }
 0x263   :  { %4635 = vpow2.f32 %v4118_v26  ;;  %v1283_v53 = vadd.f32 1.0, %v4618_v11 }
 0x264   :  { %v4620_v46 = vpop.eup %4619  ;;  %4637 = vtanh.f32 %v6292_v2  ;;  %v6298_v33 = vadd.f32 %v1496_v16, %v1492_v54 }
 0x265   :  { %v4622_v6 = vpop.eup %4621  ;;  %4639 = vpow2.f32 %v4110_v31 }
 0x266   :  { %v4624_v14 = vpop.eup %4623  ;;  %4641 = vrcp.f32 %v1283_v53  ;;  %v1359_v37 = vadd.f32 1.0, %v4622_v6 }
 0x267   :  { %v4626_v0 = vpop.eup %4625  ;;  %4643 = vpow2.f32 %v4121_v40  ;;  %v1403_v23 = vadd.f32 1.0, %v4624_v14  ;;  %v7543_v14 = vld [vmem:[#allocation25_spill] sm:$0xff] }
 0x268   :  { %v4628_v10 = vpop.eup %4627  ;;  %4645 = vtanh.f32 %v1430_v58  ;;  %v1321_v39 = vmul.f32 %v4626_v0, %v4620_v46 }
 0x269   :  { %4647 = vtanh.f32 %v6281_v20  ;;  %v4630_v61 = vpop.eup %4629 }
 0x26a   :  { %v1520_v22 = vrot.slane %v1321_v39, %v7542_v47  ;;  %v1591_v55 = vmul.f32 %v1321_v39, %v5993_v63  ;;  %v1635_v21 = vmul.f32 %v1321_v39, %v6004_v24  ;;  %v1679_v25 = vmul.f32 %v1321_v39, %v5930_v44  ;;  %v6305_v41 = vpop.eup %4631 }
 0x26b   :  { %4649 = vrcp.f32 %v1359_v37  ;;  %v1703_v26 = vmul.f32 %v1321_v39, %v5950_v32  ;;  %v1320_v3 = vmul.f32 %v4630_v61, %v4628_v10  ;;  %v7544_v37 = vld [vmem:[#allocation29_spill] sm:$0xff] }
 0x26c   :  { %v4634_v51 = vpop.eup %4633  ;;  %4651 = vrcp.f32 %v1403_v23  ;;  %v1599_v31 = vrot.slane %v1591_v55, 7  ;;  %v1643_v16 = vrot.slane %v1635_v21, 7  ;;  %1537 = vperm.xlu1 %4295, %v1520_v22   ;;  %v1687_v53 = vrot.slane %v1679_v25, 7 }
 0x26d   :  { %v4636_v11 = vpop.eup %4635  ;;  %v1358_v54 = vadd.f32 1.0, %v4634_v51  ;;  %v1516_v40 = vrot.slane %v1320_v3, %v7542_v47  ;;  %v1590_v46 = vmul.f32 %v1320_v3, %v5993_v63  ;;  %v1711_v39 = vrot.slane %v1703_v26, 7 }
 0x26e   :  { %v4638_v58 = vpop.eup %4637  ;;  %v1402_v6 = vadd.f32 1.0, %v4636_v11  ;;  %v1607_v0 = vadd.f32 %v1599_v31, %v7543_v14  ;;  %v1651_v1 = vadd.f32 %v1643_v16, %v7544_v37  ;;  %v1486_v23 = vrot.slane %v6169_v52, 1 }
 0x26f   :  { %v4640_v10 = vpop.eup %4639  ;;  %4653 = vrcp.f32 %v1358_v54  ;;  %v1598_v61 = vrot.slane %v1590_v46, 7  ;;  %v1634_v22 = vmul.f32 %v1320_v3, %v6004_v24  ;;  %1534 = vperm.xlu0 %4296, %v1516_v40   ;;  %v1436_v21 = vmul.f32 %v6185_v42, %v5950_v32 }
 0x270   :  { %v4642_v55 = vpop.eup %4641  ;;  %4655 = vrcp.f32 %v1402_v6  ;;  %v4125_v25 = vmul.f32 -1.442695, %v1607_v0  ;;  %v4129_v51 = vmul.f32 -1.442695, %v1651_v1  ;;  %v1695_v31 = vadd.f32 %v1687_v53, %v5832_v30 }
 0x271   :  { %v4644_v11 = vpop.eup %4643  ;;  %v1606_v26 = vadd.f32 %v1598_v61, %v7532_v12  ;;  %v1642_v16 = vrot.slane %v1634_v22, 7  ;;  %4657 = vtanh.f32 %v6294_v13  ;;  %v1719_v54 = vadd.f32 %v1711_v39, %v7537_v60 }
 0x272   :  { %v4646_v52 = vpop.eup %4645  ;;  %4659 = vpow2.f32 %v4125_v25  ;;  %v1702_v40 = vmul.f32 %v1320_v3, %v5950_v32  ;;  %v1323_v46 = vmul.f32 %v4642_v55, %v4638_v58  ;;  %v1282_v6 = vadd.f32 1.0, %v4640_v10 }
 0x273   :  { %v6321_v19 = vpop.eup %4647  ;;  %4661 = vpow2.f32 %v4129_v51  ;;  %v4124_v42 = vmul.f32 -1.442695, %v1606_v26  ;;  %v1650_v1 = vadd.f32 %v1642_v16, %v7531_v59  ;;  %v1678_v53 = vmul.f32 %v1320_v3, %v5930_v44 }
 0x274   :  { %v1710_v0 = vrot.slane %v1702_v40, 7  ;;  %v1528_v61 = vrot.slane %v1323_v46, %v7542_v47  ;;  %v1469_v22 = vadd.f32 1.0, %v4644_v11  ;;  %v1593_v39 = vmul.f32 %v1323_v46, %v5993_v63 }
 0x275   :  { %v4650_v5 = vpop.eup %4649  ;;  %4663 = vpow2.f32 %v4124_v42  ;;  %v4128_v25 = vmul.f32 -1.442695, %v1650_v1  ;;  %v1637_v58 = vmul.f32 %v1323_v46, %v6004_v24  ;;  %v1444_v49 = vrot.slane %v1436_v21, 1 }
 0x276   :  { %v4652_v55 = vpop.eup %4651  ;;  %4665 = vtanh.f32 %v1695_v31  ;;  %v4133_v51 = vmul.f32 -1.442695, %v1719_v54  ;;  %v1718_v26 = vadd.f32 %v1710_v0, %v5851_v43  ;;  %1543 = vperm.xlu1 %4295, %v1528_v61   ;;  %v1487_v3 = vrot.slane %v6220_v36, 1  ;;  %v7545_v0 = vld [vmem:[#allocation43_spill] sm:$0xff] }
 0x277   :  { %4667 = vpow2.f32 %v4128_v25  ;;  %v1601_v10 = vrot.slane %v1593_v39, 7  ;;  %v1645_v16 = vrot.slane %v1637_v58, 7  ;;  %v1686_v11 = vrot.slane %v1678_v53, 7 }
 0x278   :  { %v4132_v40 = vmul.f32 -1.442695, %v1718_v26  ;;  %v1705_v42 = vmul.f32 %v1323_v46, %v5950_v32  ;;  %4669 = vrcp.f32 %v1282_v6  ;;  %v1495_v31 = vmul.f32 %v4652_v55, %v1487_v3 }
 0x279   :  { %v4654_v1 = vpop.eup %4653  ;;  %v1609_v18 = vadd.f32 %v1601_v10, %v5753_v29  ;;  %v1653_v21 = vadd.f32 %v1645_v16, %v5773_v8  ;;  %4671 = vrcp.f32 %v1469_v22  ;;  %v1452_v61 = vadd.f32 %v1444_v49, %v7545_v0 }
 0x27a   :  { %v4656_v54 = vpop.eup %4655  ;;  %4673 = vpow2.f32 %v4133_v51  ;;  %v1499_v36 = vmul.f32 %v4650_v5, %v6305_v41  ;;  %v1681_v58 = vmul.f32 %v1323_v46, %v5930_v44  ;;  %v1713_v43 = vrot.slane %v1705_v42, 7 }
 0x27b   :  { %v4658_v25 = vpop.eup %4657  ;;  %v4127_v39 = vmul.f32 -1.442695, %v1609_v18  ;;  %v4131_v53 = vmul.f32 -1.442695, %v1653_v21  ;;  %v1494_v26 = vmul.f32 %v4656_v54, %v1486_v23  ;;  %4675 = vpow2.f32 %v4132_v40 }
 0x27c   :  { %v4660_v6 = vpop.eup %4659  ;;  %v6336_v10 = vadd.f32 %v1499_v36, %v1495_v31  ;;  %v1498_v16 = vmul.f32 %v4654_v1, %v4646_v52  ;;  %v1694_v3 = vadd.f32 %v1686_v11, %v5829_v38  ;;  %v1689_v41 = vrot.slane %v1681_v58, 7 }
 0x27d   :  { %v4662_v22 = vpop.eup %4661  ;;  %v1623_v55 = vadd.f32 1.0, %v4660_v6  ;;  %4677 = vpow2.f32 %v4127_v39  ;;  %v4120_v46 = vmul.f32 -1.442695, %v1452_v61  ;;  %v1721_v40 = vadd.f32 %v1713_v43, %v5881_v17 }
 0x27e   :  { %v1667_v49 = vadd.f32 1.0, %v4662_v22  ;;  %4679 = vpow2.f32 %v4131_v53  ;;  %v6339_v5 = vadd.f32 %v1498_v16, %v1494_v26  ;;  %v1697_v21 = vadd.f32 %v1689_v41, %v5886_v9  ;;  %v7546_v16 = vld [vmem:[#allocation19_spill] sm:$0xff] }
 0x27f   :  { %v4664_v18 = vpop.eup %4663  ;;  %4681 = vrcp.f32 %v1623_v55  ;;  %v4135_v36 = vmul.f32 -1.442695, %v1721_v40  ;;  %v1751_v26 = vrot.slane %v6263_v62, 7 }
 0x280   :  { %v4666_v23 = vpop.eup %4665  ;;  %4683 = vrcp.f32 %v1667_v49  ;;  %v1622_v51 = vadd.f32 1.0, %v4664_v18 }
 0x281   :  { %v4668_v42 = vpop.eup %4667  ;;  %4685 = vtanh.f32 %v1694_v3 }
 0x282   :  { %v4670_v52 = vpop.eup %4669  ;;  %4687 = vrcp.f32 %v1622_v51  ;;  %v1666_v1 = vadd.f32 1.0, %v4668_v42 }
 0x283   :  { %v4672_v11 = vpop.eup %4671  ;;  %v1322_v31 = vmul.f32 %v4670_v52, %v6321_v19  ;;  %4689 = vpow2.f32 %v4120_v46  ;;  %v7547_v52 = vld [vmem:[#allocation30_spill] sm:$0xff] }
 0x284   :  { %v4674_v54 = vpop.eup %4673  ;;  %4691 = vrcp.f32 %v1666_v1  ;;  %v6344_v61 = vmul.f32 %v4672_v11, %v4658_v25 }
 0x285   :  { %v1524_v39 = vrot.slane %v1322_v31, %v7542_v47  ;;  %v1592_v43 = vmul.f32 %v1322_v31, %v5993_v63  ;;  %v1636_v53 = vmul.f32 %v1322_v31, %v6004_v24  ;;  %v4676_v58 = vpop.eup %4675  ;;  %v1704_v6 = vmul.f32 %v1322_v31, %v5950_v32 }
 0x286   :  { %v1559_v19 = vrot.slane %v6344_v61, %v7546_v16  ;;  %v1779_v22 = vmul.f32 %v6344_v61, %v6004_v24  ;;  %4693 = vtanh.f32 %v1697_v21  ;;  %v1823_v49 = vmul.f32 %v6344_v61, %v5930_v44 }
 0x287   :  { %v4678_v55 = vpop.eup %4677  ;;  %v1600_v25 = vrot.slane %v1592_v43, 7  ;;  %v1644_v3 = vrot.slane %v1636_v53, 7  ;;  %1540 = vperm.xlu0 %4296, %v1524_v39   ;;  %v1735_v41 = vadd.f32 1.0, %v4674_v54  ;;  %4695 = vpow2.f32 %v4135_v36 }
 0x288   :  { %v4680_v18 = vpop.eup %4679  ;;  %v1625_v46 = vadd.f32 1.0, %v4678_v55  ;;  %v1787_v62 = vrot.slane %v1779_v22, 1  ;;  %1576 = vperm.xlu1 %4295, %v1559_v19   ;;  %v1831_v11 = vrot.slane %v1823_v49, 1  ;;  %v1750_v39 = vrot.slane %v6267_v34, 7 }
 0x289   :  { %v4682_v51 = vpop.eup %4681  ;;  %v1669_v40 = vadd.f32 1.0, %v4680_v18  ;;  %v1608_v42 = vadd.f32 %v1600_v25, %v7534_v57  ;;  %v1652_v1 = vadd.f32 %v1644_v3, %v7547_v52  ;;  %v1712_v53 = vrot.slane %v1704_v6, 7  ;;  %v7548_v25 = vld [vmem:[#allocation36_spill] sm:$0xff] }
 0x28a   :  { %v4684_v21 = vpop.eup %4683  ;;  %v1763_v43 = vmul.f32 %v4682_v51, %v4666_v23  ;;  %4697 = vrcp.f32 %v1625_v46  ;;  %v1680_v19 = vmul.f32 %v1322_v31, %v5930_v44  ;;  %v1795_v55 = vadd.f32 %v1787_v62, %v5784_v50 }
 0x28b   :  { %v4686_v47 = vpop.eup %4685  ;;  %v1759_v38 = vmul.f32 %v4684_v21, %v1751_v26  ;;  %4699 = vrcp.f32 %v1669_v40  ;;  %v4126_v54 = vmul.f32 -1.442695, %v1608_v42  ;;  %v4130_v36 = vmul.f32 -1.442695, %v1652_v1 }
 0x28c   :  { %v4688_v22 = vpop.eup %4687  ;;  %4701 = vrcp.f32 %v1735_v41  ;;  %v1839_v3 = vadd.f32 %v1831_v11, %v7548_v25  ;;  %v1734_v23 = vadd.f32 1.0, %v4676_v58  ;;  %v4137_v26 = vmul.f32 -1.442695, %v1795_v55 }
 0x28d   :  { %v4690_v49 = vpop.eup %4689  ;;  %v6363_v18 = vadd.f32 %v1763_v43, %v1759_v38  ;;  %v1762_v34 = vmul.f32 %v4688_v22, %v4686_v47  ;;  %4703 = vpow2.f32 %v4126_v54  ;;  %v1439_v46 = vmul.f32 %v6249_v28, %v5950_v32 }
 0x28e   :  { %v4692_v6 = vpop.eup %4691  ;;  %4705 = vpow2.f32 %v4130_v36  ;;  %v1720_v31 = vadd.f32 %v1712_v53, %v7522_v48  ;;  %v1688_v62 = vrot.slane %v1680_v19, 7  ;;  %v4141_v51 = vmul.f32 -1.442695, %v1839_v3  ;;  %v7550_v53 = vld [vmem:[#allocation42_spill] sm:$0xff] }
 0x28f   :  { %4707 = vtanh.f32 %v6363_v18  ;;  %v1758_v41 = vmul.f32 %v4692_v6, %v1750_v39  ;;  %v1891_v38 = vmul.f32 %v6344_v61, %v5970_v35  ;;  %v1468_v58 = vadd.f32 1.0, %v4690_v49 }
 0x290   :  { %v4694_v40 = vpop.eup %4693  ;;  %4709 = vrcp.f32 %v1734_v23  ;;  %v1447_v11 = vrot.slane %v1439_v46, 1  ;;  %v4134_v28 = vmul.f32 -1.442695, %v1720_v31  ;;  %v1867_v21 = vmul.f32 %v6344_v61, %v5950_v32 }
 0x291   :  { %v6371_v47 = vadd.f32 %v1762_v34, %v1758_v41  ;;  %v4696_v42 = vpop.eup %4695  ;;  %4711 = vpow2.f32 %v4137_v26  ;;  %v1899_v1 = vrot.slane %v1891_v38, 1  ;;  %v1753_v39 = vrot.slane %v6292_v2, 7  ;;  %v7551_v34 = vld [vmem:[#allocation56_spill] sm:$0xff] }
 0x292   :  { %v1696_v54 = vadd.f32 %v1688_v62, %v7550_v53  ;;  %v1737_v19 = vadd.f32 1.0, %v4696_v42  ;;  %v1455_v6 = vadd.f32 %v1447_v11, %v7551_v34  ;;  %v1875_v61 = vrot.slane %v1867_v21, 1 }
 0x293   :  { %7549 = vst [vmem:[#allocation57_spill] sm:$0xff] %v6371_v47  ;;  %4713 = vtanh.f32 %v6371_v47  ;;  %v1907_v36 = vadd.f32 %v1899_v1, %v7523_v56  ;;  %v7553_v1 = vld [vmem:[#allocation55_spill] sm:$0xff] }
 0x294   :  { %v4698_v43 = vpop.eup %4697  ;;  %4715 = vpow2.f32 %v4141_v51 }
 0x295   :  { %v4700_v22 = vpop.eup %4699  ;;  %v1765_v55 = vmul.f32 %v4698_v43, %v4694_v40  ;;  %4717 = vrcp.f32 %v1468_v58  ;;  %v4145_v41 = vmul.f32 -1.442695, %v1907_v36  ;;  %v1883_v40 = vadd.f32 %v1875_v61, %v5896_v7 }
 0x296   :  { %v4702_v3 = vpop.eup %4701  ;;  %v1761_v49 = vmul.f32 %v4700_v22, %v1753_v39  ;;  %4719 = vtanh.f32 %v6298_v33  ;;  %v4123_v58 = vmul.f32 -1.442695, %v1455_v6 }
 0x297   :  { %v4704_v23 = vpop.eup %4703  ;;  %4721 = vpow2.f32 %v4134_v28 }
 0x298   :  { %v4706_v26 = vpop.eup %4705  ;;  %v6381_v2 = vadd.f32 %v1765_v55, %v1761_v49  ;;  %v1624_v46 = vadd.f32 1.0, %v4704_v23  ;;  %4723 = vtanh.f32 %v1696_v54  ;;  %v6397_v49 = vmul.f32 %v6270_v45, %v5950_v32 }
 0x299   :  { %v4708_v31 = vpop.eup %4707  ;;  %4725 = vrcp.f32 %v1737_v19  ;;  %v1668_v62 = vadd.f32 1.0, %v4706_v26 }
 0x29a   :  { %v6383_v51 = vmul.f32 %v4708_v31, %v4702_v3  ;;  %4727 = vtanh.f32 %v6381_v2  ;;  %v4710_v38 = vpop.eup %4709 }
 0x29b   :  { %4729 = vrcp.f32 %v1624_v46  ;;  %v4712_v42 = vpop.eup %4711 }
 0x29c   :  { %7552 = vst [vmem:[#allocation58_spill] sm:$0xff] %v6383_v51  ;;  %v2045_v11 = vmul.f32 %v6383_v51, %v7553_v1  ;;  %v2089_v28 = vmul.f32 %v6383_v51, %v5993_v63  ;;  %v2157_v21 = vmul.f32 %v6383_v51, %v5930_v44  ;;  %4731 = vpow2.f32 %v4145_v41 }
 0x29d   :  { %v4714_v43 = vpop.eup %4713  ;;  %v2133_v39 = vmul.f32 %v6383_v51, %v6004_v24  ;;  %4733 = vrcp.f32 %v1668_v62  ;;  %v1811_v54 = vadd.f32 1.0, %v4712_v42 }
 0x29e   :  { %v4716_v36 = vpop.eup %4715  ;;  %v2053_v22 = vrot.slane %v2045_v11, 7  ;;  %v2097_v19 = vrot.slane %v2089_v28, 7  ;;  %v2165_v55 = vrot.slane %v2157_v21, 7  ;;  %4735 = vtanh.f32 %v1883_v40 }
 0x29f   :  { %v4718_v3 = vpop.eup %4717  ;;  %v1855_v23 = vadd.f32 1.0, %v4716_v36  ;;  %v6399_v6 = vmul.f32 %v4714_v43, %v4710_v38  ;;  %4737 = vpow2.f32 %v4123_v58  ;;  %v2141_v62 = vrot.slane %v2133_v39, 7 }
 0x2a0   :  { %v4720_v61 = vpop.eup %4719  ;;  %v2061_v26 = vadd.f32 %v2053_v22, %v7543_v14  ;;  %v2105_v46 = vadd.f32 %v2097_v19, %v7544_v37  ;;  %v2173_v41 = vadd.f32 %v2165_v55, %v7537_v60  ;;  %4739 = vrcp.f32 %v1811_v54 }
 0x2a1   :  { %v4722_v31 = vpop.eup %4721  ;;  %v6404_v42 = vmul.f32 %v4720_v61, %v4718_v3  ;;  %4741 = vtanh.f32 %v6336_v10  ;;  %v1752_v19 = vrot.slane %v6281_v20, 7 }
 0x2a2   :  { %v4724_v11 = vpop.eup %4723  ;;  %v4149_v45 = vmul.f32 -1.442695, %v2061_v26  ;;  %v4153_v28 = vmul.f32 -1.442695, %v2105_v46  ;;  %v4157_v21 = vmul.f32 -1.442695, %v2173_v41  ;;  %4743 = vrcp.f32 %v1855_v23 }
 0x2a3   :  { %v4726_v38 = vpop.eup %4725  ;;  %v1555_v40 = vrot.slane %v6404_v42, %v7546_v16  ;;  %v1778_v43 = vmul.f32 %v6404_v42, %v6004_v24  ;;  %v1736_v54 = vadd.f32 1.0, %v4722_v31  ;;  %v2149_v23 = vadd.f32 %v2141_v62, %v5832_v30 }
 0x2a4   :  { %v4728_v58 = vpop.eup %4727  ;;  %4745 = vpow2.f32 %v4149_v45  ;;  %v1822_v26 = vmul.f32 %v6404_v42, %v5930_v44 }
 0x2a5   :  { %v4730_v36 = vpop.eup %4729  ;;  %4747 = vpow2.f32 %v4153_v28  ;;  %v6412_v22 = vmul.f32 %v4728_v58, %v4726_v38  ;;  %v1786_v55 = vrot.slane %v1778_v43, 1  ;;  %1573 = vperm.xlu0 %4296, %v1555_v40   ;;  %v7554_v28 = vld [vmem:[#allocation32_spill] sm:$0xff] }
 0x2a6   :  { %v4732_v3 = vpop.eup %4731  ;;  %4749 = vpow2.f32 %v4157_v21  ;;  %v1764_v61 = vmul.f32 %v4730_v36, %v4724_v11  ;;  %v1890_v21 = vmul.f32 %v6404_v42, %v5970_v35  ;;  %v1830_v53 = vrot.slane %v1822_v26, 1 }
 0x2a7   :  { %v4734_v46 = vpop.eup %4733  ;;  %v2047_v41 = vmul.f32 %v6412_v22, %v7553_v1  ;;  %v2091_v31 = vmul.f32 %v6412_v22, %v5993_v63  ;;  %v2135_v20 = vmul.f32 %v6412_v22, %v6004_v24  ;;  %v2159_v45 = vmul.f32 %v6412_v22, %v5930_v44 }
 0x2a8   :  { %4751 = vrcp.f32 %v1736_v54  ;;  %v1760_v62 = vmul.f32 %v4734_v46, %v1752_v19  ;;  %v1794_v11 = vadd.f32 %v1786_v55, %v7554_v28  ;;  %v4736_v38 = vpop.eup %4735  ;;  %v1923_v36 = vadd.f32 1.0, %v4732_v3 }
 0x2a9   :  { %v2055_v40 = vrot.slane %v2047_v41, 7  ;;  %v2099_v43 = vrot.slane %v2091_v31, 7  ;;  %v2167_v58 = vrot.slane %v2159_v45, 7  ;;  %v4738_v39 = vpop.eup %4737  ;;  %4753 = vtanh.f32 %v2149_v23 }
 0x2aa   :  { %v6429_v47 = vadd.f32 %v1764_v61, %v1760_v62  ;;  %v4136_v48 = vmul.f32 -1.442695, %v1794_v11  ;;  %v4740_v51 = vpop.eup %4739  ;;  %v2143_v55 = vrot.slane %v2135_v20, 7  ;;  %v1939_v3 = vrot.slane %v6294_v13, 1  ;;  %v7556_v20 = vld [vmem:[#allocation35_spill] sm:$0xff] }
 0x2ab   :  { %v2063_v54 = vadd.f32 %v2055_v40, %v5753_v29  ;;  %v2107_v19 = vadd.f32 %v2099_v43, %v5773_v8  ;;  %v2175_v46 = vadd.f32 %v2167_v58, %v5881_v17  ;;  %v6434_v28 = vpop.eup %4741  ;;  %v1951_v41 = vmul.f32 %v4740_v51, %v4736_v38 }
 0x2ac   :  { %7555 = vst [vmem:[#allocation61_spill] sm:$0xff] %v6429_v47  ;;  %4755 = vtanh.f32 %v6429_v47  ;;  %v1898_v23 = vrot.slane %v1890_v21, 1  ;;  %v4744_v61 = vpop.eup %4743  ;;  %v2044_v26 = vmul.f32 %v6399_v6, %v7553_v1  ;;  %v1838_v40 = vadd.f32 %v1830_v53, %v7556_v20 }
 0x2ad   :  { %v4151_v31 = vmul.f32 -1.442695, %v2063_v54  ;;  %v4155_v45 = vmul.f32 -1.442695, %v2107_v19  ;;  %4757 = vrcp.f32 %v1923_v36  ;;  %v1947_v11 = vmul.f32 %v4744_v61, %v1939_v3  ;;  %v7557_v3 = vld [vmem:[#allocation54_spill] sm:$0xff] }
 0x2ae   :  { %v4746_v62 = vpop.eup %4745  ;;  %4759 = vpow2.f32 %v4136_v48  ;;  %v1866_v43 = vmul.f32 %v6404_v42, %v5950_v32  ;;  %v2151_v13 = vadd.f32 %v2143_v55, %v5886_v9  ;;  %v4159_v51 = vmul.f32 -1.442695, %v2175_v46 }
 0x2af   :  { %v4748_v58 = vpop.eup %4747  ;;  %v2077_v47 = vadd.f32 1.0, %v4746_v62  ;;  %4761 = vpow2.f32 %v4151_v31  ;;  %v6444_v36 = vadd.f32 %v1951_v41, %v1947_v11  ;;  %v1906_v54 = vadd.f32 %v1898_v23, %v7545_v0 }
 0x2b0   :  { %v4750_v21 = vpop.eup %4749  ;;  %v2121_v38 = vadd.f32 1.0, %v4748_v58  ;;  %4763 = vpow2.f32 %v4155_v45  ;;  %v4140_v53 = vmul.f32 -1.442695, %v1838_v40  ;;  %v1874_v19 = vrot.slane %v1866_v43, 1 }
 0x2b1   :  { %4765 = vrcp.f32 %v2077_v47  ;;  %v2088_v42 = vmul.f32 %v6399_v6, %v5993_v63  ;;  %v7558_v61 = vrot.slane %v6397_v49, 1  ;;  %v2189_v46 = vadd.f32 1.0, %v4750_v21 }
 0x2b2   :  { %v4752_v48 = vpop.eup %4751  ;;  %4767 = vrcp.f32 %v2121_v38  ;;  %v4144_v41 = vmul.f32 -1.442695, %v1906_v54  ;;  %v2052_v45 = vrot.slane %v2044_v26, 7  ;;  %v1471_v47 = vadd.f32 1.0, %v4738_v39 }
 0x2b3   :  { %v1454_v55 = vadd.f32 %v7558_v61, %v7557_v3  ;;  %4769 = vtanh.f32 %v2151_v13  ;;  %v4754_v31 = vpop.eup %4753  ;;  %v1882_v62 = vadd.f32 %v1874_v19, %v7538_v15  ;;  %v2096_v11 = vrot.slane %v2088_v42, 7 }
 0x2b4   :  { %4771 = vpow2.f32 %v4159_v51  ;;  %v2060_v13 = vadd.f32 %v2052_v45, %v7532_v12  ;;  %v2205_v19 = vrot.slane %v6363_v18, 7  ;;  %v2207_v15 = vrot.slane %v6381_v2, 7 }
 0x2b5   :  { %4773 = vtanh.f32 %v6444_v36  ;;  %v4122_v43 = vmul.f32 -1.442695, %v1454_v55  ;;  %v2104_v54 = vadd.f32 %v2096_v11, %v7531_v59 }
 0x2b6   :  { %v4756_v23 = vpop.eup %4755  ;;  %4775 = vpow2.f32 %v4140_v53  ;;  %v4148_v55 = vmul.f32 -1.442695, %v2060_v13 }
 0x2b7   :  { %v4758_v40 = vpop.eup %4757  ;;  %4777 = vrcp.f32 %v2189_v46  ;;  %v6454_v58 = vmul.f32 %v4756_v23, %v4752_v48  ;;  %v4152_v23 = vmul.f32 -1.442695, %v2104_v54  ;;  %v6478_v54 = vpop.permute.xlu0 %2803 }
 0x2b8   :  { %v4760_v49 = vpop.eup %4759  ;;  %4779 = vpow2.f32 %v4144_v41 }
 0x2b9   :  { %v4762_v51 = vpop.eup %4761  ;;  %4781 = vrcp.f32 %v1471_v47  ;;  %v2046_v26 = vmul.f32 %v6454_v58, %v7553_v1  ;;  %v1810_v38 = vadd.f32 1.0, %v4760_v49 }
 0x2ba   :  { %v4764_v39 = vpop.eup %4763  ;;  %v2079_v21 = vadd.f32 1.0, %v4762_v51  ;;  %4783 = vtanh.f32 %v1882_v62  ;;  %v6469_v51 = vpop.permute.xlu1 %2498 }
 0x2bb   :  { %v4766_v53 = vpop.eup %4765  ;;  %v2123_v48 = vadd.f32 1.0, %v4764_v39  ;;  %4785 = vpow2.f32 %v4122_v43  ;;  %v2054_v45 = vrot.slane %v2046_v26, 7  ;;  %7559 = vst [vmem:[#allocation62_spill] sm:$0xff] %v6469_v51 }
 0x2bc   :  { %v4768_v42 = vpop.eup %4767  ;;  %v2217_v61 = vmul.f32 %v4766_v53, %v4754_v31  ;;  %4787 = vrcp.f32 %v2079_v21 }
 0x2bd   :  { %v4770_v46 = vpop.eup %4769  ;;  %v2213_v41 = vmul.f32 %v4768_v42, %v2205_v19  ;;  %4789 = vrcp.f32 %v2123_v48  ;;  %v2062_v26 = vadd.f32 %v2054_v45, %v7534_v57  ;;  %v7560_v19 = vld [vmem:[#allocation60_spill] sm:$0xff] }
 0x2be   :  { %v4772_v47 = vpop.eup %4771  ;;  %4791 = vrcp.f32 %v1810_v38  ;;  %v6493_v2 = vpop.permute.xlu1 %2960 }
 0x2bf   :  { %v4774_v49 = vpop.eup %4773  ;;  %v6461_v62 = vadd.f32 %v2217_v61, %v2213_v41  ;;  %4793 = vtanh.f32 %v6339_v5  ;;  %v2191_v31 = vadd.f32 1.0, %v4772_v47  ;;  %v1938_v61 = vrot.slane %v6298_v33, 1  ;;  %7561 = vst [vmem:[#allocation60_spill] sm:$0xff] %v6493_v2 }
 0x2c0   :  { %v4776_v11 = vpop.eup %4775  ;;  %v6464_v18 = vmul.f32 %v4774_v49, %v4758_v40  ;;  %4795 = vpow2.f32 %v4148_v55 }
 0x2c1   :  { %v6466_v43 = vpop.eup %4777  ;;  %4797 = vtanh.f32 %v6461_v62  ;;  %v1854_v13 = vadd.f32 1.0, %v4776_v11 }
 0x2c2   :  { %v4780_v39 = vpop.eup %4779  ;;  %v2233_v21 = vmul.f32 %v6464_v18, %v5930_v44  ;;  %v2277_v38 = vmul.f32 %v6464_v18, %v5950_v32  ;;  %v2321_v40 = vmul.f32 %v6464_v18, %v5970_v35  ;;  %4799 = vpow2.f32 %v4152_v23 }
 0x2c3   :  { %v4782_v53 = vpop.eup %4781  ;;  %v2345_v48 = vmul.f32 %v6464_v18, %v7560_v19  ;;  %4801 = vrcp.f32 %v1854_v13  ;;  %v1922_v42 = vadd.f32 1.0, %v4780_v39  ;;  %v6485_v23 = vmul.f32 -1.442695, %v2062_v26 }
 0x2c4   :  { %v4784_v55 = vpop.eup %4783  ;;  %v2241_v41 = vrot.slane %v2233_v21, 1  ;;  %v2285_v45 = vrot.slane %v2277_v38, 1  ;;  %v2329_v47 = vrot.slane %v2321_v40, 1  ;;  %v1511_v49 = vmul.f32 %v4782_v53, %v6434_v28 }
 0x2c5   :  { %v4786_v11 = vpop.eup %4785  ;;  %4803 = vrcp.f32 %v2191_v31  ;;  %v2353_v0 = vrot.slane %v2345_v48, 1 }
 0x2c6   :  { %v4788_v59 = vpop.eup %4787  ;;  %v2249_v57 = vadd.f32 %v2241_v41, %v5784_v50  ;;  %v2293_v13 = vadd.f32 %v2285_v45, %v7548_v25  ;;  %v2337_v33 = vadd.f32 %v2329_v47, %v5896_v7  ;;  %4805 = vrcp.f32 %v1922_v42  ;;  %v6495_v41 = vpop.permute.xlu0 %3265 }
 0x2c7   :  { %v4790_v39 = vpop.eup %4789  ;;  %v2219_v21 = vmul.f32 %v4788_v59, %v4770_v46  ;;  %v2361_v38 = vadd.f32 %v2353_v0, %v7523_v56  ;;  %v1567_v28 = vrot.slane %v1511_v49, %v7546_v16  ;;  %v1781_v31 = vmul.f32 %v1511_v49, %v6004_v24  ;;  %7562 = vst [vmem:[#allocation63_spill] sm:$0xff] %v6495_v41 }
 0x2c8   :  { %v4792_v26 = vpop.eup %4791  ;;  %v2215_v40 = vmul.f32 %v4790_v39, %v2207_v15  ;;  %v4161_v53 = vmul.f32 -1.442695, %v2249_v57  ;;  %v4165_v48 = vmul.f32 -1.442695, %v2293_v13  ;;  %4807 = vtanh.f32 %v2337_v33 }
 0x2c9   :  { %v6497_v45 = vpop.eup %4793  ;;  %v4169_v42 = vmul.f32 -1.442695, %v2361_v38  ;;  %v1789_v47 = vrot.slane %v1781_v31, 1  ;;  %v1825_v59 = vmul.f32 %v1511_v49, %v5930_v44  ;;  %v1869_v0 = vmul.f32 %v1511_v49, %v5950_v32  ;;  %1582 = vperm.xlu1 %4295, %v1567_v28  }
 0x2ca   :  { %v6501_v46 = vpop.eup %4795  ;;  %v6503_v12 = vadd.f32 %v2219_v21, %v2215_v40  ;;  %4809 = vpow2.f32 %v4161_v53  ;;  %v1893_v57 = vmul.f32 %v1511_v49, %v5970_v35  ;;  %v1470_v15 = vadd.f32 1.0, %v4786_v11  ;;  %v7565_v11 = vld [vmem:[#allocation53_spill] sm:$0xff] }
 0x2cb   :  { %v4798_v13 = vpop.eup %4797  ;;  %4811 = vpow2.f32 %v4165_v48  ;;  %v1797_v33 = vadd.f32 %v1789_v47, %v7526_v4  ;;  %v1833_v39 = vrot.slane %v1825_v59, 1  ;;  %v1877_v38 = vrot.slane %v1869_v0, 1  ;;  %v6515_v48 = vpop.permute.xlu1 %3422 }
 0x2cc   :  { %v6507_v31 = vpop.eup %4799  ;;  %4813 = vtanh.f32 %v6503_v12  ;;  %v1950_v41 = vmul.f32 %v4792_v26, %v4784_v55  ;;  %v1901_v28 = vrot.slane %v1893_v57, 1  ;;  %v6511_v20 = vmul.f32 %v4798_v13, %v6466_v43  ;;  %7566 = vst [vmem:[#allocation66_spill] sm:$0xff] %v6515_v48  ;;  %v6520_v26 = vpop.permute.xlu0 %3727 }
 0x2cd   :  { %7563 = vst [vmem:[#allocation64_spill] sm:$0xff] %v6507_v31  ;;  %v4802_v21 = vpop.eup %4801  ;;  %4815 = vpow2.f32 %v4169_v42  ;;  %v4139_v40 = vmul.f32 -1.442695, %v1797_v33  ;;  %v1841_v49 = vadd.f32 %v1833_v39, %v7524_v27  ;;  %v1885_v53 = vadd.f32 %v1877_v38, %v7565_v11  ;;  %7567 = vst [vmem:[#allocation67_spill] sm:$0xff] %v6520_v26  ;;  %v7571_v31 = vld [vmem:[#allocation37_spill] sm:$0xff] }
 0x2ce   :  { %7564 = vst [vmem:[#allocation65_spill] sm:$0xff] %v6511_v20  ;;  %v1946_v47 = vmul.f32 %v4802_v21, %v1938_v61  ;;  %v1909_v59 = vadd.f32 %v1901_v28, %v7551_v34  ;;  %4817 = vrcp.f32 %v1470_v15  ;;  %v2502_v55 = vmul.f32 %v6469_v51, %v6511_v20 }
 0x2cf   :  { %v4804_v43 = vpop.eup %4803  ;;  %4819 = vpow2.f32 %v4139_v40  ;;  %v4143_v0 = vmul.f32 -1.442695, %v1841_v49  ;;  %v2546_v42 = vmul.f32 %v6511_v20, %v7553_v1  ;;  %v2590_v57 = vmul.f32 %v6511_v20, %v5993_v63 }
 0x2d0   :  { %v6526_v13 = vpop.eup %4805  ;;  %v6528_v61 = vadd.f32 %v1950_v41, %v1946_v47  ;;  %4821 = vtanh.f32 %v1885_v53  ;;  %v4147_v15 = vmul.f32 -1.442695, %v1909_v59  ;;  %v2510_v33 = vrot.slane %v2502_v55, 7  ;;  %v593_v40 = vpop.permute.xlu0 %592 }
 0x2d1   :  { %4823 = vpow2.f32 %v4143_v0  ;;  %v2554_v39 = vrot.slane %v2546_v42, 7  ;;  %v2598_v38 = vrot.slane %v2590_v57, 7  ;;  %v590_v41 = vpop.permute.xlu1 %589  ;;  %v6539_v42 = vmul.f32 %v6511_v20, %v6004_v24 }
 0x2d2   :  { %7568 = vst [vmem:[#allocation68_spill] sm:$0xff] %v6528_v61  ;;  %v6530_v28 = vpop.eup %4807  ;;  %4825 = vtanh.f32 %v6528_v61  ;;  %v2518_v21 = vadd.f32 %v2510_v33, %v7543_v14  ;;  %v601_v33 = vsel %vm600_vm1, %v593_v40, %v590_v41 }
 0x2d3   :  { %4827 = vpow2.f32 %v4147_v15  ;;  %v2562_v49 = vadd.f32 %v2554_v39, %v7544_v37  ;;  %v2606_v26 = vadd.f32 %v2598_v38, %v5832_v30 }
 0x2d4   :  { %v4810_v47 = vpop.eup %4809  ;;  %v4173_v53 = vmul.f32 -1.442695, %v2518_v21  ;;  %4829 = vpow2.f32 %v6485_v23  ;;  %v596_v39 = vpop.permute.xlu0 %595 }
 0x2d5   :  { %v4812_v59 = vpop.eup %4811  ;;  %v2265_v55 = vadd.f32 1.0, %v4810_v47  ;;  %v4177_v0 = vmul.f32 -1.442695, %v2562_v49  ;;  %4831 = vtanh.f32 %v2606_v26  ;;  %v6545_v23 = vsel %vm602_vm2, %v596_v39, %v601_v33  ;;  %v632_v48 = vpop.permute.xlu1 %631 }
 0x2d6   :  { %v4814_v57 = vpop.eup %4813  ;;  %v2309_v15 = vadd.f32 1.0, %v4812_v59  ;;  %4833 = vpow2.f32 %v4173_v53  ;;  %v2393_v47 = vrot.slane %v6444_v36, 1  ;;  %v6550_v59 = vmul.f32 %v6454_v58, %v5993_v63 }
 0x2d7   :  { %v4816_v38 = vpop.eup %4815  ;;  %4835 = vrcp.f32 %v2265_v55  ;;  %v6542_v21 = vmul.f32 %v4814_v57, %v4804_v43 }
 0x2d8   :  { %v4818_v49 = vpop.eup %4817  ;;  %4837 = vrcp.f32 %v2309_v15  ;;  %v2377_v26 = vadd.f32 1.0, %v4816_v38  ;;  %v2622_v15 = vrot.slane %v6539_v42, 7 }
 0x2d9   :  { %7569 = vst [vmem:[#allocation69_spill] sm:$0xff] %v6542_v21  ;;  %v4820_v53 = vpop.eup %4819  ;;  %v1510_v40 = vmul.f32 %v4818_v49, %v6497_v45  ;;  %v2504_v41 = vmul.f32 %v6469_v51, %v6542_v21  ;;  %v2548_v43 = vmul.f32 %v6542_v21, %v7553_v1  ;;  %4839 = vpow2.f32 %v4177_v0 }
 0x2da   :  { %v6557_v55 = vpop.eup %4821  ;;  %4841 = vrcp.f32 %v2377_v26  ;;  %v1813_v57 = vadd.f32 1.0, %v4820_v53  ;;  %v2592_v36 = vmul.f32 %v6542_v21, %v5993_v63 }
 0x2db   :  { %v4824_v33 = vpop.eup %4823  ;;  %v1563_v39 = vrot.slane %v1510_v40, %v7546_v16  ;;  %v1780_v45 = vmul.f32 %v1510_v40, %v6004_v24  ;;  %v1824_v38 = vmul.f32 %v1510_v40, %v5930_v44  ;;  %v1868_v49 = vmul.f32 %v1510_v40, %v5950_v32 }
 0x2dc   :  { %v4826_v0 = vpop.eup %4825  ;;  %4843 = vrcp.f32 %v1813_v57  ;;  %v1857_v61 = vadd.f32 1.0, %v4824_v33  ;;  %v1892_v26 = vmul.f32 %v1510_v40, %v5970_v35  ;;  %v2512_v53 = vrot.slane %v2504_v41, 7  ;;  %v7570_v57 = vld [vmem:[#allocation34_spill] sm:$0xff]  ;;  %v7572_v41 = vld [vmem:[#allocation52_spill] sm:$0xff] }
 0x2dd   :  { %v4828_v30 = vpop.eup %4827  ;;  %v1788_v20 = vrot.slane %v1780_v45, 1  ;;  %v1832_v1 = vrot.slane %v1824_v38, 1  ;;  %v1876_v42 = vrot.slane %v1868_v49, 1  ;;  %1579 = vperm.xlu0 %4296, %v1563_v39   ;;  %v2556_v63 = vrot.slane %v2548_v43, 7 }
 0x2de   :  { %v6567_v16 = vpop.eup %4829  ;;  %4845 = vrcp.f32 %v1857_v61  ;;  %v1925_v37 = vadd.f32 1.0, %v4828_v30  ;;  %v1900_v14 = vrot.slane %v1892_v26, 1  ;;  %v2520_v51 = vadd.f32 %v2512_v53, %v5753_v29 }
 0x2df   :  { %v6570_v2 = vpop.eup %4831  ;;  %v1796_v33 = vadd.f32 %v1788_v20, %v7570_v57  ;;  %v1840_v40 = vadd.f32 %v1832_v1, %v7571_v31  ;;  %v1884_v7 = vadd.f32 %v1876_v42, %v7572_v41  ;;  %v2616_v45 = vmul.f32 %v6542_v21, %v6004_v24  ;;  %v635_v20 = vpop.permute.xlu1 %634 }
 0x2e0   :  { %v4834_v39 = vpop.eup %4833  ;;  %4847 = vrcp.f32 %v1925_v37  ;;  %v1908_v43 = vadd.f32 %v1900_v14, %v7557_v3  ;;  %v4175_v61 = vmul.f32 -1.442695, %v2520_v51  ;;  %v2564_v30 = vadd.f32 %v2556_v63, %v5773_v8 }
 0x2e1   :  { %v4836_v38 = vpop.eup %4835  ;;  %v4138_v49 = vmul.f32 -1.442695, %v1796_v33  ;;  %v4142_v26 = vmul.f32 -1.442695, %v1840_v40  ;;  %4849 = vtanh.f32 %v1884_v7  ;;  %v2600_v53 = vrot.slane %v2592_v36, 7 }
 0x2e2   :  { %v4838_v57 = vpop.eup %4837  ;;  %v2405_v1 = vmul.f32 %v4836_v38, %v6530_v28  ;;  %v4146_v42 = vmul.f32 -1.442695, %v1908_v43  ;;  %4851 = vpow2.f32 %v4175_v61  ;;  %v2534_v41 = vadd.f32 1.0, %v4834_v39 }
 0x2e3   :  { %v4840_v31 = vpop.eup %4839  ;;  %v2401_v21 = vmul.f32 %v4838_v57, %v2393_v47  ;;  %4853 = vpow2.f32 %v4138_v49  ;;  %v2624_v37 = vrot.slane %v2616_v45, 7  ;;  %v2630_v14 = vadd.f32 %v2622_v15, %v7537_v60 }
 0x2e4   :  { %v4842_v51 = vpop.eup %4841  ;;  %4855 = vpow2.f32 %v4142_v26  ;;  %v4179_v63 = vmul.f32 -1.442695, %v2564_v30  ;;  %v2578_v33 = vadd.f32 1.0, %v4840_v31  ;;  %v6582_v7 = vmul.f32 %v4826_v0, %v6526_v13  ;;  %v638_v13 = vpop.permute.xlu1 %637 }
 0x2e5   :  { %v6584_v36 = vadd.f32 %v2405_v1, %v2401_v21  ;;  %4857 = vpow2.f32 %v4146_v42  ;;  %v2632_v28 = vadd.f32 %v2624_v37, %v5881_v17  ;;  %v642_v40 = vsel %vm600_vm1, %v635_v20, %v632_v48 }
 0x2e6   :  { %v4844_v39 = vpop.eup %4843  ;;  %4859 = vrcp.f32 %v2534_v41  ;;  %v2608_v47 = vadd.f32 %v2600_v53, %v5886_v9  ;;  %v1941_v15 = vrot.slane %v6336_v10, 1  ;;  %v4181_v57 = vmul.f32 -1.442695, %v2630_v14 }
 0x2e7   :  { %4861 = vtanh.f32 %v6584_v36  ;;  %v1953_v31 = vmul.f32 %v4844_v39, %v6557_v55  ;;  %v4183_v21 = vmul.f32 -1.442695, %v2632_v28  ;;  %v2098_v43 = vrot.slane %v6550_v59, 7  ;;  %v599_v55 = vpop.permute.xlu0 %598 }
 0x2e8   :  { %v4846_v0 = vpop.eup %4845  ;;  %4863 = vpow2.f32 %v4179_v63  ;;  %v7573_v41 = vlaneseq  ;;  %v1940_v59 = vrot.slane %v6339_v5, 1  ;;  %v641_v20 = vpop.permute.xlu1 %640  ;;  %v605_v37 = vsel %vm604_vm3, %v599_v55, %v6545_v23 }
 0x2e9   :  { %v1949_v45 = vmul.f32 %v4846_v0, %v1941_v15  ;;  %4865 = vrcp.f32 %v2578_v33  ;;  %v2106_v53 = vadd.f32 %v2098_v43, %v7547_v52  ;;  %v643_v14 = vsel %vm602_vm2, %v638_v13, %v642_v40  ;;  %v7576_v13 = vld [vmem:[#allocation58_spill] sm:$0xff] }
 0x2ea   :  { %v6593_v48 = vpop.eup %4847  ;;  %4867 = vtanh.f32 %v2608_v47  ;;  %v6596_v61 = vand.u32 127, %v7573_v41  ;;  %v2662_v33 = vrot.slane %v6461_v62, 7  ;;  %v2076_v39 = vadd.f32 1.0, %v6501_v46  ;;  %v7575_v62 = vld [vmem:[#allocation21_spill] sm:$0xff] }
 0x2eb   :  { %v6598_v30 = vpop.eup %4849  ;;  %v6600_v10 = vadd.f32 %v1953_v31, %v1949_v45  ;;  %4869 = vpow2.f32 %v4181_v57  ;;  %v644_v31 = vsel %vm604_vm3, %v641_v20, %v643_v14  ;;  %v1974_v0 = vrot.slane %v7576_v13, %v7575_v62 }
 0x2ec   :  { %7574 = vst [vmem:[#allocation70_spill] sm:$0xff] %v6596_v61  ;;  %v4852_v38 = vpop.eup %4851  ;;  %4871 = vpow2.f32 %v4183_v21  ;;  %vm567_vm4 = vcmp.eq.s32.totalorder %v6596_v61, 0  ;;  %vm609_vm5 = vcmp.eq.s32.totalorder %v6596_v61, 7  ;;  %v1970_v41 = vrot.slane %v6399_v6, %v7575_v62 }
 0x2ed   :  { %v4854_v49 = vpop.eup %4853  ;;  %4873 = vtanh.f32 %v6600_v10  ;;  %v2536_v26 = vadd.f32 1.0, %v4852_v38  ;;  %v607_v23 = vsel %vm567_vm4, %v605_v37, 0.0  ;;  %v646_v40 = vsel %vm609_vm5, %v644_v31, 0.0  ;;  %1991 = vperm.xlu1 %4295, %v1974_v0  }
 0x2ee   :  { %v4856_v1 = vpop.eup %4855  ;;  %v1812_v42 = vadd.f32 1.0, %v4854_v49  ;;  %v6622_v43 = vadd.f32 %v646_v40, %v607_v23  ;;  %v2078_v49 = vadd.f32 1.0, %v6567_v16  ;;  %1988 = vperm.xlu0 %4296, %v1970_v41   ;;  %v6633_v37 = vmul.f32 %v6399_v6, %v6004_v24  ;;  %v7577_v40 = vld [vmem:[#allocation18_spill] sm:$0xff] }
 0x2ef   :  { %v4858_v63 = vpop.eup %4857  ;;  %v1856_v28 = vadd.f32 1.0, %v4856_v1  ;;  %4875 = vrcp.f32 %v2536_v26  ;;  %v4154_v26 = vmul.f32 -1.442695, %v2106_v53  ;;  %v1982_v16 = vrot.slane %v6412_v22, %v7575_v62 }
 0x2f0   :  { %v4860_v47 = vpop.eup %4859  ;;  %4877 = vrcp.f32 %v1812_v42  ;;  %v1924_v15 = vadd.f32 1.0, %v4858_v63  ;;  %v1978_v53 = vrot.slane %v6454_v58, %v7575_v62  ;;  %v2013_v13 = vrot.slane %v6464_v18, %v7577_v40 }
 0x2f1   :  { %v4862_v57 = vpop.eup %4861  ;;  %4879 = vrcp.f32 %v1856_v28  ;;  %v2674_v46 = vmul.f32 %v4860_v47, %v6570_v2  ;;  %1997 = vperm.xlu1 %4295, %v1982_v16   ;;  %vm1058_vm6 = vcmp.eq.s32.totalorder %v6596_v61, 1  ;;  %vm1097_vm7 = vcmp.eq.s32.totalorder %v6596_v61, 6 }
 0x2f2   :  { %v4864_v21 = vpop.eup %4863  ;;  %v6620_v45 = vmul.f32 %v4862_v57, %v4842_v51  ;;  %4881 = vrcp.f32 %v2076_v39  ;;  %1994 = vperm.xlu0 %4296, %v1978_v53   ;;  %vm1512_vm8 = vcmp.eq.s32.totalorder %v6596_v61, 2 }
 0x2f3   :  { %v4866_v55 = vpop.eup %4865  ;;  %v2580_v38 = vadd.f32 1.0, %v4864_v21  ;;  %4883 = vrcp.f32 %v1924_v15  ;;  %v2664_v15 = vrot.slane %v6503_v12, 7 }
 0x2f4   :  { %v4868_v20 = vpop.eup %4867  ;;  %v2670_v1 = vmul.f32 %v4866_v55, %v2662_v33  ;;  %v2690_v2 = vmul.f32 %v6620_v45, %v5950_v32  ;;  %v2734_v51 = vmul.f32 %v6620_v45, %v5970_v35  ;;  %v2778_v31 = vmul.f32 %v6620_v45, %v7560_v19 }
 0x2f5   :  { %v4870_v42 = vpop.eup %4869  ;;  %4885 = vrcp.f32 %v2580_v38  ;;  %v2807_v57 = vmul.f32 %v6478_v54, %v6620_v45  ;;  %2030 = vperm.xlu1 %4295, %v2013_v13  }
 0x2f6   :  { %v4872_v14 = vpop.eup %4871  ;;  %v2646_v63 = vadd.f32 1.0, %v4870_v42  ;;  %v6639_v33 = vadd.f32 %v2674_v46, %v2670_v1  ;;  %v2698_v28 = vrot.slane %v2690_v2, 1  ;;  %v2742_v39 = vrot.slane %v2734_v51, 1 }
 0x2f7   :  { %v4874_v47 = vpop.eup %4873  ;;  %4887 = vrcp.f32 %v2078_v49  ;;  %v2648_v21 = vadd.f32 1.0, %v4872_v14  ;;  %v2009_v46 = vrot.slane %v6582_v7, %v7577_v40  ;;  %v2815_v2 = vrot.slane %v2807_v57, 1 }
 0x2f8   :  { %v1965_v22 = vmul.f32 %v4874_v47, %v6593_v48  ;;  %v2706_v23 = vadd.f32 %v2698_v28, %v5784_v50  ;;  %4889 = vpow2.f32 %v4154_v26  ;;  %v2750_v12 = vadd.f32 %v2742_v39, %v7548_v25 }
 0x2f9   :  { %v4876_v0 = vpop.eup %4875  ;;  %4891 = vrcp.f32 %v2646_v63  ;;  %2027 = vperm.xlu0 %4296, %v2009_v46   ;;  %v2786_v39 = vrot.slane %v2778_v31, 1 }
 0x2fa   :  { %v4878_v41 = vpop.eup %4877  ;;  %v2235_v55 = vmul.f32 %v1965_v22, %v5930_v44  ;;  %v2279_v48 = vmul.f32 %v1965_v22, %v5950_v32  ;;  %v2323_v38 = vmul.f32 %v1965_v22, %v5970_v35  ;;  %v2347_v49 = vmul.f32 %v1965_v22, %v7560_v19 }
 0x2fb   :  { %v4880_v26 = vpop.eup %4879  ;;  %v1952_v18 = vmul.f32 %v4878_v41, %v6598_v30  ;;  %4893 = vtanh.f32 %v6639_v33  ;;  %v4185_v1 = vmul.f32 -1.442695, %v2706_v23  ;;  %v4189_v28 = vmul.f32 -1.442695, %v2750_v12 }
 0x2fc   :  { %v2243_v51 = vrot.slane %v2235_v55, 1  ;;  %v2287_v42 = vrot.slane %v2279_v48, 1  ;;  %v2331_v16 = vrot.slane %v2323_v38, 1  ;;  %v2355_v53 = vrot.slane %v2347_v49, 1  ;;  %v6659_v14 = vpop.eup %4881 }
 0x2fd   :  { %v1948_v63 = vmul.f32 %v4880_v26, %v1940_v59  ;;  %4895 = vpow2.f32 %v4185_v1  ;;  %v6663_v47 = vpop.eup %4883  ;;  %v2676_v46 = vmul.f32 %v4876_v0, %v4868_v20  ;;  %v2021_v5 = vrot.slane %v1965_v22, %v7577_v40 }
 0x2fe   :  { %v2251_v30 = vadd.f32 %v2243_v51, %v7526_v4  ;;  %v2295_v57 = vadd.f32 %v2287_v42, %v7524_v27  ;;  %v2363_v23 = vadd.f32 %v2355_v53, %v7551_v34  ;;  %4897 = vrcp.f32 %v2648_v21  ;;  %v1084_v51 = vpop.permute.xlu1 %1083 }
 0x2ff   :  { %v4886_v13 = vpop.eup %4885  ;;  %v6668_v41 = vadd.f32 %v1952_v18, %v1948_v63  ;;  %4899 = vpow2.f32 %v4189_v28  ;;  %v2339_v31 = vadd.f32 %v2331_v16, %v7565_v11  ;;  %v2823_v12 = vadd.f32 %v2815_v2, %v7523_v56  ;;  %2036 = vperm.xlu1 %4295, %v2021_v5   ;;  %v7580_v18 = vld [vmem:[#allocation51_spill] sm:$0xff] }
 0x300   :  { %v4163_v59 = vmul.f32 -1.442695, %v2251_v30  ;;  %v4167_v55 = vmul.f32 -1.442695, %v2295_v57  ;;  %v2672_v38 = vmul.f32 %v4886_v13, %v2664_v15  ;;  %v4171_v49 = vmul.f32 -1.442695, %v2363_v23  ;;  %v1081_v15 = vpop.permute.xlu0 %1080 }
 0x301   :  { %7578 = vst [vmem:[#allocation21_spill] sm:$0xff] %v6668_v41  ;;  %v6673_v48 = vpop.eup %4887  ;;  %4901 = vtanh.f32 %v6668_v41  ;;  %v2134_v20 = vmul.f32 %v6454_v58, %v6004_v24  ;;  %v2156_v22 = vmul.f32 %v6399_v6, %v5930_v44  ;;  %v2794_v1 = vadd.f32 %v2786_v39, %v7580_v18  ;;  %v7581_v6 = vld [vmem:[#allocation64_spill] sm:$0xff]  ;;  %v7588_v18 = vld [vmem:[#allocation25_spill] sm:$0xff] }
 0x302   :  { %v4890_v21 = vpop.eup %4889  ;;  %4903 = vpow2.f32 %v4163_v59  ;;  %v6680_v26 = vadd.f32 %v2676_v46, %v2672_v38  ;;  %v2140_v2 = vrot.slane %v6633_v37, 7  ;;  %v4193_v42 = vmul.f32 -1.442695, %v2823_v12  ;;  %v7583_v38 = vld [vmem:[#allocation60_spill] sm:$0xff] }
 0x303   :  { %v4892_v0 = vpop.eup %4891  ;;  %4905 = vpow2.f32 %v4167_v55  ;;  %v2158_v16 = vmul.f32 %v6454_v58, %v5930_v44  ;;  %v1091_v53 = vsel %vm600_vm1, %v1084_v51, %v1081_v15  ;;  %v2120_v28 = vadd.f32 1.0, %v7581_v6  ;;  %v7582_v58 = vld [vmem:[#allocation40_spill] sm:$0xff]  ;;  %v7586_v15 = vld [vmem:[#allocation62_spill] sm:$0xff] }
 0x304   :  { %7579 = vst [vmem:[#allocation58_spill] sm:$0xff] %v6680_v26  ;;  %4907 = vtanh.f32 %v2339_v31  ;;  %v2142_v39 = vrot.slane %v2134_v20, 7  ;;  %v2164_v57 = vrot.slane %v2156_v22, 7  ;;  %v2122_v23 = vadd.f32 1.0, %v4890_v21  ;;  %v1087_v13 = vpop.permute.xlu0 %1086  ;;  %v1090_v31 = vpop.permute.xlu1 %1089  ;;  %v7584_v20 = vld [vmem:[#allocation42_spill] sm:$0xff] }
 0x305   :  { %v4894_v63 = vpop.eup %4893  ;;  %4909 = vtanh.f32 %v6680_v26  ;;  %v2148_v59 = vadd.f32 %v2140_v2, %v7582_v58  ;;  %v2166_v55 = vrot.slane %v2158_v16, 7  ;;  %v7587_v6 = vld [vmem:[#allocation46_spill] sm:$0xff] }
 0x306   :  { %4911 = vpow2.f32 %v4171_v49  ;;  %v6689_v30 = vmul.f32 %v4894_v63, %v4892_v0  ;;  %v1092_v49 = vsel %vm602_vm2, %v1087_v13, %v1091_v53  ;;  %v2150_v22 = vadd.f32 %v2142_v39, %v7584_v20  ;;  %v7585_v0 = vld [vmem:[#allocation44_spill] sm:$0xff] }
 0x307   :  { %v4896_v37 = vpop.eup %4895  ;;  %4913 = vtanh.f32 %v2794_v1  ;;  %v2172_v21 = vadd.f32 %v2164_v57, %v7585_v0  ;;  %v6700_v2 = vsel %vm604_vm3, %v1090_v31, %v1092_v49 }
 0x308   :  { %v4898_v46 = vpop.eup %4897  ;;  %v2722_v5 = vadd.f32 1.0, %v4896_v37  ;;  %4915 = vpow2.f32 %v4193_v42  ;;  %v2964_v51 = vmul.f32 %v7583_v38, %v6689_v30  ;;  %v3008_v42 = vmul.f32 %v6689_v30, %v7586_v15 }
 0x309   :  { %v4900_v12 = vpop.eup %4899  ;;  %4917 = vrcp.f32 %v2120_v28  ;;  %v2174_v28 = vadd.f32 %v2166_v55, %v7587_v6 }
 0x30a   :  { %4919 = vrcp.f32 %v2722_v5  ;;  %v2766_v63 = vadd.f32 1.0, %v4900_v12  ;;  %v2972_v13 = vrot.slane %v2964_v51, 7  ;;  %v4156_v12 = vmul.f32 -1.442695, %v2172_v21 }
 0x30b   :  { %v4902_v1 = vpop.eup %4901  ;;  %4921 = vrcp.f32 %v2122_v23  ;;  %v3016_v23 = vrot.slane %v3008_v42, 7  ;;  %v7590_v42 = vld [vmem:[#allocation29_spill] sm:$0xff] }
 0x30c   :  { %v4904_v16 = vpop.eup %4903  ;;  %4923 = vtanh.f32 %v2148_v59  ;;  %v6704_v39 = vmul.f32 %v4902_v1, %v6663_v47  ;;  %v4158_v59 = vmul.f32 -1.442695, %v2174_v28 }
 0x30d   :  { %v4906_v37 = vpop.eup %4905  ;;  %v2267_v53 = vadd.f32 1.0, %v4904_v16  ;;  %4925 = vrcp.f32 %v2766_v63  ;;  %v2980_v16 = vadd.f32 %v2972_v13, %v7588_v18  ;;  %v7589_v63 = vld [vmem:[#allocation57_spill] sm:$0xff]  ;;  %v3024_v21 = vadd.f32 %v3016_v23, %v7590_v42 }
 0x30e   :  { %v4908_v57 = vpop.eup %4907  ;;  %v2311_v5 = vadd.f32 1.0, %v4906_v37  ;;  %4927 = vtanh.f32 %v2150_v22  ;;  %v2017_v51 = vrot.slane %v6704_v39, %v7577_v40  ;;  %v2204_v37 = vrot.slane %v7589_v63, 7 }
 0x30f   :  { %v4910_v41 = vpop.eup %4909  ;;  %4929 = vrcp.f32 %v2267_v53  ;;  %v4197_v18 = vmul.f32 -1.442695, %v2980_v16  ;;  %v4201_v23 = vmul.f32 -1.442695, %v3024_v21  ;;  %v2395_v42 = vrot.slane %v6600_v10, 1  ;;  %v1123_v10 = vpop.permute.xlu1 %1122 }
 0x310   :  { %v4912_v31 = vpop.eup %4911  ;;  %4931 = vrcp.f32 %v2311_v5  ;;  %v6706_v49 = vmul.f32 %v4910_v41, %v4898_v46  ;;  %2033 = vperm.xlu0 %4296, %v2017_v51   ;;  %v7591_v46 = vld [vmem:[#allocation61_spill] sm:$0xff]  ;;  %v2855_v5 = vrot.slane %v6584_v36, 1  ;;  %v7592_v51 = vld [vmem:[#allocation59_spill] sm:$0xff] }
 0x311   :  { %v4914_v55 = vpop.eup %4913  ;;  %4933 = vpow2.f32 %v4156_v12  ;;  %v2206_v28 = vrot.slane %v7591_v46, 7  ;;  %v3076_v46 = vmul.f32 %v6689_v30, %v7592_v51  ;;  %v7593_v36 = vld [vmem:[#allocation55_spill] sm:$0xff] }
 0x312   :  { %v4916_v47 = vpop.eup %4915  ;;  %v2966_v1 = vmul.f32 %v7583_v38, %v6706_v49  ;;  %4935 = vpow2.f32 %v4158_v59  ;;  %v2379_v59 = vadd.f32 1.0, %v4912_v31  ;;  %v3052_v16 = vmul.f32 %v6689_v30, %v7593_v36 }
 0x313   :  { %v4918_v22 = vpop.eup %4917  ;;  %v2839_v3 = vadd.f32 1.0, %v4916_v47  ;;  %4937 = vpow2.f32 %v4197_v18 }
 0x314   :  { %v4920_v41 = vpop.eup %4919  ;;  %v2974_v53 = vrot.slane %v2966_v1, 7  ;;  %v2212_v25 = vmul.f32 %v4918_v22, %v2204_v37 }
 0x315   :  { %v4922_v13 = vpop.eup %4921  ;;  %v2867_v26 = vmul.f32 %v4920_v41, %v4914_v55  ;;  %v3010_v55 = vmul.f32 %v6706_v49, %v7586_v15  ;;  %4939 = vrcp.f32 %v2839_v3  ;;  %v3054_v3 = vmul.f32 %v6706_v49, %v7593_v36 }
 0x316   :  { %v4924_v50 = vpop.eup %4923  ;;  %v2982_v38 = vadd.f32 %v2974_v53, %v5753_v29  ;;  %v2214_v63 = vmul.f32 %v4922_v13, %v2206_v28  ;;  %4941 = vpow2.f32 %v4201_v23 }
 0x317   :  { %v4926_v56 = vpop.eup %4925  ;;  %v2216_v12 = vmul.f32 %v4924_v50, %v6659_v14  ;;  %v1120_v50 = vpop.permute.xlu0 %1119  ;;  %v3018_v18 = vrot.slane %v3010_v55, 7 }
 0x318   :  { %v4928_v1 = vpop.eup %4927  ;;  %v2863_v22 = vmul.f32 %v4926_v56, %v2855_v5  ;;  %v4199_v28 = vmul.f32 -1.442695, %v2982_v38  ;;  %v3084_v56 = vrot.slane %v3076_v46, 7  ;;  %v3078_v5 = vmul.f32 %v6706_v49, %v7592_v51 }
 0x319   :  { %v4930_v37 = vpop.eup %4929  ;;  %v2218_v47 = vmul.f32 %v4928_v1, %v6673_v48  ;;  %v6727_v21 = vadd.f32 %v2216_v12, %v2212_v25  ;;  %v1095_v46 = vsel %vm1058_vm6, %v6700_v2, 0.0  ;;  %v1130_v1 = vsel %vm600_vm1, %v1123_v10, %v1120_v50  ;;  %v7596_v2 = vld [vmem:[#allocation41_spill] sm:$0xff] }
 0x31a   :  { %v4932_v14 = vpop.eup %4931  ;;  %v2407_v41 = vmul.f32 %v4930_v37, %v4908_v57  ;;  %v6729_v31 = vadd.f32 %v2867_v26, %v2863_v22  ;;  %v2276_v57 = vmul.f32 %v6582_v7, %v5950_v32  ;;  %v3026_v22 = vadd.f32 %v3018_v18, %v5773_v8 }
 0x31b   :  { %v2403_v53 = vmul.f32 %v4932_v14, %v2395_v42  ;;  %v6731_v13 = vadd.f32 %v2218_v47, %v2214_v63  ;;  %v4934_v48 = vpop.eup %4933  ;;  %v3060_v42 = vrot.slane %v3052_v16, 7  ;;  %v3092_v63 = vadd.f32 %v3084_v56, %v7537_v60  ;;  %v1126_v23 = vpop.permute.xlu0 %1125  ;;  %v7595_v47 = vld [vmem:[#allocation65_spill] sm:$0xff] }
 0x31c   :  { %7594 = vst [vmem:[#allocation18_spill] sm:$0xff] %v6729_v31  ;;  %4943 = vtanh.f32 %v6729_v31  ;;  %v4936_v26 = vpop.eup %4935  ;;  %v2188_v38 = vadd.f32 1.0, %v4934_v48  ;;  %v3062_v37 = vrot.slane %v3054_v3, 7  ;;  %v1096_v16 = vadd.f32 %v1095_v46, %v6622_v43 }
 0x31d   :  { %4945 = vrcp.f32 %v2379_v59  ;;  %v6735_v25 = vadd.f32 %v2407_v41, %v2403_v53  ;;  %v2190_v12 = vadd.f32 1.0, %v4936_v26  ;;  %v1129_v59 = vpop.permute.xlu1 %1128  ;;  %v1131_v55 = vsel %vm602_vm2, %v1126_v23, %v1130_v1  ;;  %v4938_v41 = vpop.eup %4937 }
 0x31e   :  { %4947 = vpow2.f32 %v4199_v28  ;;  %v2427_v14 = vrot.slane %v7595_v47, %v7577_v40  ;;  %v3068_v28 = vadd.f32 %v3060_v42, %v7596_v2  ;;  %v3086_v50 = vrot.slane %v3078_v5, 7  ;;  %v7597_v42 = vld [vmem:[#allocation69_spill] sm:$0xff] }
 0x31f   :  { %4949 = vtanh.f32 %v6735_v25  ;;  %v1132_v10 = vsel %vm604_vm3, %v1129_v59, %v1131_v55  ;;  %v4940_v53 = vpop.eup %4939  ;;  %v4205_v56 = vmul.f32 -1.442695, %v3092_v63  ;;  %v3070_v18 = vadd.f32 %v3062_v37, %v5886_v9 }
 0x320   :  { %4951 = vtanh.f32 %v6727_v21  ;;  %v1134_v43 = vsel %vm1097_vm7, %v1132_v10, 0.0  ;;  %2444 = vperm.xlu1 %4295, %v2427_v14   ;;  %v4942_v48 = vpop.eup %4941  ;;  %v2284_v3 = vrot.slane %v2276_v57, 1  ;;  %v4203_v23 = vmul.f32 -1.442695, %v3026_v22  ;;  %v7598_v57 = vld [vmem:[#allocation35_spill] sm:$0xff] }
 0x321   :  { %4953 = vtanh.f32 %v6731_v13  ;;  %v6762_v26 = vadd.f32 %v1134_v43, %v1096_v16  ;;  %v2435_v5 = vrot.slane %v7597_v42, %v7577_v40  ;;  %v2996_v1 = vadd.f32 1.0, %v4938_v41  ;;  %v1538_v29 = vpop.permute.xlu1 %1537 }
 0x322   :  { %4955 = vrcp.f32 %v2188_v38  ;;  %v3094_v63 = vadd.f32 %v3086_v50, %v5881_v17  ;;  %v3040_v37 = vadd.f32 1.0, %v4942_v48  ;;  %v2292_v16 = vadd.f32 %v2284_v3, %v7598_v57  ;;  %v7602_v57 = vld [vmem:[#allocation28_spill] sm:$0xff] }
 0x323   :  { %4957 = vrcp.f32 %v2190_v12  ;;  %v2465_v14 = vrot.slane %v6620_v45, %v7575_v62 }
 0x324   :  { %4959 = vtanh.f32 %v3068_v28  ;;  %2450 = vperm.xlu1 %4295, %v2435_v5   ;;  %v4207_v28 = vmul.f32 -1.442695, %v3094_v63  ;;  %v4164_v45 = vmul.f32 -1.442695, %v2292_v16 }
 0x325   :  { %4961 = vpow2.f32 %v4205_v56 }
 0x326   :  { %v4944_v38 = vpop.eup %4943  ;;  %4963 = vtanh.f32 %v3070_v18 }
 0x327   :  { %v4946_v46 = vpop.eup %4945  ;;  %v6766_v59 = vmul.f32 %v4944_v38, %v4940_v53  ;;  %4965 = vpow2.f32 %v4203_v23 }
 0x328   :  { %v4948_v12 = vpop.eup %4947  ;;  %4967 = vrcp.f32 %v2996_v1  ;;  %2482 = vperm.xlu1 %4295, %v2465_v14   ;;  %v6788_v1 = vmul.f32 %v6582_v7, %v5930_v44 }
 0x329   :  { %v4950_v55 = vpop.eup %4949  ;;  %v2998_v10 = vadd.f32 1.0, %v4948_v12  ;;  %4969 = vrcp.f32 %v3040_v37 }
 0x32a   :  { %v4952_v47 = vpop.eup %4951  ;;  %v6770_v22 = vmul.f32 %v4950_v55, %v4946_v46  ;;  %4971 = vpow2.f32 %v4207_v28  ;;  %v3124_v55 = vrot.slane %v6639_v33, 7 }
 0x32b   :  { %v4954_v41 = vpop.eup %4953  ;;  %4973 = vrcp.f32 %v2998_v10 }
 0x32c   :  { %v4956_v50 = vpop.eup %4955  ;;  %v2692_v53 = vmul.f32 %v6770_v22, %v5950_v32  ;;  %v2736_v56 = vmul.f32 %v6770_v22, %v5970_v35  ;;  %v2780_v43 = vmul.f32 %v6770_v22, %v7560_v19  ;;  %v2809_v48 = vmul.f32 %v6478_v54, %v6770_v22 }
 0x32d   :  { %v6782_v18 = vmul.f32 %v4956_v50, %v4952_v47  ;;  %v4958_v3 = vpop.eup %4957  ;;  %4975 = vpow2.f32 %v4164_v45 }
 0x32e   :  { %v2700_v38 = vrot.slane %v2692_v53, 1  ;;  %v2744_v23 = vrot.slane %v2736_v56, 1  ;;  %v2788_v42 = vrot.slane %v2780_v43, 1  ;;  %v2817_v5 = vrot.slane %v2809_v48, 1  ;;  %v4960_v37 = vpop.eup %4959 }
 0x32f   :  { %v6784_v46 = vmul.f32 %v4958_v3, %v4954_v41  ;;  %v2501_v16 = vmul.f32 %v7586_v15, %v6782_v18  ;;  %v2545_v14 = vmul.f32 %v6782_v18, %v7593_v36  ;;  %v6799_v41 = vpop.eup %4961  ;;  %v2589_v45 = vmul.f32 %v6782_v18, %v7592_v51 }
 0x330   :  { %v2708_v63 = vadd.f32 %v2700_v38, %v7526_v4  ;;  %v2752_v12 = vadd.f32 %v2744_v23, %v7524_v27  ;;  %v2796_v50 = vadd.f32 %v2788_v42, %v7565_v11  ;;  %v2825_v53 = vadd.f32 %v2817_v5, %v7551_v34  ;;  %v6803_v33 = vpop.eup %4963 }
 0x331   :  { %v2503_v47 = vmul.f32 %v7586_v15, %v6784_v46  ;;  %v2509_v56 = vrot.slane %v2501_v16, 7  ;;  %v2547_v48 = vmul.f32 %v6784_v46, %v7593_v36  ;;  %v2553_v3 = vrot.slane %v2545_v14, 7  ;;  %v6807_v38 = vpop.eup %4965  ;;  %v7600_v16 = vld [vmem:[#allocation26_spill] sm:$0xff]  ;;  %v7601_v14 = vld [vmem:[#allocation63_spill] sm:$0xff] }
 0x332   :  { %v4187_v10 = vmul.f32 -1.442695, %v2708_v63  ;;  %v4191_v28 = vmul.f32 -1.442695, %v2752_v12  ;;  %v2591_v23 = vmul.f32 %v6784_v46, %v7592_v51  ;;  %v2613_v42 = vmul.f32 %v6782_v18, %v6004_v24  ;;  %v4968_v5 = vpop.eup %4967  ;;  %v7599_v63 = vld [vmem:[#allocation24_spill] sm:$0xff] }
 0x333   :  { %v2511_v43 = vrot.slane %v2503_v47, 7  ;;  %v2517_v12 = vadd.f32 %v2509_v56, %v7599_v63  ;;  %v2555_v31 = vrot.slane %v2547_v48, 7  ;;  %v2561_v17 = vadd.f32 %v2553_v3, %v7602_v57  ;;  %v4970_v60 = vpop.eup %4969 }
 0x334   :  { %4977 = vpow2.f32 %v4187_v10  ;;  %v6819_v10 = vmul.f32 %v7601_v14, %v6766_v59  ;;  %v2597_v11 = vrot.slane %v2589_v45, 7  ;;  %v4195_v56 = vmul.f32 -1.442695, %v2825_v53 }
 0x335   :  { %4979 = vpow2.f32 %v4191_v28  ;;  %v2519_v47 = vadd.f32 %v2511_v43, %v7600_v16  ;;  %v4172_v27 = vmul.f32 -1.442695, %v2517_v12  ;;  %v2563_v4 = vadd.f32 %v2555_v31, %v7547_v52 }
 0x336   :  { %4981 = vtanh.f32 %v2796_v50  ;;  %v2615_v28 = vmul.f32 %v6784_v46, %v6004_v24  ;;  %v4176_v8 = vmul.f32 -1.442695, %v2561_v17  ;;  %v2599_v43 = vrot.slane %v2591_v23, 7  ;;  %v6825_v50 = vpop.eup %4971  ;;  %v1535_v24 = vpop.permute.xlu0 %1534 }
 0x337   :  { %v4174_v9 = vmul.f32 -1.442695, %v2519_v47  ;;  %v2621_v48 = vrot.slane %v2613_v42, 7  ;;  %4983 = vpow2.f32 %v4172_v27  ;;  %v4178_v34 = vmul.f32 -1.442695, %v2563_v4  ;;  %v6828_v45 = vpop.eup %4973  ;;  %v1544_v23 = vpop.permute.xlu1 %1543 }
 0x338   :  { %v2605_v2 = vadd.f32 %v2597_v11, %v7582_v58  ;;  %v2623_v3 = vrot.slane %v2615_v28, 7  ;;  %v3132_v31 = vmul.f32 %v4970_v60, %v3124_v55  ;;  %v3136_v47 = vmul.f32 %v4968_v5, %v4960_v37  ;;  %v6831_v53 = vpop.eup %4975 }
 0x339   :  { %4985 = vpow2.f32 %v4174_v9  ;;  %v2629_v12 = vadd.f32 %v2621_v48, %v7585_v0  ;;  %v2607_v27 = vadd.f32 %v2599_v43, %v7584_v20  ;;  %v2234_v9 = vmul.f32 %v6704_v39, %v5930_v44 }
 0x33a   :  { %4987 = vpow2.f32 %v4176_v8  ;;  %v2631_v17 = vadd.f32 %v2623_v3, %v7587_v6  ;;  %v6835_v4 = vadd.f32 %v3136_v47, %v3132_v31  ;;  %v2240_v11 = vrot.slane %v6788_v1, 1  ;;  %v7605_v47 = vld [vmem:[#allocation47_spill] sm:$0xff] }
 0x33b   :  { %4989 = vpow2.f32 %v4178_v34  ;;  %v3277_v55 = vrot.slane %v6819_v10, 1  ;;  %v4180_v37 = vmul.f32 -1.442695, %v2629_v12  ;;  %v2423_v8 = vrot.slane %v6782_v18, %v7577_v40  ;;  %v1541_v34 = vpop.permute.xlu0 %1540 }
 0x33c   :  { %7603 = vst [vmem:[#allocation64_spill] sm:$0xff] %v6835_v4  ;;  %4991 = vpow2.f32 %v4195_v56  ;;  %v4182_v28 = vmul.f32 -1.442695, %v2631_v17  ;;  %v2473_v56 = vrot.slane %v6770_v22, %v7575_v62  ;;  %v1545_v44 = vsel %vm600_vm1, %v1538_v29, %v1535_v24 }
 0x33d   :  { %4993 = vtanh.f32 %v2605_v2  ;;  %2441 = vperm.xlu0 %4296, %v2423_v8   ;;  %v1546_v2 = vsel %vm602_vm2, %v1541_v34, %v1545_v44  ;;  %v3042_v18 = vadd.f32 1.0, %v6807_v38  ;;  %v2242_v10 = vrot.slane %v2234_v9, 1 }
 0x33e   :  { %v4978_v60 = vpop.eup %4977  ;;  %4995 = vtanh.f32 %v2607_v27  ;;  %2488 = vperm.xlu1 %4295, %v2473_v56   ;;  %v1547_v48 = vsel %vm604_vm3, %v1544_v23, %v1546_v2  ;;  %v2278_v22 = vmul.f32 %v6704_v39, %v5950_v32  ;;  %v2431_v29 = vrot.slane %v6784_v46, %v7577_v40  ;;  %v7607_v40 = vld [vmem:[#allocation34_spill] sm:$0xff] }
 0x33f   :  { %v4980_v42 = vpop.eup %4979  ;;  %v2724_v5 = vadd.f32 1.0, %v4978_v60  ;;  %v1549_v3 = vsel %vm1512_vm8, %v1547_v48, 0.0  ;;  %v3285_v24 = vadd.f32 %v3277_v55, %v7605_v47  ;;  %v7606_v60 = vld [vmem:[#allocation32_spill] sm:$0xff]  ;;  %v2250_v46 = vadd.f32 %v2242_v10, %v7607_v40 }
 0x340   :  { %v4982_v43 = vpop.eup %4981  ;;  %v2768_v1 = vadd.f32 1.0, %v4980_v42  ;;  %v6857_v31 = vadd.f32 %v1549_v3, %v6762_v26  ;;  %v2248_v8 = vadd.f32 %v2240_v11, %v7606_v60  ;;  %v2286_v26 = vrot.slane %v2278_v22, 1  ;;  %v7608_v11 = vld [vmem:[#allocation37_spill] sm:$0xff]  ;;  %v7609_v3 = vld [vmem:[#allocation19_spill] sm:$0xff] }
 0x341   :  { %4997 = vrcp.f32 %v2724_v5  ;;  %v4984_v12 = vpop.eup %4983  ;;  %2447 = vperm.xlu0 %4296, %v2431_v29   ;;  %v4217_v56 = vmul.f32 -1.442695, %v3285_v24  ;;  %v2857_v10 = vrot.slane %v6735_v25, 1  ;;  %v2308_v29 = vadd.f32 1.0, %v6831_v53 }
 0x342   :  { %4999 = vrcp.f32 %v2768_v1  ;;  %7604 = vst [vmem:[#allocation40_spill] sm:$0xff] %v6857_v31  ;;  %v2533_v17 = vadd.f32 1.0, %v4984_v12  ;;  %v4162_v1 = vmul.f32 -1.442695, %v2250_v46  ;;  %v2294_v2 = vadd.f32 %v2286_v26, %v7608_v11 }
 0x343   :  { %5001 = vpow2.f32 %v4180_v37  ;;  %v4986_v38 = vpop.eup %4985  ;;  %v3108_v37 = vadd.f32 1.0, %v6799_v41  ;;  %v2889_v12 = vrot.slane %v6689_v30, %v7609_v3  ;;  %v3138_v25 = vmul.f32 %v6828_v45, %v6803_v33 }
 0x344   :  { %5003 = vpow2.f32 %v4182_v28  ;;  %v4988_v27 = vpop.eup %4987  ;;  %v2535_v9 = vadd.f32 1.0, %v4986_v38  ;;  %v4160_v28 = vmul.f32 -1.442695, %v2248_v8  ;;  %v4166_v8 = vmul.f32 -1.442695, %v2294_v2 }
 0x345   :  { %5005 = vrcp.f32 %v3042_v18  ;;  %v4990_v23 = vpop.eup %4989  ;;  %v2577_v34 = vadd.f32 1.0, %v4988_v27  ;;  %v7610_v27 = vld [vmem:[#allocation58_spill] sm:$0xff]  ;;  %2906 = vperm.xlu1 %4295, %v2889_v12   ;;  %v3110_v53 = vadd.f32 1.0, %v6825_v50  ;;  %v2344_v30 = vmul.f32 %v6582_v7, %v7560_v19 }
 0x346   :  { %5007 = vrcp.f32 %v2533_v17  ;;  %v4992_v42 = vpop.eup %4991  ;;  %v2579_v5 = vadd.f32 1.0, %v4990_v23  ;;  %v2897_v33 = vrot.slane %v6706_v49, %v7609_v3  ;;  %v2320_v49 = vmul.f32 %v6582_v7, %v5970_v35 }
 0x347   :  { %5009 = vrcp.f32 %v2535_v9  ;;  %v4994_v55 = vpop.eup %4993  ;;  %v2841_v48 = vadd.f32 1.0, %v4992_v42  ;;  %v3126_v9 = vrot.slane %v7610_v27, 7  ;;  %v2663_v42 = vrot.slane %v6731_v13, 7 }
 0x348   :  { %5011 = vrcp.f32 %v2577_v34  ;;  %v4996_v44 = vpop.eup %4995  ;;  %v2661_v34 = vrot.slane %v6727_v21, 7  ;;  %v2346_v13 = vmul.f32 %v6704_v39, %v7560_v19  ;;  %v3152_v7 = vmul.f32 %v6766_v59, %v5970_v35 }
 0x349   :  { %5013 = vrcp.f32 %v2579_v5  ;;  %2912 = vperm.xlu1 %4295, %v2897_v33  }
 0x34a   :  { %5015 = vrcp.f32 %v3108_v37 }
 0x34b   :  { %v4998_v18 = vpop.eup %4997  ;;  %5017 = vtanh.f32 %v6835_v4 }
 0x34c   :  { %v5000_v41 = vpop.eup %4999  ;;  %v2869_v22 = vmul.f32 %v4998_v18, %v4982_v43  ;;  %5019 = vpow2.f32 %v4217_v56 }
 0x34d   :  { %v5002_v38 = vpop.eup %5001  ;;  %v2865_v24 = vmul.f32 %v5000_v41, %v2857_v10  ;;  %5021 = vpow2.f32 %v4160_v28 }
 0x34e   :  { %v5004_v17 = vpop.eup %5003  ;;  %5023 = vpow2.f32 %v4162_v1  ;;  %v2645_v26 = vadd.f32 1.0, %v5002_v38 }
 0x34f   :  { %v5006_v46 = vpop.eup %5005  ;;  %5025 = vrcp.f32 %v2841_v48  ;;  %v6872_v43 = vadd.f32 %v2869_v22, %v2865_v24  ;;  %v2647_v50 = vadd.f32 1.0, %v5004_v17  ;;  %v2322_v22 = vmul.f32 %v6704_v39, %v5970_v35 }
 0x350   :  { %v5008_v23 = vpop.eup %5007  ;;  %v3134_v37 = vmul.f32 %v5006_v46, %v3126_v9  ;;  %5027 = vrcp.f32 %v2308_v29  ;;  %v2352_v29 = vrot.slane %v2344_v30, 1  ;;  %v3196_v9 = vmul.f32 %v6766_v59, %v7560_v19  ;;  %v7614_v46 = vld [vmem:[#allocation68_spill] sm:$0xff] }
 0x351   :  { %7611 = vst [vmem:[#allocation42_spill] sm:$0xff] %v6872_v43  ;;  %v5010_v45 = vpop.eup %5009  ;;  %5029 = vtanh.f32 %v6872_v43  ;;  %v2673_v5 = vmul.f32 %v5008_v23, %v4994_v55  ;;  %v7613_v55 = vld [vmem:[#allocation20_spill] sm:$0xff]  ;;  %v2328_v39 = vrot.slane %v2320_v49, 1  ;;  %v2330_v23 = vrot.slane %v2322_v22, 1 }
 0x352   :  { %v5012_v56 = vpop.eup %5011  ;;  %v2675_v28 = vmul.f32 %v5010_v45, %v4996_v44  ;;  %v6882_v1 = vadd.f32 %v3138_v25, %v3134_v37  ;;  %5031 = vpow2.f32 %v4166_v8  ;;  %v2927_v44 = vrot.slane %v6766_v59, %v7613_v55  ;;  %v7615_v45 = vld [vmem:[#allocation43_spill] sm:$0xff] }
 0x353   :  { %v5014_v21 = vpop.eup %5013  ;;  %v2669_v2 = vmul.f32 %v5012_v56, %v2661_v34  ;;  %5033 = vrcp.f32 %v3110_v53  ;;  %v2354_v25 = vrot.slane %v2346_v13, 1  ;;  %v2392_v53 = vrot.slane %v7614_v46, 1 }
 0x354   :  { %7612 = vst [vmem:[#allocation62_spill] sm:$0xff] %v6882_v1  ;;  %v5016_v18 = vpop.eup %5015  ;;  %v2671_v10 = vmul.f32 %v5014_v21, %v2663_v42  ;;  %5035 = vtanh.f32 %v6882_v1  ;;  %2944 = vperm.xlu1 %4295, %v2927_v44   ;;  %v3160_v37 = vrot.slane %v3152_v7, 1  ;;  %v3204_v21 = vrot.slane %v3196_v9, 1  ;;  %v7618_v44 = vld [vmem:[#allocation52_spill] sm:$0xff] }
 0x355   :  { %v5018_v48 = vpop.eup %5017  ;;  %5037 = vrcp.f32 %v2645_v26  ;;  %v6891_v41 = vadd.f32 %v2673_v5, %v2669_v2  ;;  %v2360_v26 = vadd.f32 %v2352_v29, %v7615_v45  ;;  %v7616_v2 = vld [vmem:[#allocation48_spill] sm:$0xff] }
 0x356   :  { %v5020_v12 = vpop.eup %5019  ;;  %5039 = vrcp.f32 %v2647_v50  ;;  %v6897_v38 = vadd.f32 %v2675_v28, %v2671_v10  ;;  %v6899_v24 = vmul.f32 %v5018_v48, %v5016_v18  ;;  %v2336_v49 = vadd.f32 %v2328_v39, %v7616_v2  ;;  %v7617_v18 = vld [vmem:[#allocation54_spill] sm:$0xff]  ;;  %v7620_v9 = vld [vmem:[#allocation36_spill] sm:$0xff] }
 0x357   :  { %v5022_v17 = vpop.eup %5021  ;;  %5041 = vtanh.f32 %v6891_v41  ;;  %v3301_v30 = vadd.f32 1.0, %v5020_v12  ;;  %v2362_v10 = vadd.f32 %v2354_v25, %v7617_v18  ;;  %v2338_v48 = vadd.f32 %v2330_v23, %v7618_v44  ;;  %v7619_v12 = vld [vmem:[#allocation33_spill] sm:$0xff]  ;;  %v7621_v23 = vld [vmem:[#allocation66_spill] sm:$0xff] }
 0x358   :  { %v5024_v27 = vpop.eup %5023  ;;  %5043 = vtanh.f32 %v6897_v38  ;;  %v2264_v33 = vadd.f32 1.0, %v5022_v17  ;;  %v3168_v7 = vadd.f32 %v3160_v37, %v7619_v12  ;;  %v4168_v29 = vmul.f32 -1.442695, %v2360_v26 }
 0x359   :  { %v5026_v8 = vpop.eup %5025  ;;  %v2266_v5 = vadd.f32 1.0, %v5024_v27  ;;  %5045 = vrcp.f32 %v3301_v30  ;;  %v3240_v39 = vmul.f32 %v6766_v59, %v6478_v54  ;;  %v4170_v25 = vmul.f32 -1.442695, %v2362_v10 }
 0x35a   :  { %v5028_v34 = vpop.eup %5027  ;;  %5047 = vrcp.f32 %v2264_v33  ;;  %v4209_v33 = vmul.f32 -1.442695, %v3168_v7 }
 0x35b   :  { %v5030_v42 = vpop.eup %5029  ;;  %v6907_v56 = vmul.f32 %v5028_v34, %v2392_v53  ;;  %5049 = vrcp.f32 %v2266_v5  ;;  %v3212_v53 = vadd.f32 %v3204_v21, %v7620_v9  ;;  %v3426_v34 = vmul.f32 %v7621_v23, %v6899_v24  ;;  %v7624_v21 = vld [vmem:[#allocation60_spill] sm:$0xff] }
 0x35c   :  { %v5032_v50 = vpop.eup %5031  ;;  %v6909_v28 = vmul.f32 %v5030_v42, %v5026_v8  ;;  %5051 = vtanh.f32 %v2336_v49  ;;  %v3514_v5 = vmul.f32 %v6899_v24, %v7586_v15  ;;  %v3248_v59 = vrot.slane %v3240_v39, 1 }
 0x35d   :  { %v5034_v13 = vpop.eup %5033  ;;  %v2310_v8 = vadd.f32 1.0, %v5032_v50  ;;  %5053 = vtanh.f32 %v2338_v48  ;;  %v4213_v50 = vmul.f32 -1.442695, %v3212_v53 }
 0x35e   :  { %v5036_v22 = vpop.eup %5035  ;;  %5055 = vpow2.f32 %v4168_v29 }
 0x35f   :  { %v5038_v17 = vpop.eup %5037  ;;  %v6915_v27 = vmul.f32 %v5036_v22, %v5034_v13  ;;  %5057 = vrcp.f32 %v2310_v8  ;;  %v3434_v22 = vrot.slane %v3426_v34, 7 }
 0x360   :  { %v5040_v46 = vpop.eup %5039  ;;  %5059 = vpow2.f32 %v4170_v25  ;;  %v3522_v25 = vrot.slane %v3514_v5, 7 }
 0x361   :  { %v5042_v30 = vpop.eup %5041  ;;  %5061 = vpow2.f32 %v4209_v33 }
 0x362   :  { %v5044_v37 = vpop.eup %5043  ;;  %v6922_v26 = vmul.f32 %v5042_v30, %v5038_v17  ;;  %v3428_v17 = vmul.f32 %v7621_v23, %v6915_v27  ;;  %5063 = vpow2.f32 %v4213_v50 }
 0x363   :  { %v6924_v42 = vmul.f32 %v5044_v37, %v5040_v46  ;;  %v6940_v8 = vpop.eup %5045 }
 0x364   :  { %7622 = vst [vmem:[#allocation46_spill] sm:$0xff] %v6922_v26  ;;  %v2963_v49 = vmul.f32 %v7624_v21, %v6922_v26  ;;  %v3007_v13 = vmul.f32 %v6922_v26, %v7586_v15  ;;  %v3075_v29 = vmul.f32 %v6922_v26, %v7592_v51  ;;  %7625 = vst [vmem:[#allocation61_spill] sm:$0xff] %v6940_v8  ;;  %v5048_v30 = vpop.eup %5047  ;;  %v3436_v9 = vrot.slane %v3428_v17, 7 }
 0x365   :  { %7623 = vst [vmem:[#allocation57_spill] sm:$0xff] %v6924_v42  ;;  %v2965_v10 = vmul.f32 %v7624_v21, %v6924_v42  ;;  %v3009_v48 = vmul.f32 %v6924_v42, %v7586_v15  ;;  %v3051_v34 = vmul.f32 %v6922_v26, %v7593_v36  ;;  %v5050_v31 = vpop.eup %5049 }
 0x366   :  { %v2971_v7 = vrot.slane %v2963_v49, 7  ;;  %v3015_v53 = vrot.slane %v3007_v13, 7  ;;  %v3077_v49 = vmul.f32 %v6924_v42, %v7592_v51  ;;  %v3083_v13 = vrot.slane %v3075_v29, 7 }
 0x367   :  { %v2973_v46 = vrot.slane %v2965_v10, 7  ;;  %v3017_v39 = vrot.slane %v3009_v48, 7  ;;  %v5052_v48 = vpop.eup %5051  ;;  %v3053_v51 = vmul.f32 %v6924_v42, %v7593_v36  ;;  %v3271_v29 = vmul.f32 %v7601_v14, %v6909_v28 }
 0x368   :  { %v2979_v37 = vadd.f32 %v2971_v7, %v7599_v63  ;;  %v3023_v33 = vadd.f32 %v3015_v53, %v7602_v57  ;;  %v3085_v47 = vrot.slane %v3077_v49, 7  ;;  %v7626_v7 = vld [vmem:[#allocation25_spill] sm:$0xff]  ;;  %v5054_v1 = vpop.eup %5053  ;;  %v7627_v53 = vld [vmem:[#allocation51_spill] sm:$0xff]  ;;  %v3091_v17 = vadd.f32 %v3083_v13, %v7585_v0 }
 0x369   :  { %v2981_v61 = vadd.f32 %v2973_v46, %v7600_v16  ;;  %v3025_v10 = vadd.f32 %v3017_v39, %v7547_v52  ;;  %v3442_v12 = vadd.f32 %v3434_v22, %v7626_v7  ;;  %v5056_v50 = vpop.eup %5055  ;;  %v3059_v46 = vrot.slane %v3051_v34, 7  ;;  %v7630_v7 = vld [vmem:[#allocation41_spill] sm:$0xff] }
 0x36a   :  { %v4196_v5 = vmul.f32 -1.442695, %v2979_v37  ;;  %v4200_v4 = vmul.f32 -1.442695, %v3023_v33  ;;  %v3256_v26 = vadd.f32 %v3248_v59, %v7627_v53  ;;  %v5058_v39 = vpop.eup %5057  ;;  %v7628_v37 = vld [vmem:[#allocation21_spill] sm:$0xff]  ;;  %v3093_v33 = vadd.f32 %v3085_v47, %v7587_v6  ;;  %v7629_v59 = vld [vmem:[#allocation27_spill] sm:$0xff] }
 0x36b   :  { %v4198_v8 = vmul.f32 -1.442695, %v2981_v61  ;;  %v4202_v43 = vmul.f32 -1.442695, %v3025_v10  ;;  %v3470_v61 = vmul.f32 %v6899_v24, %v7624_v21  ;;  %v5060_v22 = vpop.eup %5059  ;;  %v2394_v49 = vrot.slane %v7628_v37, 1 }
 0x36c   :  { %5065 = vpow2.f32 %v4196_v5  ;;  %v4221_v10 = vmul.f32 -1.442695, %v3442_v12  ;;  %v3061_v34 = vrot.slane %v3053_v51, 7  ;;  %v3444_v5 = vadd.f32 %v3436_v9, %v7629_v59  ;;  %v6963_v14 = vpop.eup %5061  ;;  %v7632_v51 = vld [vmem:[#allocation56_spill] sm:$0xff] }
 0x36d   :  { %5067 = vpow2.f32 %v4198_v8  ;;  %v3530_v53 = vadd.f32 %v3522_v25, %v7630_v7  ;;  %v3067_v8 = vadd.f32 %v3059_v46, %v7582_v58  ;;  %v2402_v13 = vmul.f32 %v5058_v39, %v2394_v49  ;;  %v7633_v7 = vld [vmem:[#allocation31_spill] sm:$0xff] }
 0x36e   :  { %5069 = vpow2.f32 %v4200_v4  ;;  %v2404_v0 = vmul.f32 %v5052_v48, %v5048_v30  ;;  %v2406_v42 = vmul.f32 %v5054_v1, %v5050_v31  ;;  %v3279_v3 = vrot.slane %v3271_v29, 1  ;;  %v6966_v4 = vpop.eup %5063  ;;  %v7631_v1 = vld [vmem:[#allocation29_spill] sm:$0xff] }
 0x36f   :  { %5071 = vpow2.f32 %v4202_v43  ;;  %v4204_v52 = vmul.f32 -1.442695, %v3091_v17  ;;  %v3478_v37 = vrot.slane %v3470_v61, 7  ;;  %v4206_v47 = vmul.f32 -1.442695, %v3093_v33 }
 0x370   :  { %5073 = vtanh.f32 %v3256_v26  ;;  %v6969_v43 = vadd.f32 %v2404_v0, %v6907_v56  ;;  %v6971_v12 = vadd.f32 %v2406_v42, %v2402_v13  ;;  %v4223_v9 = vmul.f32 -1.442695, %v3444_v5 }
 0x371   :  { %5075 = vpow2.f32 %v4221_v10  ;;  %v3069_v25 = vadd.f32 %v3061_v34, %v7584_v20  ;;  %v3472_v31 = vmul.f32 %v6915_v27, %v7624_v21  ;;  %v3486_v26 = vadd.f32 %v3478_v37, %v7631_v1 }
 0x372   :  { %5077 = vtanh.f32 %v3530_v53  ;;  %v2935_v30 = vrot.slane %v6909_v28, %v7613_v55  ;;  %v3287_v0 = vadd.f32 %v3279_v3, %v7632_v51  ;;  %v3154_v53 = vmul.f32 %v6909_v28, %v5970_v35 }
 0x373   :  { %5079 = vtanh.f32 %v3067_v8  ;;  %v4225_v61 = vmul.f32 -1.442695, %v3486_v26  ;;  %v3516_v49 = vmul.f32 %v6915_v27, %v7586_v15  ;;  %v2376_v34 = vadd.f32 1.0, %v5056_v50 }
 0x374   :  { %5081 = vpow2.f32 %v4204_v52  ;;  %2950 = vperm.xlu1 %4295, %v2935_v30   ;;  %v3480_v52 = vrot.slane %v3472_v31, 7  ;;  %v4219_v3 = vmul.f32 -1.442695, %v3287_v0  ;;  %v3162_v5 = vrot.slane %v3154_v53, 1 }
 0x375   :  { %5083 = vpow2.f32 %v4206_v47  ;;  %v3524_v37 = vrot.slane %v3516_v49, 7  ;;  %v2378_v47 = vadd.f32 1.0, %v5060_v22  ;;  %v3198_v1 = vmul.f32 %v6909_v28, %v7560_v19  ;;  %v7636_v22 = vld [vmem:[#allocation50_spill] sm:$0xff] }
 0x376   :  { %v5066_v48 = vpop.eup %5065  ;;  %5085 = vpow2.f32 %v4223_v9  ;;  %v3488_v8 = vadd.f32 %v3480_v52, %v7633_v7  ;;  %v7634_v9 = vld [vmem:[#allocation22_spill] sm:$0xff] }
 0x377   :  { %v5068_v56 = vpop.eup %5067  ;;  %v2995_v42 = vadd.f32 1.0, %v5066_v48  ;;  %5087 = vtanh.f32 %v3069_v25  ;;  %v3351_v25 = vrot.slane %v6899_v24, %v7634_v9  ;;  %v7635_v48 = vld [vmem:[#allocation38_spill] sm:$0xff]  ;;  %v3359_v53 = vrot.slane %v6915_v27, %v7634_v9 }
 0x378   :  { %v5070_v46 = vpop.eup %5069  ;;  %v2997_v39 = vadd.f32 1.0, %v5068_v56  ;;  %v3170_v0 = vadd.f32 %v3162_v5, %v7635_v48  ;;  %v4227_v56 = vmul.f32 -1.442695, %v3488_v8 }
 0x379   :  { %v5072_v29 = vpop.eup %5071  ;;  %5089 = vrcp.f32 %v2995_v42  ;;  %v3039_v17 = vadd.f32 1.0, %v5070_v46  ;;  %3368 = vperm.xlu1 %4295, %v3351_v25   ;;  %v3532_v46 = vadd.f32 %v3524_v37, %v7636_v22 }
 0x37a   :  { %5091 = vrcp.f32 %v2997_v39  ;;  %v3041_v33 = vadd.f32 1.0, %v5072_v29  ;;  %v6984_v10 = vpop.eup %5073  ;;  %v3538_v39 = vmul.f32 %v6899_v24, %v7593_v36  ;;  %v3206_v29 = vrot.slane %v3198_v1, 1  ;;  %v7637_v1 = vld [vmem:[#allocation39_spill] sm:$0xff] }
 0x37b   :  { %5093 = vrcp.f32 %v3039_v17  ;;  %v5076_v59 = vpop.eup %5075  ;;  %v3540_v24 = vmul.f32 %v6915_v27, %v7593_v36  ;;  %v3184_v27 = vadd.f32 1.0, %v6963_v14  ;;  %v7639_v14 = vld [vmem:[#allocation53_spill] sm:$0xff] }
 0x37c   :  { %5095 = vrcp.f32 %v3041_v33  ;;  %v6987_v13 = vpop.eup %5077  ;;  %v3458_v50 = vadd.f32 1.0, %v5076_v59 }
 0x37d   :  { %5097 = vpow2.f32 %v4225_v61  ;;  %v5080_v31 = vpop.eup %5079  ;;  %v3123_v61 = vrot.slane %v6891_v41, 7  ;;  %3374 = vperm.xlu1 %4295, %v3359_v53   ;;  %v4211_v41 = vmul.f32 -1.442695, %v3170_v0  ;;  %v3548_v0 = vrot.slane %v3540_v24, 7 }
 0x37e   :  { %5099 = vpow2.f32 %v4219_v3  ;;  %v5082_v26 = vpop.eup %5081  ;;  %v3242_v3 = vmul.f32 %v6909_v28, %v6478_v54  ;;  %v3214_v28 = vadd.f32 %v3206_v29, %v7637_v1 }
 0x37f   :  { %5101 = vrcp.f32 %v2376_v34  ;;  %v5084_v30 = vpop.eup %5083  ;;  %v3107_v17 = vadd.f32 1.0, %v5082_v26  ;;  %v3125_v34 = vrot.slane %v6897_v38, 7 }
 0x380   :  { %5103 = vtanh.f32 %v6969_v43  ;;  %v5086_v42 = vpop.eup %5085  ;;  %v3109_v33 = vadd.f32 1.0, %v5084_v30 }
 0x381   :  { %5105 = vrcp.f32 %v2378_v47  ;;  %v5088_v52 = vpop.eup %5087  ;;  %v3460_v7 = vadd.f32 1.0, %v5086_v42  ;;  %v3546_v47 = vrot.slane %v3538_v39, 7 }
 0x382   :  { %5107 = vtanh.f32 %v6971_v12 }
 0x383   :  { %v5090_v49 = vpop.eup %5089  ;;  %5109 = vrcp.f32 %v3458_v50  ;;  %v3250_v50 = vrot.slane %v3242_v3, 1 }
 0x384   :  { %v5092_v59 = vpop.eup %5091  ;;  %v3135_v5 = vmul.f32 %v5090_v49, %v5080_v31  ;;  %5111 = vpow2.f32 %v4227_v56  ;;  %v3228_v49 = vadd.f32 1.0, %v6966_v4 }
 0x385   :  { %v5094_v8 = vpop.eup %5093  ;;  %v3137_v37 = vmul.f32 %v5092_v59, %v5088_v52  ;;  %5113 = vtanh.f32 %v3532_v46  ;;  %v7638_v46 = vld [vmem:[#allocation45_spill] sm:$0xff]  ;;  %v4215_v52 = vmul.f32 -1.442695, %v3214_v28  ;;  %v3258_v3 = vadd.f32 %v3250_v50, %v7639_v14 }
 0x386   :  { %v5096_v25 = vpop.eup %5095  ;;  %5115 = vrcp.f32 %v3107_v17  ;;  %v3131_v26 = vmul.f32 %v5094_v8, %v3123_v61  ;;  %v3554_v53 = vadd.f32 %v3546_v47, %v7638_v46 }
 0x387   :  { %v7008_v38 = vpop.eup %5097  ;;  %5117 = vrcp.f32 %v3109_v33  ;;  %v3133_v31 = vmul.f32 %v5096_v25, %v3125_v34  ;;  %v7640_v33 = vld [vmem:[#allocation49_spill] sm:$0xff] }
 0x388   :  { %v7010_v30 = vpop.eup %5099  ;;  %v7012_v56 = vadd.f32 %v3135_v5, %v3131_v26  ;;  %5119 = vrcp.f32 %v3460_v7  ;;  %v3556_v34 = vadd.f32 %v3548_v0, %v7640_v33  ;;  %v4229_v8 = vmul.f32 -1.442695, %v3554_v53 }
 0x389   :  { %v5102_v42 = vpop.eup %5101  ;;  %v7015_v22 = vadd.f32 %v3137_v37, %v3133_v31  ;;  %5121 = vpow2.f32 %v4211_v41 }
 0x38a   :  { %v5104_v39 = vpop.eup %5103  ;;  %5123 = vtanh.f32 %v7012_v56 }
 0x38b   :  { %v5106_v29 = vpop.eup %5105  ;;  %5125 = vtanh.f32 %v7015_v22  ;;  %v2416_v17 = vmul.f32 %v5104_v39, %v5102_v42 }
 0x38c   :  { %v5108_v61 = vpop.eup %5107  ;;  %5127 = vrcp.f32 %v3184_v27 }
 0x38d   :  { %v7023_v59 = vpop.eup %5109  ;;  %v7025_v5 = vmul.f32 %v5108_v61, %v5106_v29  ;;  %v2689_v7 = vmul.f32 %v2416_v17, %v5950_v32  ;;  %v2733_v24 = vmul.f32 %v2416_v17, %v5970_v35  ;;  %v2777_v37 = vmul.f32 %v2416_v17, %v7560_v19  ;;  %v7641_v29 = vld [vmem:[#allocation35_spill] sm:$0xff] }
 0x38e   :  { %v7029_v41 = vpop.eup %5111  ;;  %v2806_v47 = vmul.f32 %v6478_v54, %v2416_v17  ;;  %5129 = vpow2.f32 %v4215_v52  ;;  %v2461_v4 = vrot.slane %v2416_v17, %v7575_v62 }
 0x38f   :  { %v7034_v25 = vpop.eup %5113  ;;  %v2691_v28 = vmul.f32 %v7025_v5, %v5950_v32  ;;  %v2697_v26 = vrot.slane %v2689_v7, 1  ;;  %v2735_v50 = vmul.f32 %v7025_v5, %v5970_v35  ;;  %v2741_v31 = vrot.slane %v2733_v24, 1 }
 0x390   :  { %v5116_v27 = vpop.eup %5115  ;;  %v2779_v0 = vmul.f32 %v7025_v5, %v7560_v19  ;;  %v2808_v42 = vmul.f32 %v6478_v54, %v7025_v5  ;;  %v2814_v46 = vrot.slane %v2806_v47, 1  ;;  %5131 = vrcp.f32 %v3228_v49  ;;  %2479 = vperm.xlu0 %4296, %v2461_v4  }
 0x391   :  { %v5118_v53 = vpop.eup %5117  ;;  %v2699_v39 = vrot.slane %v2691_v28, 1  ;;  %v2705_v52 = vadd.f32 %v2697_v26, %v7606_v60  ;;  %v2743_v32 = vrot.slane %v2735_v50, 1  ;;  %v2749_v17 = vadd.f32 %v2741_v31, %v7641_v29 }
 0x392   :  { %v7046_v61 = vpop.eup %5119  ;;  %v2785_v33 = vrot.slane %v2777_v37, 1  ;;  %v2787_v7 = vrot.slane %v2779_v0, 1  ;;  %v2816_v24 = vrot.slane %v2808_v42, 1  ;;  %5133 = vtanh.f32 %v3258_v3 }
 0x393   :  { %v5122_v14 = vpop.eup %5121  ;;  %v2707_v51 = vadd.f32 %v2699_v39, %v7607_v40  ;;  %v4184_v1 = vmul.f32 -1.442695, %v2705_v52  ;;  %v2751_v49 = vadd.f32 %v2743_v32, %v7608_v11  ;;  %v4188_v47 = vmul.f32 -1.442695, %v2749_v17  ;;  %v7642_v52 = vld [vmem:[#allocation18_spill] sm:$0xff] }
 0x394   :  { %v5124_v4 = vpop.eup %5123  ;;  %v2822_v28 = vadd.f32 %v2814_v46, %v7615_v45  ;;  %v2824_v26 = vadd.f32 %v2816_v24, %v7617_v18  ;;  %5135 = vpow2.f32 %v4229_v8  ;;  %v4231_v50 = vmul.f32 -1.442695, %v3556_v34 }
 0x395   :  { %v5126_v31 = vpop.eup %5125  ;;  %v7052_v48 = vmul.f32 %v5124_v4, %v5116_v27  ;;  %5137 = vpow2.f32 %v4184_v1  ;;  %v4186_v37 = vmul.f32 -1.442695, %v2707_v51  ;;  %v4190_v3 = vmul.f32 -1.442695, %v2751_v49 }
 0x396   :  { %v5128_v0 = vpop.eup %5127  ;;  %v7054_v42 = vmul.f32 %v5126_v31, %v5118_v53  ;;  %5139 = vpow2.f32 %v4188_v47  ;;  %v2793_v39 = vadd.f32 %v2785_v33, %v7616_v2  ;;  %v3317_v32 = vrot.slane %v7642_v52, 1 }
 0x397   :  { %v3425_v46 = vmul.f32 %v7621_v23, %v7052_v48  ;;  %v3469_v34 = vmul.f32 %v7052_v48, %v7624_v21  ;;  %5141 = vpow2.f32 %v4186_v37  ;;  %v2795_v8 = vadd.f32 %v2787_v7, %v7618_v44 }
 0x398   :  { %v5130_v1 = vpop.eup %5129  ;;  %v3427_v51 = vmul.f32 %v7621_v23, %v7054_v42  ;;  %v3471_v27 = vmul.f32 %v7054_v42, %v7624_v21  ;;  %5143 = vpow2.f32 %v4190_v3  ;;  %v4192_v53 = vmul.f32 -1.442695, %v2822_v28  ;;  %v7643_v3 = vld [vmem:[#allocation30_spill] sm:$0xff] }
 0x399   :  { %v3433_v17 = vrot.slane %v3425_v46, 7  ;;  %v3477_v33 = vrot.slane %v3469_v34, 7  ;;  %v4194_v24 = vmul.f32 -1.442695, %v2824_v26  ;;  %5145 = vpow2.f32 %v4231_v50 }
 0x39a   :  { %v5132_v49 = vpop.eup %5131  ;;  %v3435_v47 = vrot.slane %v3427_v51, 7  ;;  %v3479_v4 = vrot.slane %v3471_v27, 7  ;;  %5147 = vtanh.f32 %v2793_v39  ;;  %v3186_v31 = vadd.f32 1.0, %v5122_v14 }
 0x39b   :  { %v3441_v7 = vadd.f32 %v3433_v17, %v7599_v63  ;;  %v3485_v37 = vadd.f32 %v3477_v33, %v7602_v57  ;;  %v3513_v23 = vmul.f32 %v7052_v48, %v7586_v15  ;;  %5149 = vtanh.f32 %v2795_v8 }
 0x39c   :  { %v7071_v21 = vpop.eup %5133  ;;  %v3443_v28 = vadd.f32 %v3435_v47, %v7600_v16  ;;  %v3487_v26 = vadd.f32 %v3479_v4, %v7643_v3  ;;  %v3515_v50 = vmul.f32 %v7054_v42, %v7586_v15  ;;  %5151 = vpow2.f32 %v4192_v53 }
 0x39d   :  { %v4220_v39 = vmul.f32 -1.442695, %v3441_v7  ;;  %v4224_v14 = vmul.f32 -1.442695, %v3485_v37  ;;  %5153 = vpow2.f32 %v4194_v24  ;;  %v3325_v63 = vmul.f32 %v5132_v49, %v3317_v32  ;;  %v7644_v24 = vld [vmem:[#allocation19_spill] sm:$0xff]  ;;  %v7645_v49 = vld [vmem:[#allocation46_spill] sm:$0xff] }
 0x39e   :  { %v7077_v52 = vpop.eup %5135  ;;  %v4222_v57 = vmul.f32 -1.442695, %v3443_v28  ;;  %v4226_v46 = vmul.f32 -1.442695, %v3487_v26  ;;  %5155 = vrcp.f32 %v3186_v31  ;;  %v3329_v34 = vmul.f32 %v5128_v0, %v6984_v10 }
 0x39f   :  { %v5138_v8 = vpop.eup %5137  ;;  %5157 = vpow2.f32 %v4220_v39  ;;  %v3521_v16 = vrot.slane %v3513_v23, 7  ;;  %v2469_v51 = vrot.slane %v7025_v5, %v7575_v62  ;;  %v3523_v15 = vrot.slane %v3515_v50, 7 }
 0x3a0   :  { %v5140_v27 = vpop.eup %5139  ;;  %5159 = vpow2.f32 %v4222_v57  ;;  %v2721_v53 = vadd.f32 1.0, %v5138_v8  ;;  %v7082_v17 = vadd.f32 %v3329_v34, %v3325_v63  ;;  %v2885_v47 = vrot.slane %v7645_v49, %v7644_v24 }
 0x3a1   :  { %v5142_v32 = vpop.eup %5141  ;;  %5161 = vpow2.f32 %v4224_v14  ;;  %v2765_v33 = vadd.f32 1.0, %v5140_v27  ;;  %2485 = vperm.xlu0 %4296, %v2469_v51   ;;  %v3529_v62 = vadd.f32 %v3521_v16, %v7582_v58  ;;  %v3531_v7 = vadd.f32 %v3523_v15, %v7584_v20  ;;  %v7646_v58 = vld [vmem:[#allocation57_spill] sm:$0xff] }
 0x3a2   :  { %v5144_v10 = vpop.eup %5143  ;;  %5163 = vpow2.f32 %v4226_v46  ;;  %v2723_v0 = vadd.f32 1.0, %v5142_v32  ;;  %v3537_v37 = vmul.f32 %v7052_v48, %v7593_v36  ;;  %v3230_v28 = vadd.f32 1.0, %v5130_v1  ;;  %v7647_v1 = vld [vmem:[#allocation44_spill] sm:$0xff] }
 0x3a3   :  { %v7086_v4 = vpop.eup %5145  ;;  %5165 = vrcp.f32 %v2721_v53  ;;  %v2767_v5 = vadd.f32 1.0, %v5144_v10  ;;  %v2893_v39 = vrot.slane %v7646_v58, %v7644_v24  ;;  %v3502_v14 = vadd.f32 1.0, %v7008_v38 }
 0x3a4   :  { %v5148_v31 = vpop.eup %5147  ;;  %5167 = vrcp.f32 %v2723_v0  ;;  %v3545_v26 = vrot.slane %v3537_v37, 7  ;;  %v2854_v32 = vrot.slane %v6969_v43, 1  ;;  %v2856_v49 = vrot.slane %v6971_v12, 1 }
 0x3a5   :  { %v5150_v23 = vpop.eup %5149  ;;  %5169 = vrcp.f32 %v2765_v33  ;;  %2903 = vperm.xlu0 %4296, %v2885_v47   ;;  %v3504_v33 = vadd.f32 1.0, %v7029_v41 }
 0x3a6   :  { %v5152_v3 = vpop.eup %5151  ;;  %5171 = vrcp.f32 %v2767_v5  ;;  %v3553_v8 = vadd.f32 %v3545_v26, %v7647_v1  ;;  %v3303_v1 = vadd.f32 1.0, %v7010_v30 }
 0x3a7   :  { %v5154_v50 = vpop.eup %5153  ;;  %5173 = vtanh.f32 %v3529_v62  ;;  %v2838_v57 = vadd.f32 1.0, %v5152_v3 }
 0x3a8   :  { %v5156_v63 = vpop.eup %5155  ;;  %5175 = vtanh.f32 %v3531_v7  ;;  %v2840_v15 = vadd.f32 1.0, %v5154_v50  ;;  %v4228_v10 = vmul.f32 -1.442695, %v3553_v8  ;;  %v3539_v7 = vmul.f32 %v7054_v42, %v7593_v36  ;;  %v7648_v50 = vld [vmem:[#allocation42_spill] sm:$0xff] }
 0x3a9   :  { %v5158_v20 = vpop.eup %5157  ;;  %5177 = vrcp.f32 %v3230_v28  ;;  %2909 = vperm.xlu0 %4296, %v2893_v39   ;;  %v3319_v12 = vrot.slane %v7648_v50, 1 }
 0x3aa   :  { %v5160_v46 = vpop.eup %5159  ;;  %v3457_v34 = vadd.f32 1.0, %v5158_v20  ;;  %5179 = vtanh.f32 %v7082_v17  ;;  %v3547_v39 = vrot.slane %v3539_v7, 7  ;;  %v7649_v20 = vld [vmem:[#allocation64_spill] sm:$0xff]  ;;  %v3600_v7 = vmul.f32 %v7046_v61, %v7034_v25 }
 0x3ab   :  { %v5162_v16 = vpop.eup %5161  ;;  %v3459_v51 = vadd.f32 1.0, %v5160_v46  ;;  %5181 = vrcp.f32 %v3502_v14  ;;  %v3598_v46 = vmul.f32 %v7023_v59, %v6987_v13 }
 0x3ac   :  { %v5164_v27 = vpop.eup %5163  ;;  %5183 = vrcp.f32 %v3457_v34  ;;  %v3501_v53 = vadd.f32 1.0, %v5162_v16  ;;  %v3555_v13 = vadd.f32 %v3547_v39, %v7587_v6  ;;  %v3570_v6 = vadd.f32 1.0, %v7077_v52 }
 0x3ad   :  { %v5166_v38 = vpop.eup %5165  ;;  %5185 = vrcp.f32 %v2838_v57  ;;  %v3503_v5 = vadd.f32 1.0, %v5164_v27  ;;  %v3586_v57 = vrot.slane %v7649_v20, 7 }
 0x3ae   :  { %v5168_v24 = vpop.eup %5167  ;;  %5187 = vrcp.f32 %v3459_v51  ;;  %v2866_v47 = vmul.f32 %v5166_v38, %v5148_v31  ;;  %v3331_v31 = vmul.f32 %v5156_v63, %v7071_v21  ;;  %v7650_v21 = vld [vmem:[#allocation61_spill] sm:$0xff]  ;;  %v7651_v38 = vld [vmem:[#allocation16_spill] sm:$0xff]  ;;  %v4230_v50 = vmul.f32 -1.442695, %v3555_v13 }
 0x3af   :  { %v5170_v0 = vpop.eup %5169  ;;  %v2868_v62 = vmul.f32 %v5168_v24, %v5150_v23  ;;  %5189 = vrcp.f32 %v3501_v53  ;;  %v3585_v53 = vrot.slane %v7012_v56, 7 }
 0x3b0   :  { %v5172_v37 = vpop.eup %5171  ;;  %5191 = vrcp.f32 %v2840_v15  ;;  %v2862_v28 = vmul.f32 %v5170_v0, %v2854_v32  ;;  %v7653_v0 = vld [vmem:[#allocation62_spill] sm:$0xff] }
 0x3b1   :  { %v5174_v3 = vpop.eup %5173  ;;  %v2864_v43 = vmul.f32 %v5172_v37, %v2856_v49  ;;  %5193 = vrcp.f32 %v3504_v33  ;;  %v3587_v37 = vrot.slane %v7015_v22, 7 }
 0x3b2   :  { %v5176_v41 = vpop.eup %5175  ;;  %v7102_v26 = vadd.f32 %v2866_v47, %v2862_v28  ;;  %5195 = vpow2.f32 %v4228_v10  ;;  %v7652_v47 = vld [vmem:[#allocation63_spill] sm:$0xff] }
 0x3b3   :  { %v5178_v23 = vpop.eup %5177  ;;  %v7106_v58 = vadd.f32 %v2868_v62, %v2864_v43  ;;  %5197 = vrcp.f32 %v3503_v5  ;;  %v3588_v62 = vrot.slane %v7653_v0, 7  ;;  %v3572_v43 = vadd.f32 1.0, %v7086_v4 }
 0x3b4   :  { %v5180_v36 = vpop.eup %5179  ;;  %5199 = vtanh.f32 %v7102_v26  ;;  %v3327_v14 = vmul.f32 %v5178_v23, %v3319_v12 }
 0x3b5   :  { %v5182_v34 = vpop.eup %5181  ;;  %5201 = vtanh.f32 %v7106_v58  ;;  %v7115_v63 = vmul.f32 %v5180_v36, %v7650_v21 }
 0x3b6   :  { %v5184_v8 = vpop.eup %5183  ;;  %v7117_v16 = vadd.f32 %v3331_v31, %v3327_v14  ;;  %v3594_v51 = vmul.f32 %v5182_v34, %v3586_v57  ;;  %5203 = vrcp.f32 %v3303_v1  ;;  %v7655_v1 = vld [vmem:[#allocation36_spill] sm:$0xff] }
 0x3b7   :  { %v5186_v27 = vpop.eup %5185  ;;  %v3614_v15 = vmul.f32 %v7115_v63, %v7560_v19  ;;  %v3658_v30 = vmul.f32 %v7115_v63, %v6478_v54  ;;  %v3389_v32 = vrot.slane %v7115_v63, %v7651_v38  ;;  %v3597_v24 = vmul.f32 %v5184_v8, %v5174_v3 }
 0x3b8   :  { %v5188_v59 = vpop.eup %5187  ;;  %v3602_v33 = vadd.f32 %v3598_v46, %v3594_v51  ;;  %v3702_v10 = vmul.f32 %v7115_v63, %v7652_v47  ;;  %5205 = vtanh.f32 %v7117_v16  ;;  %v7654_v46 = vld [vmem:[#allocation33_spill] sm:$0xff] }
 0x3b9   :  { %v5190_v49 = vpop.eup %5189  ;;  %3406 = vperm.xlu1 %4295, %v3389_v32   ;;  %v3622_v3 = vrot.slane %v3614_v15, 1  ;;  %v3666_v31 = vrot.slane %v3658_v30, 1  ;;  %v3599_v36 = vmul.f32 %v5188_v59, %v5176_v41 }
 0x3ba   :  { %v5192_v5 = vpop.eup %5191  ;;  %v3593_v56 = vmul.f32 %v5190_v49, %v3585_v53  ;;  %v3710_v14 = vrot.slane %v3702_v10, 1  ;;  %5207 = vtanh.f32 %v3602_v33  ;;  %v7656_v53 = vld [vmem:[#allocation51_spill] sm:$0xff] }
 0x3bb   :  { %v5194_v28 = vpop.eup %5193  ;;  %5209 = vrcp.f32 %v3570_v6  ;;  %v3630_v34 = vadd.f32 %v3622_v3, %v7654_v46  ;;  %v3674_v21 = vadd.f32 %v3666_v31, %v7655_v1 }
 0x3bc   :  { %v5196_v12 = vpop.eup %5195  ;;  %v7136_v23 = vadd.f32 %v3597_v24, %v3593_v56  ;;  %v3596_v39 = vmul.f32 %v5194_v28, %v3588_v62  ;;  %5211 = vrcp.f32 %v3572_v43  ;;  %v3718_v13 = vadd.f32 %v3710_v14, %v7656_v53 }
 0x3bd   :  { %v5198_v52 = vpop.eup %5197  ;;  %5213 = vpow2.f32 %v4230_v50  ;;  %v3569_v32 = vadd.f32 1.0, %v5196_v12  ;;  %v4233_v0 = vmul.f32 -1.442695, %v3630_v34  ;;  %v4237_v56 = vmul.f32 -1.442695, %v3674_v21 }
 0x3be   :  { %v5200_v20 = vpop.eup %5199  ;;  %v7138_v25 = vadd.f32 %v3600_v7, %v3596_v39  ;;  %v3595_v22 = vmul.f32 %v5198_v52, %v3587_v37  ;;  %5215 = vtanh.f32 %v3718_v13 }
 0x3bf   :  { %v5202_v61 = vpop.eup %5201  ;;  %v2878_v57 = vmul.f32 %v5200_v20, %v5186_v27  ;;  %5217 = vrcp.f32 %v3569_v32 }
 0x3c0   :  { %v7141_v4 = vmul.f32 %v5202_v61, %v5192_v5  ;;  %v7144_v8 = vadd.f32 %v3599_v36, %v3595_v22  ;;  %v5204_v33 = vpop.eup %5203  ;;  %5219 = vpow2.f32 %v4233_v0  ;;  %v3347_v0 = vrot.slane %v7052_v48, %v7634_v9 }
 0x3c1   :  { %v3151_v41 = vmul.f32 %v2878_v57, %v5970_v35  ;;  %v3195_v51 = vmul.f32 %v2878_v57, %v7560_v19  ;;  %v3268_v15 = vmul.f32 %v7652_v47, %v2878_v57  ;;  %v3239_v30 = vmul.f32 %v2878_v57, %v6478_v54 }
 0x3c2   :  { %v3153_v27 = vmul.f32 %v7141_v4, %v5970_v35  ;;  %v3197_v59 = vmul.f32 %v7141_v4, %v7560_v19  ;;  %v3241_v10 = vmul.f32 %v7141_v4, %v6478_v54  ;;  %v3270_v6 = vmul.f32 %v7652_v47, %v7141_v4  ;;  %v5206_v35 = vpop.eup %5205 }
 0x3c3   :  { %v3159_v24 = vrot.slane %v3151_v41, 1  ;;  %v3203_v49 = vrot.slane %v3195_v51, 1  ;;  %v3276_v28 = vrot.slane %v3268_v15, 1  ;;  %v3247_v50 = vrot.slane %v3239_v30, 1  ;;  %v7657_v51 = vld [vmem:[#allocation67_spill] sm:$0xff] }
 0x3c4   :  { %v3161_v62 = vrot.slane %v3153_v27, 1  ;;  %v3205_v5 = vrot.slane %v3197_v59, 1  ;;  %v5208_v12 = vpop.eup %5207  ;;  %v3249_v36 = vrot.slane %v3241_v10, 1  ;;  %v3278_v22 = vrot.slane %v3270_v6, 1 }
 0x3c5   :  { %v3167_v7 = vadd.f32 %v3159_v24, %v7606_v60  ;;  %v3211_v37 = vadd.f32 %v3203_v49, %v7641_v29  ;;  %v5210_v52 = vpop.eup %5209  ;;  %5221 = vpow2.f32 %v4237_v56  ;;  %v3284_v46 = vadd.f32 %v3276_v28, %v7615_v45  ;;  %v7659_v56 = vld [vmem:[#allocation38_spill] sm:$0xff] }
 0x3c6   :  { %v3169_v3 = vadd.f32 %v3161_v62, %v7607_v40  ;;  %v3213_v43 = vadd.f32 %v3205_v5, %v7608_v11  ;;  %v7163_v61 = vpop.eup %5211  ;;  %v3343_v34 = vmul.f32 %v5206_v35, %v5204_v33  ;;  %v2923_v1 = vrot.slane %v2878_v57, %v7613_v55  ;;  %v7658_v62 = vld [vmem:[#allocation23_spill] sm:$0xff] }
 0x3c7   :  { %v4208_v31 = vmul.f32 -1.442695, %v3167_v7  ;;  %v4212_v39 = vmul.f32 -1.442695, %v3211_v37  ;;  %v7167_v21 = vpop.eup %5213  ;;  %v3255_v41 = vadd.f32 %v3247_v50, %v7616_v2  ;;  %v3731_v15 = vmul.f32 %v7657_v51, %v7115_v63  ;;  %v7660_v7 = vld [vmem:[#allocation39_spill] sm:$0xff] }
 0x3c8   :  { %v4210_v14 = vmul.f32 -1.442695, %v3169_v3  ;;  %v4214_v20 = vmul.f32 -1.442695, %v3213_v43  ;;  %v3610_v53 = vmul.f32 %v5210_v52, %v5208_v12  ;;  %v3257_v13 = vadd.f32 %v3249_v36, %v7618_v44  ;;  %2941 = vperm.xlu0 %4296, %v2923_v1   ;;  %v7183_v6 = vpop.eup %5215 }
 0x3c9   :  { %5223 = vpow2.f32 %v4208_v31  ;;  %v3616_v27 = vmul.f32 %v3343_v34, %v7560_v19  ;;  %v3660_v59 = vmul.f32 %v3343_v34, %v6478_v54  ;;  %v3286_v57 = vadd.f32 %v3278_v22, %v7617_v18  ;;  %v5218_v3 = vpop.eup %5217  ;;  %v7661_v31 = vld [vmem:[#allocation47_spill] sm:$0xff]  ;;  %v7662_v22 = vld [vmem:[#allocation56_spill] sm:$0xff] }
 0x3ca   :  { %5225 = vpow2.f32 %v4210_v14  ;;  %v3733_v30 = vmul.f32 %v7657_v51, %v3343_v34  ;;  %v3397_v32 = vrot.slane %v3343_v34, %v7651_v38  ;;  %v4216_v33 = vmul.f32 -1.442695, %v3284_v46 }
 0x3cb   :  { %5227 = vpow2.f32 %v4212_v39  ;;  %v3624_v24 = vrot.slane %v3616_v27, 1  ;;  %v3668_v49 = vrot.slane %v3660_v59, 1  ;;  %v2931_v63 = vrot.slane %v7141_v4, %v7613_v55  ;;  %v5220_v4 = vpop.eup %5219 }
 0x3cc   :  { %5229 = vpow2.f32 %v4214_v20  ;;  %v3739_v10 = vrot.slane %v3731_v15, 1  ;;  %3412 = vperm.xlu1 %4295, %v3397_v32   ;;  %v3813_v5 = vrot.slane %v3610_v53, %v7658_v62  ;;  %v3704_v28 = vmul.f32 %v3343_v34, %v7652_v47 }
 0x3cd   :  { %5231 = vtanh.f32 %v3255_v41  ;;  %v3632_v35 = vadd.f32 %v3624_v24, %v7659_v56  ;;  %v3676_v37 = vadd.f32 %v3668_v49, %v7660_v7  ;;  %2947 = vperm.xlu0 %4296, %v2931_v63   ;;  %v3741_v55 = vrot.slane %v3733_v30, 1 }
 0x3ce   :  { %5233 = vtanh.f32 %v3257_v13  ;;  %v4218_v48 = vmul.f32 -1.442695, %v3286_v57  ;;  %v3747_v39 = vadd.f32 %v3739_v10, %v7661_v31  ;;  %v3712_v52 = vrot.slane %v3704_v28, 1  ;;  %v7663_v13 = vld [vmem:[#allocation53_spill] sm:$0xff] }
 0x3cf   :  { %5235 = vtanh.f32 %v7136_v23  ;;  %v4235_v43 = vmul.f32 -1.442695, %v3632_v35  ;;  %v4239_v50 = vmul.f32 -1.442695, %v3676_v37  ;;  %v5222_v12 = vpop.eup %5221  ;;  %v3749_v23 = vadd.f32 %v3741_v55, %v7662_v22 }
 0x3d0   :  { %5237 = vpow2.f32 %v4216_v33  ;;  %3830 = vperm.xlu1 %4295, %v3813_v5   ;;  %v3355_v1 = vrot.slane %v7054_v42, %v7634_v9  ;;  %v4241_v53 = vmul.f32 -1.442695, %v3747_v39  ;;  %v3720_v27 = vadd.f32 %v3712_v52, %v7663_v13 }
 0x3d1   :  { %5239 = vtanh.f32 %v7138_v25  ;;  %3365 = vperm.xlu0 %4296, %v3347_v0   ;;  %v4243_v57 = vmul.f32 -1.442695, %v3749_v23  ;;  %v3571_v32 = vadd.f32 1.0, %v7167_v21  ;;  %v3646_v42 = vadd.f32 1.0, %v5220_v4 }
 0x3d2   :  { %5241 = vpow2.f32 %v4235_v43  ;;  %v3690_v63 = vadd.f32 1.0, %v5222_v12  ;;  %v3316_v55 = vrot.slane %v7102_v26, 1  ;;  %v3318_v43 = vrot.slane %v7106_v58, 1 }
 0x3d3   :  { %v5224_v36 = vpop.eup %5223  ;;  %5243 = vpow2.f32 %v4239_v50 }
 0x3d4   :  { %v5226_v14 = vpop.eup %5225  ;;  %v3183_v20 = vadd.f32 1.0, %v5224_v36  ;;  %5245 = vpow2.f32 %v4218_v48 }
 0x3d5   :  { %v5228_v46 = vpop.eup %5227  ;;  %v3185_v34 = vadd.f32 1.0, %v5226_v14  ;;  %3371 = vperm.xlu0 %4296, %v3355_v1  }
 0x3d6   :  { %v5230_v41 = vpop.eup %5229  ;;  %5247 = vrcp.f32 %v3183_v20  ;;  %v3227_v15 = vadd.f32 1.0, %v5228_v46  ;;  %v3779_v46 = vrot.slane %v7082_v17, 1 }
 0x3d7   :  { %5249 = vrcp.f32 %v3185_v34  ;;  %v3229_v25 = vadd.f32 1.0, %v5230_v41  ;;  %v5232_v59 = vpop.eup %5231 }
 0x3d8   :  { %5251 = vrcp.f32 %v3227_v15  ;;  %v5234_v30 = vpop.eup %5233 }
 0x3d9   :  { %5253 = vrcp.f32 %v3229_v25  ;;  %v5236_v33 = vpop.eup %5235  ;;  %v3781_v25 = vrot.slane %v7117_v16, 1 }
 0x3da   :  { %5255 = vpow2.f32 %v4241_v53  ;;  %v5238_v24 = vpop.eup %5237  ;;  %v7196_v9 = vmul.f32 %v5236_v33, %v5218_v3 }
 0x3db   :  { %5257 = vtanh.f32 %v3720_v27  ;;  %v5240_v49 = vpop.eup %5239  ;;  %v3300_v3 = vadd.f32 1.0, %v5238_v24 }
 0x3dc   :  { %5259 = vpow2.f32 %v4243_v57  ;;  %v5242_v10 = vpop.eup %5241  ;;  %v3612_v0 = vmul.f32 %v5240_v49, %v7163_v61 }
 0x3dd   :  { %5261 = vrcp.f32 %v3571_v32  ;;  %v5244_v5 = vpop.eup %5243  ;;  %v3648_v56 = vadd.f32 1.0, %v5242_v10 }
 0x3de   :  { %5263 = vtanh.f32 %v7144_v8  ;;  %v5246_v35 = vpop.eup %5245  ;;  %v3821_v21 = vrot.slane %v3612_v0, %v7658_v62  ;;  %v3692_v7 = vadd.f32 1.0, %v5244_v5 }
 0x3df   :  { %5265 = vrcp.f32 %v3646_v42  ;;  %v3302_v48 = vadd.f32 1.0, %v5246_v35 }
 0x3e0   :  { %v5248_v37 = vpop.eup %5247  ;;  %5267 = vrcp.f32 %v3690_v63  ;;  %3836 = vperm.xlu1 %4295, %v3821_v21  }
 0x3e1   :  { %v5250_v28 = vpop.eup %5249  ;;  %v3328_v4 = vmul.f32 %v5248_v37, %v5232_v59  ;;  %5269 = vrcp.f32 %v3648_v56 }
 0x3e2   :  { %v5252_v61 = vpop.eup %5251  ;;  %v3330_v8 = vmul.f32 %v5250_v28, %v5234_v30  ;;  %5271 = vrcp.f32 %v3692_v7 }
 0x3e3   :  { %v5254_v50 = vpop.eup %5253  ;;  %v3324_v12 = vmul.f32 %v5252_v61, %v3316_v55  ;;  %5273 = vrcp.f32 %v3300_v3 }
 0x3e4   :  { %v5256_v31 = vpop.eup %5255  ;;  %v3326_v39 = vmul.f32 %v5254_v50, %v3318_v43  ;;  %5275 = vrcp.f32 %v3302_v48 }
 0x3e5   :  { %v5258_v36 = vpop.eup %5257  ;;  %v7203_v52 = vadd.f32 %v3328_v4, %v3324_v12  ;;  %v3763_v53 = vadd.f32 1.0, %v5256_v31 }
 0x3e6   :  { %v5260_v14 = vpop.eup %5259  ;;  %v7205_v26 = vadd.f32 %v3330_v8, %v3326_v39 }
 0x3e7   :  { %v5262_v20 = vpop.eup %5261  ;;  %5277 = vtanh.f32 %v7203_v52  ;;  %v3765_v59 = vadd.f32 1.0, %v5260_v14 }
 0x3e8   :  { %v5264_v22 = vpop.eup %5263  ;;  %5279 = vtanh.f32 %v7205_v26 }
 0x3e9   :  { %v5266_v58 = vpop.eup %5265  ;;  %v7209_v23 = vmul.f32 %v5264_v22, %v5262_v20  ;;  %v7664_v20 = vld [vmem:[#allocation17_spill] sm:$0xff] }
 0x3ea   :  { %v5268_v34 = vpop.eup %5267  ;;  %v3791_v1 = vmul.f32 %v5266_v58, %v7183_v6 }
 0x3eb   :  { %v5270_v41 = vpop.eup %5269  ;;  %v3787_v15 = vmul.f32 %v5268_v34, %v3779_v46 }
 0x3ec   :  { %v3793_v13 = vmul.f32 %v5270_v41, %v5258_v36  ;;  %v5272_v27 = vpop.eup %5271  ;;  %v3809_v41 = vrot.slane %v7196_v9, %v7658_v62 }
 0x3ed   :  { %v3795_v57 = vadd.f32 %v3791_v1, %v3787_v15  ;;  %v3789_v30 = vmul.f32 %v5272_v27, %v3781_v25  ;;  %v5274_v32 = vpop.eup %5273 }
 0x3ee   :  { %v5276_v33 = vpop.eup %5275 }
 0x3ef   :  { %5281 = vtanh.f32 %v3795_v57  ;;  %v3797_v24 = vadd.f32 %v3793_v13, %v3789_v30 }
 0x3f0   :  { %5283 = vrcp.f32 %v3763_v53 }
 0x3f1   :  { %v5278_v42 = vpop.eup %5277  ;;  %5285 = vrcp.f32 %v3765_v59 }
 0x3f2   :  { %v5280_v17 = vpop.eup %5279  ;;  %v3340_v49 = vmul.f32 %v5278_v42, %v5274_v32  ;;  %5287 = vtanh.f32 %v3797_v24 }
 0x3f3   :  { %v3342_v6 = vmul.f32 %v5280_v17, %v5276_v33 }
 0x3f4   :  { %v3613_v63 = vmul.f32 %v3340_v49, %v7560_v19  ;;  %v3657_v16 = vmul.f32 %v3340_v49, %v6478_v54  ;;  %v3730_v7 = vmul.f32 %v7657_v51, %v3340_v49 }
 0x3f5   :  { %v3615_v10 = vmul.f32 %v3342_v6, %v7560_v19  ;;  %v3659_v0 = vmul.f32 %v3342_v6, %v6478_v54  ;;  %v3732_v3 = vmul.f32 %v7657_v51, %v3342_v6  ;;  %v3701_v19 = vmul.f32 %v3340_v49, %v7652_v47 }
 0x3f6   :  { %v3621_v5 = vrot.slane %v3613_v63, 1  ;;  %v3665_v56 = vrot.slane %v3657_v16, 1  ;;  %v3703_v8 = vmul.f32 %v3342_v6, %v7652_v47  ;;  %v3385_v51 = vrot.slane %v3340_v49, %v7651_v38 }
 0x3f7   :  { %v3623_v35 = vrot.slane %v3615_v10, 1  ;;  %v3667_v21 = vrot.slane %v3659_v0, 1  ;;  %v3393_v46 = vrot.slane %v3342_v6, %v7651_v38  ;;  %v3778_v49 = vrot.slane %v7203_v52, 1 }
 0x3f8   :  { %v3629_v37 = vadd.f32 %v3621_v5, %v7606_v60  ;;  %v3673_v28 = vadd.f32 %v3665_v56, %v7641_v29  ;;  %v3738_v60 = vrot.slane %v3730_v7, 1  ;;  %v3740_v29 = vrot.slane %v3732_v3, 1  ;;  %3403 = vperm.xlu0 %4296, %v3385_v51  }
 0x3f9   :  { %v5282_v55 = vpop.eup %5281  ;;  %v3631_v4 = vadd.f32 %v3623_v35, %v7607_v40  ;;  %v3675_v61 = vadd.f32 %v3667_v21, %v7608_v11  ;;  %v3709_v40 = vrot.slane %v3701_v19, 1  ;;  %v3711_v14 = vrot.slane %v3703_v8, 1 }
 0x3fa   :  { %v5284_v54 = vpop.eup %5283  ;;  %v4232_v48 = vmul.f32 -1.442695, %v3629_v37  ;;  %v4236_v43 = vmul.f32 -1.442695, %v3673_v28  ;;  %v3746_v47 = vadd.f32 %v3738_v60, %v7615_v45  ;;  %v3748_v58 = vadd.f32 %v3740_v29, %v7617_v18 }
 0x3fb   :  { %v5286_v50 = vpop.eup %5285  ;;  %v4234_v12 = vmul.f32 -1.442695, %v3631_v4  ;;  %v4238_v31 = vmul.f32 -1.442695, %v3675_v61  ;;  %v3803_v36 = vmul.f32 %v5284_v54, %v5282_v55  ;;  %v3717_v34 = vadd.f32 %v3709_v40, %v7616_v2  ;;  %v1577_v4 = vpop.permute.xlu1 %1576 }
 0x3fc   :  { %v5288_v39 = vpop.eup %5287  ;;  %5289 = vpow2.f32 %v4232_v48  ;;  %v3719_v1 = vadd.f32 %v3711_v14, %v7618_v44  ;;  %3409 = vperm.xlu0 %4296, %v3393_v46   ;;  %v4240_v53 = vmul.f32 -1.442695, %v3746_v47  ;;  %v4242_v25 = vmul.f32 -1.442695, %v3748_v58  ;;  %v1574_v61 = vpop.permute.xlu0 %1573 }
 0x3fd   :  { %5291 = vpow2.f32 %v4234_v12  ;;  %v3805_v11 = vmul.f32 %v5288_v39, %v5286_v50  ;;  %v3851_v22 = vrot.slane %v3803_v36, %v7664_v20  ;;  %v3817_v2 = vrot.slane %v7209_v23, %v7658_v62 }
 0x3fe   :  { %5293 = vpow2.f32 %v4236_v43  ;;  %v3780_v63 = vrot.slane %v7205_v26, 1 }
 0x3ff   :  { %5295 = vpow2.f32 %v4238_v31  ;;  %3868 = vperm.xlu1 %4295, %v3851_v22   ;;  %v3859_v15 = vrot.slane %v3805_v11, %v7664_v20  ;;  %v1583_v19 = vpop.permute.xlu1 %1582 }
 0x400   :  { %5297 = vtanh.f32 %v3717_v34  ;;  %3827 = vperm.xlu0 %4296, %v3809_v41   ;;  %v1580_v54 = vpop.permute.xlu0 %1579 }
 0x401   :  { %5299 = vtanh.f32 %v3719_v1 }
 0x402   :  { %5301 = vpow2.f32 %v4240_v53 }
 0x403   :  { %3874 = vperm.xlu1 %4295, %v3859_v15   ;;  %5303 = vpow2.f32 %v4242_v25  ;;  %v1992_v48 = vpop.permute.xlu1 %1991 }
 0x404   :  { %3833 = vperm.xlu0 %4296, %v3817_v2   ;;  %v1989_v43 = vpop.permute.xlu0 %1988  ;;  %v1584_v2 = vsel %vm600_vm1, %v1577_v4, %v1574_v61 }
 0x406   :  { %v5290_v45 = vpop.eup %5289 }
 0x407   :  { %v5292_v18 = vpop.eup %5291  ;;  %v3645_v38 = vadd.f32 1.0, %v5290_v45  ;;  %v1998_v8 = vpop.permute.xlu1 %1997 }
 0x408   :  { %v5294_v13 = vpop.eup %5293  ;;  %v3647_v44 = vadd.f32 1.0, %v5292_v18  ;;  %v1995_v50 = vpop.permute.xlu0 %1994 }
 0x409   :  { %v5296_v27 = vpop.eup %5295  ;;  %5305 = vrcp.f32 %v3645_v38  ;;  %v3689_v9 = vadd.f32 1.0, %v5294_v13 }
 0x40a   :  { %5307 = vrcp.f32 %v3647_v44  ;;  %v3691_v59 = vadd.f32 1.0, %v5296_v27  ;;  %v5298_v57 = vpop.eup %5297  ;;  %v1585_v27 = vsel %vm602_vm2, %v1580_v54, %v1584_v2 }
 0x40b   :  { %5309 = vrcp.f32 %v3689_v9  ;;  %v5300_v30 = vpop.eup %5299  ;;  %v2031_v12 = vpop.permute.xlu1 %2030  ;;  %v1999_v9 = vsel %vm600_vm1, %v1992_v48, %v1989_v43 }
 0x40c   :  { %5311 = vrcp.f32 %v3691_v59  ;;  %v5302_v32 = vpop.eup %5301  ;;  %v2028_v31 = vpop.permute.xlu0 %2027  ;;  %v2000_v59 = vsel %vm602_vm2, %v1995_v50, %v1999_v9 }
 0x40d   :  { %v5304_v33 = vpop.eup %5303  ;;  %v3762_v17 = vadd.f32 1.0, %v5302_v32  ;;  %v1586_v32 = vsel %vm604_vm3, %v1583_v19, %v1585_v27 }
 0x40e   :  { %v3764_v23 = vadd.f32 1.0, %v5304_v33  ;;  %v2038_v33 = vsel %vm600_vm1, %v2031_v12, %v2028_v31 }
 0x40f   :  { %5313 = vrcp.f32 %v3762_v17  ;;  %v2037_v60 = vpop.permute.xlu1 %2036 }
 0x410   :  { %5315 = vrcp.f32 %v3764_v23  ;;  %v2034_v39 = vpop.permute.xlu0 %2033 }
 0x413   :  { %v5306_v24 = vpop.eup %5305  ;;  %v2445_v29 = vpop.permute.xlu1 %2444 }
 0x414   :  { %v5308_v42 = vpop.eup %5307  ;;  %v3790_v6 = vmul.f32 %v5306_v24, %v5298_v57  ;;  %v2442_v51 = vpop.permute.xlu0 %2441  ;;  %v2039_v24 = vsel %vm602_vm2, %v2034_v39, %v2038_v33 }
 0x415   :  { %v5310_v62 = vpop.eup %5309  ;;  %v3792_v16 = vmul.f32 %v5308_v42, %v5300_v30  ;;  %v7665_v30 = vld [vmem:[#allocation70_spill] sm:$0xff]  ;;  %v2001_v42 = vsel %vm604_vm3, %v1998_v8, %v2000_v59  ;;  %v2452_v17 = vsel %vm600_vm1, %v2445_v29, %v2442_v51 }
 0x416   :  { %v5312_v10 = vpop.eup %5311  ;;  %v3786_v0 = vmul.f32 %v5310_v62, %v3778_v49  ;;  %vm1551_vm9 = vcmp.eq.s32.totalorder %v7665_v30, 5  ;;  %vm1966_vm10 = vcmp.eq.s32.totalorder %v7665_v30, 3  ;;  %vm2005_vm11 = vcmp.eq.s32.totalorder %v7665_v30, 4 }
 0x417   :  { %v3788_v5 = vmul.f32 %v5312_v10, %v3780_v63  ;;  %v2451_v36 = vpop.permute.xlu1 %2450  ;;  %v2040_v63 = vsel %vm604_vm3, %v2037_v60, %v2039_v24  ;;  %v2003_v10 = vsel %vm1966_vm10, %v2001_v42, 0.0 }
 0x418   :  { %v3794_v56 = vadd.f32 %v3790_v6, %v3786_v0  ;;  %v2448_v40 = vpop.permute.xlu0 %2447  ;;  %v1588_v6 = vsel %vm1551_vm9, %v1586_v32, 0.0 }
 0x419   :  { %v3796_v35 = vadd.f32 %v3792_v16, %v3788_v5  ;;  %v5314_v21 = vpop.eup %5313  ;;  %v2453_v62 = vsel %vm602_vm2, %v2448_v40, %v2452_v17  ;;  %v7666_v5 = vld [vmem:[#allocation40_spill] sm:$0xff] }
 0x41a   :  { %5317 = vtanh.f32 %v3794_v56  ;;  %v5316_v7 = vpop.eup %5315  ;;  %v1589_v56 = vadd.f32 %v1588_v6, %v7666_v5 }
 0x41b   :  { %5319 = vtanh.f32 %v3796_v35  ;;  %v2483_v11 = vpop.permute.xlu1 %2482  ;;  %v2454_v35 = vsel %vm604_vm3, %v2451_v36, %v2453_v62 }
 0x41c   :  { %v2480_v14 = vpop.permute.xlu0 %2479 }
 0x41d   :  { %v2490_v16 = vsel %vm600_vm1, %v2483_v11, %v2480_v14 }
 0x420   :  { %v2486_v22 = vpop.permute.xlu0 %2485 }
 0x421   :  { %v2491_v0 = vsel %vm602_vm2, %v2486_v22, %v2490_v16 }
 0x424   :  { %v5318_v37 = vpop.eup %5317  ;;  %v2904_v58 = vpop.permute.xlu0 %2903 }
 0x425   :  { %v5320_v28 = vpop.eup %5319  ;;  %v3802_v52 = vmul.f32 %v5318_v37, %v5314_v21  ;;  %v2042_v37 = vsel %vm2005_vm11, %v2040_v63, 0.0 }
 0x426   :  { %v3804_v3 = vmul.f32 %v5320_v28, %v5316_v7 }
 0x427   :  { %v3847_v55 = vrot.slane %v3802_v52, %v7664_v20  ;;  %v2004_v52 = vadd.f32 %v2003_v10, %v1589_v56  ;;  %v3901_v10 = vcvt.s32.f32 %v7665_v30 }
 0x428   :  { %v3855_v26 = vrot.slane %v3804_v3, %v7664_v20  ;;  %v2489_v20 = vpop.permute.xlu1 %2488  ;;  %v2910_v34 = vpop.permute.xlu0 %2909 }
 0x429   :  { %3865 = vperm.xlu0 %4296, %v3847_v55   ;;  %v2492_v3 = vsel %vm604_vm3, %v2489_v20, %v2491_v0  ;;  %v2043_v19 = vadd.f32 %v2042_v37, %v2004_v52  ;;  %v5460_v0 = vmov 0.0   ;;  %v5325_v37 = vld [vmem:[#allocation2] sm:$0xff] }
 0x42a   :  { %v2494_v43 = vsel %vm1966_vm10, %v2492_v3, 0.0  ;;  %v5461_v3 = vmov 0.0|0.0  }
 0x42b   :  { %4261 = vmatprep.subr.bf16.mxu0 %v5461_v3 }
 0x42c   :  { %v2907_v47 = vpop.permute.xlu1 %2906 }
 0x42d   :  { %3871 = vperm.xlu0 %4296, %v3855_v26   ;;  %v2914_v21 = vsel %vm600_vm1, %v2907_v47, %v2904_v58  ;;  %v2456_v26 = vsel %vm2005_vm11, %v2454_v35, 0.0 }
 0x42e   :  { %v2915_v28 = vsel %vm602_vm2, %v2910_v34, %v2914_v21  ;;  %v2457_v50 = vadd.f32 %v2456_v26, %v2043_v19  ;;  %v5328_v26 = vld [vmem:[#allocation2 + $0x18] sm:$0xff] }
 0x430   :  { %v2913_v46 = vpop.permute.xlu1 %2912  ;;  %v2495_v51 = vadd.f32 %v2494_v43, %v2457_v50 }
 0x431   :  { %v2916_v54 = vsel %vm604_vm3, %v2913_v46, %v2915_v28  ;;  %v5326_v28 = vld [vmem:[#allocation2 + $0x8] sm:$0xff] }
 0x432   :  { %v2918_v39 = vsel %vm1551_vm9, %v2916_v54, 0.0  ;;  %v4262_v52 = vpack.c.bf16 %v5326_v28, %v5325_v37  ;;  %vm3933_vm9 = vcmask 195584  }
 0x433   :  { %v2919_v22 = vadd.f32 %v2918_v39, %v2495_v51 }
 0x434   :  { %v2945_v1 = vpop.permute.xlu1 %2944  ;;  %4263 = vmatpush3.bf16.msra.mxu0 %v4262_v52 }
 0x435   :  { %4264 = vmatprep.subr.bf16.mxu0 %v5461_v3 }
 0x438   :  { %v2951_v15 = vpop.permute.xlu1 %2950 }
 0x43c   :  { %v3369_v25 = vpop.permute.xlu1 %3368 }
 0x440   :  { %v3375_v18 = vpop.permute.xlu1 %3374 }
 0x444   :  { %v3407_v13 = vpop.permute.xlu1 %3406 }
 0x447   :  { %v2942_v41 = vpop.permute.xlu0 %2941 }
 0x448   :  { %v2952_v55 = vsel %vm600_vm1, %v2945_v1, %v2942_v41 }
 0x44b   :  { %v3413_v57 = vpop.permute.xlu1 %3412 }
 0x44c   :  { %v2948_v53 = vpop.permute.xlu0 %2947 }
 0x44d   :  { %v2953_v4 = vsel %vm602_vm2, %v2948_v53, %v2952_v55  ;;  %v5327_v55 = vld [vmem:[#allocation2 + $0x10] sm:$0xff] }
 0x44e   :  { %v2954_v12 = vsel %vm604_vm3, %v2951_v15, %v2953_v4  ;;  %v4265_v4 = vpack.c.bf16 %v5328_v26, %v5327_v55 }
 0x44f   :  { %v3831_v23 = vpop.permute.xlu1 %3830  ;;  %v2956_v11 = vsel %vm1512_vm8, %v2954_v12, 0.0  ;;  %vm3931_vm8 = vcmask 130048  }
 0x450   :  { %v3366_v45 = vpop.permute.xlu0 %3365  ;;  %v2957_v46 = vadd.f32 %v2956_v11, %v2919_v22  ;;  %4266 = vmatpush3.bf16.msra.mxu0 %v4265_v4 }
 0x451   :  { %v3376_v48 = vsel %vm600_vm1, %v3369_v25, %v3366_v45 }
 0x454   :  { %v3372_v38 = vpop.permute.xlu0 %3371 }
 0x455   :  { %v3377_v8 = vsel %vm602_vm2, %v3372_v38, %v3376_v48 }
 0x456   :  { %v3378_v36 = vsel %vm604_vm3, %v3375_v18, %v3377_v8  ;;  %v7667_v8 = vld [vmem:[#allocation15_spill] sm:$0xff] }
 0x457   :  { %v3380_v58 = vsel %vm1097_vm7, %v3378_v36, 0.0  ;;  %v3939_v50 = vadd.s32 1, %v7667_v8  ;;  %v3937_v12 = vmul.u32 8, %v7667_v8 }
 0x458   :  { %v3381_v15 = vadd.f32 %v3380_v58, %v2957_v46 }
 0x45f   :  { %v3837_v61 = vpop.permute.xlu1 %3836 }
 0x477   :  { %v3404_v44 = vpop.permute.xlu0 %3403 }
 0x478   :  { %v3414_v31 = vsel %vm600_vm1, %v3407_v13, %v3404_v44  ;;  %v65_v13 = vld [vmem:[#allocation5] sm:$0xf] }
 0x479   :  { %vm3882_vm12 = vcmp.gt.f32.partialorder %v65_v13, 0.5 }
 0x47b   :  { %v3410_v49 = vpop.permute.xlu0 %3409 }
 0x47c   :  { %v3415_v29 = vsel %vm602_vm2, %v3410_v49, %v3414_v31  ;;  %v3940_v31 = vmul.u32 8, %v3939_v50 }
 0x47d   :  { %v3416_v47 = vsel %vm604_vm3, %v3413_v57, %v3415_v29 }
 0x47e   :  { %v3869_v20 = vpop.permute.xlu1 %3868  ;;  %v3418_v41 = vsel %vm1058_vm6, %v3416_v47, 0.0  ;;  %vm3938_vm6 = vcmp.ge.s32.totalorder %v7665_v30, %v3937_v12  ;;  %vm3941_vm7 = vcmp.lt.s32.totalorder %v7665_v30, %v3940_v31 }
 0x47f   :  { %v3828_v7 = vpop.permute.xlu0 %3827  ;;  %v3419_v45 = vadd.f32 %v3418_v41, %v3381_v15  ;;  %vm3942_vm10 = vmand %vm3938_vm6, %vm3941_vm7 }
 0x480   :  { %v3838_v40 = vsel %vm600_vm1, %v3831_v23, %v3828_v7 }
 0x482   :  { %v3875_v25 = vpop.permute.xlu1 %3874 }
 0x483   :  { %v3834_v60 = vpop.permute.xlu0 %3833 }
 0x484   :  { %v3839_v14 = vsel %vm602_vm2, %v3834_v60, %v3838_v40 }
 0x485   :  { %v3840_v34 = vsel %vm604_vm3, %v3837_v61, %v3839_v14 }
 0x486   :  { %v3842_v53 = vsel %vm609_vm5, %v3840_v34, 0.0  ;;  %vm3929_vm5 = vcmask 64512  }
 0x487   :  { %v3843_v44 = vadd.f32 %v3842_v53, %v3419_v45 }
 0x4a8   :  { %v3866_v1 = vpop.permute.xlu0 %3865 }
 0x4a9   :  { %v3876_v18 = vsel %vm600_vm1, %v3869_v20, %v3866_v1 }
 0x4ac   :  { %v3872_v38 = vpop.permute.xlu0 %3871 }
 0x4ad   :  { %v3877_v2 = vsel %vm602_vm2, %v3872_v38, %v3876_v18 }
 0x4ae   :  { %v3878_v27 = vsel %vm604_vm3, %v3875_v25, %v3877_v2  ;;  %vm5462_vm3 = vmmov 0  }
 0x4af   :  { %v3880_v9 = vsel %vm567_vm4, %v3878_v27, 0.0  ;;  %4258 = vmatprep.mubr.msk.f32.mxu0 %vm5462_vm3, %v5460_v0 }
 0x4b0   :  { %v3881_v59 = vadd.f32 %v3880_v9, %v3843_v44 }
 0x4b2   :  { %v3883_v57 = vsel %vm3882_vm12, %v3881_v59, -inf }
 0x4b3   :  { %v3885_v32 = vsel %vm3884_vm13, %v3883_v57, -inf }
 0x4b4   :  { %3886 = vmax.xlane.f32.xlu0 %v3885_v32 }
 0x541   :  { %v3887_v33 = vpop.xlane.xlu0 %3886 }
 0x542   :  { %v3888_v24 = vsub.f32 %v3883_v57, %v3887_v33 }
 0x544   :  { %v3889_v42 = vmul.f32 1.442695, %v3888_v24 }
 0x546   :  { %5321 = vpow2.f32 %v3889_v42 }
 0x550   :  { %v5322_v17 = vpop.eup %5321 }
 0x551   :  { %v3891_v49 = vsel %vm3884_vm13, %v5322_v17, 0.0 }
 0x552   :  { %3892 = vadd.xlane.f32.xlu1 %v3891_v49 }
 0x5df   :  { %v3893_v6 = vpop.xlane.xlu1 %3892 }
 0x5e0   :  { %5323 = vrcp.f32 %v3893_v6 }
 0x5ea   :  { %v5324_v62 = vpop.eup %5323 }
 0x5eb   :  { %v3895_v23 = vmul.f32 %v5324_v62, %v5322_v17 }
 0x5ed   :  { %4017 = vst.msk [vmem:[#allocation9] sm:$0xf] %vm3884_vm13, %v3895_v23  ;;  %v3902_v63 = vsel %vm3884_vm13, %v3895_v23, -inf  ;;  %vm3896_vm1 = vcmp.ge.f32.partialorder %v3895_v23, 0.1 }
 0x5ee   :  { %3903 = vmax.xlane.f32.xlu0 %v3902_v63  ;;  %v3897_v21 = vsel %vm3896_vm1, 1.0, %v5460_v0 }
 0x5ef   :  { %v3898_v7 = vsel %vm3884_vm13, %v3897_v21, -inf }
 0x67b   :  { %v3904_v16 = vpop.xlane.xlu0 %3903 }
 0x67c   :  { %vm3905_vm14 = vcmp.eq.f32.partialorder %v3895_v23, %v3904_v16 }
 0x67d   :  { %v3906_v5 = vsel %vm3905_vm14, 1.0, %v5460_v0 }
 0x67e   :  { %vm3907_vm15 = vcmp.gt.f32.partialorder %v3906_v5, 0.5 }
 0x67f   :  { %v3908_v56 = vsel %vm3907_vm15, %v3901_v10, 8.0 }
 0x680   :  { %v3909_v35 = vsel %vm3884_vm13, %v3908_v56, inf }
 0x681   :  { %3910 = vmin.xlane.f32.xlu0 %v3909_v35 }
 0x685   :  { %3899 = vmax.xlane.f32.xlu0 %v3898_v7 }
 0x70e   :  { %v3911_v61 = vpop.xlane.xlu0 %3910 }
 0x70f   :  { %vm3912_vm2 = vcmp.eq.f32.partialorder %v3901_v10, %v3911_v61 }
 0x710   :  { %v3913_v54 = vsel %vm3912_vm2, 1.0, %v5460_v0 }
 0x712   :  { %v3900_v19 = vpop.xlane.xlu0 %3899 }
 0x713   :  { %vm3914_vm4 = vcmp.gt.f32.partialorder %v3900_v19, 0.5 }
 0x714   :  { %v3917_v48 = vsel %vm3914_vm4, %v3897_v21, %v3913_v54 }
 0x715   :  { %v3918_v43 = vmul.f32 %v3917_v48, %v3895_v23 }
 0x717   :  { %3923 = vrot.lane.b32.xlu0 %v3918_v43, %s5463_s3  ;;  %3920 = vrot.lane.b32.xlu1 %v3918_v43, %s5450_s19 }
 0x71b   :  { %3926 = vrot.lane.b32.xlu1 %v3918_v43, %s5464_s11 }
 0x789   :  { %v3921_v60 = vpop.permute.xlu1 %3920  ;;  %v3924_v39 = vpop.permute.xlu0 %3923 }
 0x78a   :  { %v3930_v29 = vsel %vm3929_vm5, %v3918_v43, %v3921_v60 }
 0x78b   :  { %v3932_v51 = vsel %vm3931_vm8, %v3930_v29, %v3924_v39 }
 0x78d   :  { %v3927_v36 = vpop.permute.xlu1 %3926 }
 0x78e   :  { %v3934_v40 = vsel %vm3933_vm9, %v3932_v51, %v3927_v36 }
 0x78f   :  { %v3943_v11 = vsel %vm3942_vm10, %v3934_v40, 0.0 }
 0x790   :  { %4259 = vmatmul.mubr.msk.f32.vlgmr.msra.gmra.mrb[0].mxu0 %vm77_vm0, %v3943_v11 }
 0x791   :  { %5406 = shalt.err (!%p5403_p0)
}
 0x792   :  { %s5407_s17 = scalar_lea.hbm %s7340_s6, 64 }
 0x793   :  { %p5408_p1 = scmp.ne.s32.totalorder %s7340_s6, %s5407_s17  ;;  %p5411_p2 = scmp.lt.u32.totalorder %s5407_s17, %s7340_s6 }
 0x795   :  { %p5413_p3 = pnand %p5411_p2, %p5408_p1 }
 0x797   :  { %5416 = shalt.err (!%p5413_p3)
}
 0x798   :  { %4039 = dma.vmem_to_hbm [thread:$0]  %s4037_s13, 64, %s7340_s6, [#allocation10]   ;;  %vm4018_vm0 = vcmask 257024  }
 0x799   :  { %s5466_s23 = smov [#allocation8]  }
 0x79a   :  { %s4026_s25 = sshll.u32 %s5466_s23, 4  ;;  %s4027_s25 = int_to_ptr.vmem [resolvable:$true] %s4026_s25 }
 0x79b   :  { %s5417_s26 = scalar_lea.vmem %s4027_s25, 64  ;;  %p5422_p5 = scmp.lt.s32.totalorder %s4027_s25, %s4027_s25 }
 0x79c   :  { %p5418_p4 = scmp.ne.s32.totalorder %s4027_s25, %s5417_s26  ;;  %p5423_p6 = scmp.lt.s32.totalorder %s5417_s26, %s5417_s26 }
 0x79e   :  { %p5424_p7 = por %p5423_p6, %p5422_p5 }
 0x7a0   :  { %p5425_p8 = pnand %p5424_p7, %p5418_p4 }
 0x863   :  { %v4013_v30 = vpop.f32.mrb[0].mxu0 }
 0x864   :  { %v4260_v14 = vpop.f32.mrb[1].mxu0  ;;  %4019 = vst.msk [vmem:[#allocation8] sm:$0xf] %vm4018_vm0, %v4013_v30 }
 0x865   :  { %5428 = shalt.err (!%p5425_p8)
}
 0x866   :  { %s5429_s29 = scalar_lea.hbm %s7339_s5, 64 }
 0x867   :  { %p5430_p9 = scmp.ne.s32.totalorder %s7339_s5, %s5429_s29  ;;  %p5433_p10 = scmp.lt.u32.totalorder %s5429_s29, %s7339_s5 }
 0x869   :  { %p5435_p11 = pnand %p5433_p10, %p5430_p9 }
 0x86b   :  { %5438 = shalt.err (!%p5435_p11)
}
 0x86c   :  { %4029 = dma.vmem_to_hbm [thread:$0]  %s4027_s25, 64, %s7339_s5, [#allocation4]  }
 0x86d   :  { %5443 = dma.done.wait [#allocation4], 64  }
 0x86e   :  { %5444 = vsyncadd [#allocation4], 4294967232 }
 0x86f   :  { %5445 = dma.done.wait [#allocation10], 64  }
 0x870   :  { %5446 = vsyncadd [#allocation10], 4294967232 }
 0x871   :  { %4046 = vsyncpa [#allocation3], 1 }
 0x872   :  { %4047 = vsyncpa [#allocation6], 1 }
 0x873   :  { %4048 = vsyncpa [#allocation4], 1 }
 0x874   :  { %4049 = vsyncpa [#allocation10], 1 }

</bundles_post_ra>
